<compile_context>
chip_gen: v7x
topology: tpu7x:2x2x1
jax: 0.10.0
libtpu: 0.0.40
codegen_flags: <defaults>
</compile_context>

<pallas_src>
import jax
import jax.numpy as jnp
from jax.experimental import pallas as pl
from jax.experimental.pallas import tpu as pltpu


_LEAKY_SLOPE = 0.2
_BN_EPS = 0.8  # nn.BatchNorm1d(out_feat, 0.8) -> eps = 0.8 (intentional)


def _leaky_relu(x):
    return jnp.where(x > 0, x, _LEAKY_SLOPE * x)


def _generator_kernel(z_ref, w0_ref, b0_ref, w1_ref, p1_ref, w2_ref, p2_ref,
                      w3_ref, p3_ref, w4_ref, b4_ref, o_ref, h_ref):
    """Whole generator forward; one grid step = one output-feature tile of the
    final Linear.

    z_ref      : (B, latent) f32   — whole batch (never tiled -> BN stats valid)
    w0..w3     : bf16 trunk weights (constant block index, DMA'd once)
    b0         : (1, 128) f32 bias of the un-normalized first block
    p1..p3     : (2, N) f32 = [gamma; beta]   (Linear bias dropped: cancels in BN)
    w4, b4     : final-layer bf16 weight tile / f32 bias tile for this step
    h_ref      : (B, 1024) bf16 VMEM scratch holding the trunk output
    """
    # ---- Trunk (layers 0-3): computed once, cached in VMEM scratch. Safe
    # because the grid axis is "arbitrary" (sequential on a single core).
    @pl.when(pl.program_id(0) == 0)
    def _trunk():
        # Layer 0: Linear(latent, 128) + LeakyReLU(0.2)   (normalize=False)
        h = jnp.dot(z_ref[...].astype(jnp.bfloat16), w0_ref[...],
                    preferred_element_type=jnp.float32)
        h = _leaky_relu(h + b0_ref[...])

        # Layers 1-3: Linear (bias-free) + BatchNorm1d(eps=0.8, batch stats)
        #             + LeakyReLU(0.2).  BN folded to one FMA per element.
        for w_ref, p_ref in ((w1_ref, p1_ref), (w2_ref, p2_ref), (w3_ref, p3_ref)):
            h = jnp.dot(h.astype(jnp.bfloat16), w_ref[...],
                        preferred_element_type=jnp.float32)
            mean = jnp.mean(h, axis=0, keepdims=True)       # biased batch stats
            var = jnp.mean((h - mean) ** 2, axis=0, keepdims=True)
            p = p_ref[...]                                   # (2, N): gamma, beta
            scale = p[0:1, :] * jax.lax.rsqrt(var + _BN_EPS)
            shift = p[1:2, :] - mean * scale
            h = _leaky_relu(h * scale + shift)

        h_ref[...] = h.astype(jnp.bfloat16)

    # ---- Final layer tile: Linear(1024, C*H*W) + Tanh
    out = jnp.dot(h_ref[...], w4_ref[...], preferred_element_type=jnp.float32)
    o_ref[...] = jnp.tanh(out + b4_ref[...]).astype(o_ref.dtype)


def _pick_tile(n_out, k_dim, budget_bytes=8 * 1024 * 1024):
    """Keep the whole bf16 final weight resident (grid=(1,)) when its
    double-buffered copy fits the budget; otherwise split lane-dense."""
    if 2 * n_out * k_dim * 2 <= budget_bytes:       # 2 bufs * bytes(bf16 W4)
        return n_out
    for t in (2048, 1024, 512, 256, 128):
        if n_out % t == 0:
            return t
    return n_out


def generator_forward(params, z, img_shape):
    """Single fused Pallas call for the whole generator; returns (B, C, H, W)."""
    B, _latent = z.shape
    C, H, W = img_shape
    n_out = C * H * W

    bf16 = jnp.bfloat16
    w0 = params[0]["w"].astype(bf16)
    w1 = params[1]["w"].astype(bf16)
    w2 = params[2]["w"].astype(bf16)
    w3 = params[3]["w"].astype(bf16)
    w4 = params[4]["w"].astype(bf16)

    b0 = params[0]["b"].reshape(1, -1)                                   # f32
    packed = [jnp.stack([params[i]["gamma"], params[i]["beta"]], axis=0)  # (2,N)
              for i in (1, 2, 3)]
    b4 = params[4]["b"].reshape(1, -1)                                   # f32

    trunk_width = w4.shape[0]                   # 1024
    tile_out = _pick_tile(n_out, trunk_width)

    const = lambda j: (0, 0)
    in_specs = [
        pl.BlockSpec(z.shape, const),                         # z (whole batch)
        pl.BlockSpec(w0.shape, const),                        # W0 (bf16)
        pl.BlockSpec(b0.shape, const),                        # b0
        pl.BlockSpec(w1.shape, const),                        # W1 (bf16)
        pl.BlockSpec(packed[0].shape, const),                 # [g1; be1]
        pl.BlockSpec(w2.shape, const),                        # W2 (bf16)
        pl.BlockSpec(packed[1].shape, const),                 # [g2; be2]
        pl.BlockSpec(w3.shape, const),                        # W3 (bf16)
        pl.BlockSpec(packed[2].shape, const),                 # [g3; be3]
        pl.BlockSpec((trunk_width, tile_out), lambda j: (0, j)),  # W4 tile
        pl.BlockSpec((1, tile_out), lambda j: (0, j)),            # b4 tile
    ]
    out_spec = pl.BlockSpec((B, tile_out), lambda j: (0, j))

    flat = pl.pallas_call(
        _generator_kernel,
        out_shape=jax.ShapeDtypeStruct((B, n_out), z.dtype),
        grid_spec=pltpu.PrefetchScalarGridSpec(
            num_scalar_prefetch=0,
            grid=(n_out // tile_out,),
            in_specs=in_specs,
            out_specs=out_spec,
            scratch_shapes=[pltpu.VMEM((B, trunk_width), jnp.bfloat16)],
        ),
        compiler_params=pltpu.CompilerParams(
            # "arbitrary": single-core sequential execution makes the
            # pl.when(j==0) trunk hoist safe; "parallel" buys nothing here.
            dimension_semantics=("arbitrary",),
            vmem_limit_bytes=32 * 1024 * 1024,
        ),
    )(z, w0, b0, w1, packed[0], w2, packed[1], w3, packed[2], w4, b4)

    return flat.reshape(B, C, H, W)


def init_generator_params(key, latent_dim, img_shape):
    """Deterministic init matching the PyTorch module's layer shapes.
    Linear: U(-1/sqrt(fan_in), 1/sqrt(fan_in)); BatchNorm: gamma=1, beta=0."""
    C, H, W = img_shape
    dims = [latent_dim, 128, 256, 512, 1024, C * H * W]
    params = []
    for i in range(5):
        key, kw, kb = jax.random.split(key, 3)
        bound = 1.0 / float(dims[i]) ** 0.5
        w = jax.random.uniform(kw, (dims[i], dims[i + 1]), jnp.float32,
                               minval=-bound, maxval=bound)
        b = jax.random.uniform(kb, (dims[i + 1],), jnp.float32,
                               minval=-bound, maxval=bound)
        layer = {"w": w, "b": b}
        if i in (1, 2, 3):  # blocks with normalize=True
            layer["gamma"] = jnp.ones((dims[i + 1],), jnp.float32)
            layer["beta"] = jnp.zeros((dims[i + 1],), jnp.float32)
        params.append(layer)
    return params


def reference_forward_bf16(params, z, img_shape):
    """Pure-JAX reference mirroring the kernel's low-precision path exactly:
    bf16 matmul operands, f32 accumulate, f32 elementwise, bias-free BN."""
    bf16 = jnp.bfloat16
    h = jnp.dot(z.astype(bf16), params[0]["w"].astype(bf16),
                preferred_element_type=jnp.float32)
    h = _leaky_relu(h + params[0]["b"])
    for i in (1, 2, 3):
        h = jnp.dot(h.astype(bf16), params[i]["w"].astype(bf16),
                    preferred_element_type=jnp.float32)
        mean = h.mean(axis=0, keepdims=True)
        var = ((h - mean) ** 2).mean(axis=0, keepdims=True)
        scale = params[i]["gamma"] * jax.lax.rsqrt(var + _BN_EPS)
        shift = params[i]["beta"] - mean * scale
        h = _leaky_relu(h * scale + shift)
    out = jnp.dot(h.astype(bf16), params[4]["w"].astype(bf16),
                  preferred_element_type=jnp.float32)
    return jnp.tanh(out + params[4]["b"]).reshape(z.shape[0], *img_shape)


def reference_forward_f32(params, z, img_shape):
    """Full-f32, PyTorch-faithful reference (training-mode BN, biases kept)."""
    h = _leaky_relu(z @ params[0]["w"] + params[0]["b"])
    for i in (1, 2, 3):
        h = h @ params[i]["w"] + params[i]["b"]
        mean = h.mean(axis=0, keepdims=True)
        var = ((h - mean) ** 2).mean(axis=0, keepdims=True)
        h = (h - mean) / jnp.sqrt(var + _BN_EPS)
        h = h * params[i]["gamma"] + params[i]["beta"]
        h = _leaky_relu(h)
    h = jnp.tanh(h @ params[4]["w"] + params[4]["b"])
    return h.reshape(z.shape[0], *img_shape)


if __name__ == "__main__":
    # Small shapes consistent with the module's forward:
    # latent_dim=32, img_shape=(channels=4, img_size=16, img_size=16), batch=8.
    batch = 8
    latent_dim = 32
    img_shape = (4, 16, 16)

    key = jax.random.PRNGKey(0)
    key, zkey = jax.random.split(key)
    z = jax.random.normal(zkey, (batch, latent_dim), dtype=jnp.float32)

    params = init_generator_params(key, latent_dim, img_shape)

    img = jax.block_until_ready(generator_forward(params, z, img_shape))
    assert img.shape == (batch,) + img_shape

    # Tight check against a reference that mirrors the bf16-weight kernel path.
    ref_lp = reference_forward_bf16(params, z, img_shape)
    assert jnp.allclose(img, ref_lp, atol=2e-3, rtol=2e-3), (
        "bf16-path mismatch, max|diff|=%.3e"
        % float(jnp.max(jnp.abs(img - ref_lp))))

    # Loose semantic check against the full-f32 PyTorch-faithful reference
    # (difference is pure bf16 weight/activation quantization error).
    ref_f32 = reference_forward_f32(params, z, img_shape)
    assert jnp.allclose(img, ref_f32, atol=1e-1, rtol=0.0), (
        "f32 semantic mismatch, max|diff|=%.3e"
        % float(jnp.max(jnp.abs(img - ref_f32))))

    print("KERNEL_OK")
</pallas_src>

<mosaic_0001>
module attributes {stable_mosaic.version = 11 : i64} {
  func.func @_generator_kernel(%arg0: i32, %arg1: memref<8x32xf32, #tpu.memory_space<vmem>>, %arg2: memref<32x128xbf16, #tpu.memory_space<vmem>>, %arg3: memref<1x128xf32, #tpu.memory_space<vmem>>, %arg4: memref<128x256xbf16, #tpu.memory_space<vmem>>, %arg5: memref<2x256xf32, #tpu.memory_space<vmem>>, %arg6: memref<256x512xbf16, #tpu.memory_space<vmem>>, %arg7: memref<2x512xf32, #tpu.memory_space<vmem>>, %arg8: memref<512x1024xbf16, #tpu.memory_space<vmem>>, %arg9: memref<2x1024xf32, #tpu.memory_space<vmem>>, %arg10: memref<1024x1024xbf16, #tpu.memory_space<vmem>>, %arg11: memref<1x1024xf32, #tpu.memory_space<vmem>>, %arg12: memref<8x1024xf32, #tpu.memory_space<vmem>>, %arg13: memref<8x1024xbf16, #tpu.memory_space<vmem>>) attributes {dimension_semantics = [#tpu.dimension_semantics<arbitrary>], iteration_bounds = array<i64: 1>, scalar_prefetch = 0 : i64, scratch_operands = 1 : i64, tpu.core_type = #tpu.core_type<tc>, window_params = [{pipeline_mode = #tpu.pipeline_mode<synchronous>, transform_indices = @transform_0, window_bounds = array<i64: 8, 32>}, {pipeline_mode = #tpu.pipeline_mode<synchronous>, transform_indices = @transform_1, window_bounds = array<i64: 32, 128>}, {pipeline_mode = #tpu.pipeline_mode<synchronous>, transform_indices = @transform_2, window_bounds = array<i64: 1, 128>}, {pipeline_mode = #tpu.pipeline_mode<synchronous>, transform_indices = @transform_3, window_bounds = array<i64: 128, 256>}, {pipeline_mode = #tpu.pipeline_mode<synchronous>, transform_indices = @transform_4, window_bounds = array<i64: 2, 256>}, {pipeline_mode = #tpu.pipeline_mode<synchronous>, transform_indices = @transform_5, window_bounds = array<i64: 256, 512>}, {pipeline_mode = #tpu.pipeline_mode<synchronous>, transform_indices = @transform_6, window_bounds = array<i64: 2, 512>}, {pipeline_mode = #tpu.pipeline_mode<synchronous>, transform_indices = @transform_7, window_bounds = array<i64: 512, 1024>}, {pipeline_mode = #tpu.pipeline_mode<synchronous>, transform_indices = @transform_8, window_bounds = array<i64: 2, 1024>}, {transform_indices = @transform_9, window_bounds = array<i64: 1024, 1024>}, {transform_indices = @transform_10, window_bounds = array<i64: 1, 1024>}, {transform_indices = @transform_11, window_bounds = array<i64: 8, 1024>}]} {
    %c0_i32 = arith.constant 0 : i32
    %0 = arith.cmpi eq, %arg0, %c0_i32 : i32
    %1 = arith.extui %0 : i1 to i32
    %c0_i32_0 = arith.constant 0 : i32
    %2 = arith.cmpi ne, %1, %c0_i32_0 : i32
    scf.if %2 {
      %c0_8 = arith.constant 0 : index
      %c0_9 = arith.constant 0 : index
      %11 = vector.load %arg1[%c0_8, %c0_9] : memref<8x32xf32, #tpu.memory_space<vmem>>, vector<8x32xf32>
      %12 = arith.truncf %11 : vector<8x32xf32> to vector<8x32xbf16>
      %c0_10 = arith.constant 0 : index
      %c0_11 = arith.constant 0 : index
      %13 = vector.load %arg2[%c0_10, %c0_11] : memref<32x128xbf16, #tpu.memory_space<vmem>>, vector<32x128xbf16>
      %cst_12 = arith.constant dense<0.000000e+00> : vector<8x128xf32>
      %14 = tpu.matmul %12, %13, %cst_12 {dimension_numbers = #tpu.dot_dimension_numbers<[1], [0], [0], [1], [0, 0, 1, 1], [], []>} : vector<8x32xbf16>, vector<32x128xbf16>, vector<8x128xf32> -> vector<8x128xf32>
      %c0_13 = arith.constant 0 : index
      %c0_14 = arith.constant 0 : index
      %15 = vector.load %arg3[%c0_13, %c0_14] : memref<1x128xf32, #tpu.memory_space<vmem>>, vector<1x128xf32>
      %16 = vector.broadcast %15 : vector<1x128xf32> to vector<8x128xf32>
      %17 = arith.addf %14, %16 : vector<8x128xf32>
      %cst_15 = arith.constant 0.000000e+00 : f32
      %18 = vector.broadcast %cst_15 : f32 to vector<8x128xf32>
      %19 = arith.cmpf ogt, %17, %18 : vector<8x128xf32>
      %cst_16 = arith.constant 2.000000e-01 : f32
      %20 = vector.broadcast %cst_16 : f32 to vector<8x128xf32>
      %21 = arith.mulf %20, %17 : vector<8x128xf32>
      %22 = arith.select %19, %17, %21 : vector<8x128xi1>, vector<8x128xf32>
      %23 = arith.truncf %22 : vector<8x128xf32> to vector<8x128xbf16>
      %c0_17 = arith.constant 0 : index
      %c0_18 = arith.constant 0 : index
      %24 = vector.load %arg4[%c0_17, %c0_18] : memref<128x256xbf16, #tpu.memory_space<vmem>>, vector<128x256xbf16>
      %cst_19 = arith.constant dense<0.000000e+00> : vector<8x256xf32>
      %25 = tpu.matmul %23, %24, %cst_19 {dimension_numbers = #tpu.dot_dimension_numbers<[1], [0], [0], [1], [0, 0, 1, 1], [], []>} : vector<8x128xbf16>, vector<128x256xbf16>, vector<8x256xf32> -> vector<8x256xf32>
      %cst_20 = arith.constant dense<0.000000e+00> : vector<256xf32>
      %26 = vector.multi_reduction <add>, %25, %cst_20 [0] : vector<8x256xf32> to vector<256xf32>
      %27 = vector.shape_cast %26 : vector<256xf32> to vector<1x256xf32>
      %cst_21 = arith.constant 8.000000e+00 : f32
      %28 = vector.broadcast %cst_21 : f32 to vector<1x256xf32>
      %29 = arith.divf %27, %28 : vector<1x256xf32>
      %30 = vector.broadcast %29 : vector<1x256xf32> to vector<8x256xf32>
      %31 = arith.subf %25, %30 : vector<8x256xf32>
      %32 = arith.mulf %31, %31 : vector<8x256xf32>
      %cst_22 = arith.constant dense<0.000000e+00> : vector<256xf32>
      %33 = vector.multi_reduction <add>, %32, %cst_22 [0] : vector<8x256xf32> to vector<256xf32>
      %34 = vector.shape_cast %33 : vector<256xf32> to vector<1x256xf32>
      %cst_23 = arith.constant 8.000000e+00 : f32
      %35 = vector.broadcast %cst_23 : f32 to vector<1x256xf32>
      %36 = arith.divf %34, %35 : vector<1x256xf32>
      %c0_24 = arith.constant 0 : index
      %c0_25 = arith.constant 0 : index
      %37 = vector.load %arg5[%c0_24, %c0_25] : memref<2x256xf32, #tpu.memory_space<vmem>>, vector<2x256xf32>
      %38 = vector.extract_strided_slice %37 {offsets = [0, 0], sizes = [1, 256], strides = [1, 1]} : vector<2x256xf32> to vector<1x256xf32>
      %cst_26 = arith.constant 8.000000e-01 : f32
      %39 = vector.broadcast %cst_26 : f32 to vector<1x256xf32>
      %40 = arith.addf %36, %39 : vector<1x256xf32>
      %41 = math.rsqrt %40 : vector<1x256xf32>
      %42 = arith.mulf %38, %41 : vector<1x256xf32>
      %43 = vector.extract_strided_slice %37 {offsets = [1, 0], sizes = [1, 256], strides = [1, 1]} : vector<2x256xf32> to vector<1x256xf32>
      %44 = arith.mulf %29, %42 : vector<1x256xf32>
      %45 = arith.subf %43, %44 : vector<1x256xf32>
      %46 = vector.broadcast %42 : vector<1x256xf32> to vector<8x256xf32>
      %47 = arith.mulf %25, %46 : vector<8x256xf32>
      %48 = vector.broadcast %45 : vector<1x256xf32> to vector<8x256xf32>
      %49 = arith.addf %47, %48 : vector<8x256xf32>
      %cst_27 = arith.constant 0.000000e+00 : f32
      %50 = vector.broadcast %cst_27 : f32 to vector<8x256xf32>
      %51 = arith.cmpf ogt, %49, %50 : vector<8x256xf32>
      %cst_28 = arith.constant 2.000000e-01 : f32
      %52 = vector.broadcast %cst_28 : f32 to vector<8x256xf32>
      %53 = arith.mulf %52, %49 : vector<8x256xf32>
      %54 = arith.select %51, %49, %53 : vector<8x256xi1>, vector<8x256xf32>
      %55 = arith.truncf %54 : vector<8x256xf32> to vector<8x256xbf16>
      %c0_29 = arith.constant 0 : index
      %c0_30 = arith.constant 0 : index
      %56 = vector.load %arg6[%c0_29, %c0_30] : memref<256x512xbf16, #tpu.memory_space<vmem>>, vector<256x512xbf16>
      %cst_31 = arith.constant dense<0.000000e+00> : vector<8x512xf32>
      %57 = tpu.matmul %55, %56, %cst_31 {dimension_numbers = #tpu.dot_dimension_numbers<[1], [0], [0], [1], [0, 0, 1, 1], [], []>} : vector<8x256xbf16>, vector<256x512xbf16>, vector<8x512xf32> -> vector<8x512xf32>
      %cst_32 = arith.constant dense<0.000000e+00> : vector<512xf32>
      %58 = vector.multi_reduction <add>, %57, %cst_32 [0] : vector<8x512xf32> to vector<512xf32>
      %59 = vector.shape_cast %58 : vector<512xf32> to vector<1x512xf32>
      %cst_33 = arith.constant 8.000000e+00 : f32
      %60 = vector.broadcast %cst_33 : f32 to vector<1x512xf32>
      %61 = arith.divf %59, %60 : vector<1x512xf32>
      %62 = vector.broadcast %61 : vector<1x512xf32> to vector<8x512xf32>
      %63 = arith.subf %57, %62 : vector<8x512xf32>
      %64 = arith.mulf %63, %63 : vector<8x512xf32>
      %cst_34 = arith.constant dense<0.000000e+00> : vector<512xf32>
      %65 = vector.multi_reduction <add>, %64, %cst_34 [0] : vector<8x512xf32> to vector<512xf32>
      %66 = vector.shape_cast %65 : vector<512xf32> to vector<1x512xf32>
      %cst_35 = arith.constant 8.000000e+00 : f32
      %67 = vector.broadcast %cst_35 : f32 to vector<1x512xf32>
      %68 = arith.divf %66, %67 : vector<1x512xf32>
      %c0_36 = arith.constant 0 : index
      %c0_37 = arith.constant 0 : index
      %69 = vector.load %arg7[%c0_36, %c0_37] : memref<2x512xf32, #tpu.memory_space<vmem>>, vector<2x512xf32>
      %70 = vector.extract_strided_slice %69 {offsets = [0, 0], sizes = [1, 512], strides = [1, 1]} : vector<2x512xf32> to vector<1x512xf32>
      %cst_38 = arith.constant 8.000000e-01 : f32
      %71 = vector.broadcast %cst_38 : f32 to vector<1x512xf32>
      %72 = arith.addf %68, %71 : vector<1x512xf32>
      %73 = math.rsqrt %72 : vector<1x512xf32>
      %74 = arith.mulf %70, %73 : vector<1x512xf32>
      %75 = vector.extract_strided_slice %69 {offsets = [1, 0], sizes = [1, 512], strides = [1, 1]} : vector<2x512xf32> to vector<1x512xf32>
      %76 = arith.mulf %61, %74 : vector<1x512xf32>
      %77 = arith.subf %75, %76 : vector<1x512xf32>
      %78 = vector.broadcast %74 : vector<1x512xf32> to vector<8x512xf32>
      %79 = arith.mulf %57, %78 : vector<8x512xf32>
      %80 = vector.broadcast %77 : vector<1x512xf32> to vector<8x512xf32>
      %81 = arith.addf %79, %80 : vector<8x512xf32>
      %cst_39 = arith.constant 0.000000e+00 : f32
      %82 = vector.broadcast %cst_39 : f32 to vector<8x512xf32>
      %83 = arith.cmpf ogt, %81, %82 : vector<8x512xf32>
      %cst_40 = arith.constant 2.000000e-01 : f32
      %84 = vector.broadcast %cst_40 : f32 to vector<8x512xf32>
      %85 = arith.mulf %84, %81 : vector<8x512xf32>
      %86 = arith.select %83, %81, %85 : vector<8x512xi1>, vector<8x512xf32>
      %87 = arith.truncf %86 : vector<8x512xf32> to vector<8x512xbf16>
      %c0_41 = arith.constant 0 : index
      %c0_42 = arith.constant 0 : index
      %88 = vector.load %arg8[%c0_41, %c0_42] : memref<512x1024xbf16, #tpu.memory_space<vmem>>, vector<512x1024xbf16>
      %cst_43 = arith.constant dense<0.000000e+00> : vector<8x1024xf32>
      %89 = tpu.matmul %87, %88, %cst_43 {dimension_numbers = #tpu.dot_dimension_numbers<[1], [0], [0], [1], [0, 0, 1, 1], [], []>} : vector<8x512xbf16>, vector<512x1024xbf16>, vector<8x1024xf32> -> vector<8x1024xf32>
      %cst_44 = arith.constant dense<0.000000e+00> : vector<1024xf32>
      %90 = vector.multi_reduction <add>, %89, %cst_44 [0] : vector<8x1024xf32> to vector<1024xf32>
      %91 = vector.shape_cast %90 : vector<1024xf32> to vector<1x1024xf32>
      %cst_45 = arith.constant 8.000000e+00 : f32
      %92 = vector.broadcast %cst_45 : f32 to vector<1x1024xf32>
      %93 = arith.divf %91, %92 : vector<1x1024xf32>
      %94 = vector.broadcast %93 : vector<1x1024xf32> to vector<8x1024xf32>
      %95 = arith.subf %89, %94 : vector<8x1024xf32>
      %96 = arith.mulf %95, %95 : vector<8x1024xf32>
      %cst_46 = arith.constant dense<0.000000e+00> : vector<1024xf32>
      %97 = vector.multi_reduction <add>, %96, %cst_46 [0] : vector<8x1024xf32> to vector<1024xf32>
      %98 = vector.shape_cast %97 : vector<1024xf32> to vector<1x1024xf32>
      %cst_47 = arith.constant 8.000000e+00 : f32
      %99 = vector.broadcast %cst_47 : f32 to vector<1x1024xf32>
      %100 = arith.divf %98, %99 : vector<1x1024xf32>
      %c0_48 = arith.constant 0 : index
      %c0_49 = arith.constant 0 : index
      %101 = vector.load %arg9[%c0_48, %c0_49] : memref<2x1024xf32, #tpu.memory_space<vmem>>, vector<2x1024xf32>
      %102 = vector.extract_strided_slice %101 {offsets = [0, 0], sizes = [1, 1024], strides = [1, 1]} : vector<2x1024xf32> to vector<1x1024xf32>
      %cst_50 = arith.constant 8.000000e-01 : f32
      %103 = vector.broadcast %cst_50 : f32 to vector<1x1024xf32>
      %104 = arith.addf %100, %103 : vector<1x1024xf32>
      %105 = math.rsqrt %104 : vector<1x1024xf32>
      %106 = arith.mulf %102, %105 : vector<1x1024xf32>
      %107 = vector.extract_strided_slice %101 {offsets = [1, 0], sizes = [1, 1024], strides = [1, 1]} : vector<2x1024xf32> to vector<1x1024xf32>
      %108 = arith.mulf %93, %106 : vector<1x1024xf32>
      %109 = arith.subf %107, %108 : vector<1x1024xf32>
      %110 = vector.broadcast %106 : vector<1x1024xf32> to vector<8x1024xf32>
      %111 = arith.mulf %89, %110 : vector<8x1024xf32>
      %112 = vector.broadcast %109 : vector<1x1024xf32> to vector<8x1024xf32>
      %113 = arith.addf %111, %112 : vector<8x1024xf32>
      %cst_51 = arith.constant 0.000000e+00 : f32
      %114 = vector.broadcast %cst_51 : f32 to vector<8x1024xf32>
      %115 = arith.cmpf ogt, %113, %114 : vector<8x1024xf32>
      %cst_52 = arith.constant 2.000000e-01 : f32
      %116 = vector.broadcast %cst_52 : f32 to vector<8x1024xf32>
      %117 = arith.mulf %116, %113 : vector<8x1024xf32>
      %118 = arith.select %115, %113, %117 : vector<8x1024xi1>, vector<8x1024xf32>
      %119 = arith.truncf %118 : vector<8x1024xf32> to vector<8x1024xbf16>
      %c0_53 = arith.constant 0 : index
      %c0_54 = arith.constant 0 : index
      %120 = vector.load %arg13[%c0_53, %c0_54] : memref<8x1024xbf16, #tpu.memory_space<vmem>>, vector<8x1024xbf16>
      tpu.vector_store %arg13[%c0_53, %c0_54], %119 {strides = array<i32>} : memref<8x1024xbf16, #tpu.memory_space<vmem>>, vector<8x1024xbf16>,
    } else {
    }
    %c0 = arith.constant 0 : index
    %c0_1 = arith.constant 0 : index
    %3 = vector.load %arg13[%c0, %c0_1] : memref<8x1024xbf16, #tpu.memory_space<vmem>>, vector<8x1024xbf16>
    %c0_2 = arith.constant 0 : index
    %c0_3 = arith.constant 0 : index
    %4 = vector.load %arg10[%c0_2, %c0_3] : memref<1024x1024xbf16, #tpu.memory_space<vmem>>, vector<1024x1024xbf16>
    %cst = arith.constant dense<0.000000e+00> : vector<8x1024xf32>
    %5 = tpu.matmul %3, %4, %cst {dimension_numbers = #tpu.dot_dimension_numbers<[1], [0], [0], [1], [0, 0, 1, 1], [], []>} : vector<8x1024xbf16>, vector<1024x1024xbf16>, vector<8x1024xf32> -> vector<8x1024xf32>
    %c0_4 = arith.constant 0 : index
    %c0_5 = arith.constant 0 : index
    %6 = vector.load %arg11[%c0_4, %c0_5] : memref<1x1024xf32, #tpu.memory_space<vmem>>, vector<1x1024xf32>
    %7 = vector.broadcast %6 : vector<1x1024xf32> to vector<8x1024xf32>
    %8 = arith.addf %5, %7 : vector<8x1024xf32>
    %9 = math.tanh %8 : vector<8x1024xf32>
    %c0_6 = arith.constant 0 : index
    %c0_7 = arith.constant 0 : index
    %10 = vector.load %arg12[%c0_6, %c0_7] : memref<8x1024xf32, #tpu.memory_space<vmem>>, vector<8x1024xf32>
    tpu.vector_store %arg12[%c0_6, %c0_7], %9 {strides = array<i32>} : memref<8x1024xf32, #tpu.memory_space<vmem>>, vector<8x1024xf32>,
    return
  }
  func.func @transform_0(%arg0: i32) -> (i32, i32) {
    %c0_i32 = arith.constant 0 : i32
    %c0_i32_0 = arith.constant 0 : i32
    %c0_i32_1 = arith.constant 0 : i32
    return %c0_i32, %c0_i32_0 : i32, i32
  }
  func.func @transform_1(%arg0: i32) -> (i32, i32) {
    %c0_i32 = arith.constant 0 : i32
    %c0_i32_0 = arith.constant 0 : i32
    %c0_i32_1 = arith.constant 0 : i32
    return %c0_i32, %c0_i32_0 : i32, i32
  }
  func.func @transform_2(%arg0: i32) -> (i32, i32) {
    %c0_i32 = arith.constant 0 : i32
    %c0_i32_0 = arith.constant 0 : i32
    %c0_i32_1 = arith.constant 0 : i32
    return %c0_i32, %c0_i32_0 : i32, i32
  }
  func.func @transform_3(%arg0: i32) -> (i32, i32) {
    %c0_i32 = arith.constant 0 : i32
    %c0_i32_0 = arith.constant 0 : i32
    %c0_i32_1 = arith.constant 0 : i32
    return %c0_i32, %c0_i32_0 : i32, i32
  }
  func.func @transform_4(%arg0: i32) -> (i32, i32) {
    %c0_i32 = arith.constant 0 : i32
    %c0_i32_0 = arith.constant 0 : i32
    %c0_i32_1 = arith.constant 0 : i32
    return %c0_i32, %c0_i32_0 : i32, i32
  }
  func.func @transform_5(%arg0: i32) -> (i32, i32) {
    %c0_i32 = arith.constant 0 : i32
    %c0_i32_0 = arith.constant 0 : i32
    %c0_i32_1 = arith.constant 0 : i32
    return %c0_i32, %c0_i32_0 : i32, i32
  }
  func.func @transform_6(%arg0: i32) -> (i32, i32) {
    %c0_i32 = arith.constant 0 : i32
    %c0_i32_0 = arith.constant 0 : i32
    %c0_i32_1 = arith.constant 0 : i32
    return %c0_i32, %c0_i32_0 : i32, i32
  }
  func.func @transform_7(%arg0: i32) -> (i32, i32) {
    %c0_i32 = arith.constant 0 : i32
    %c0_i32_0 = arith.constant 0 : i32
    %c0_i32_1 = arith.constant 0 : i32
    return %c0_i32, %c0_i32_0 : i32, i32
  }
  func.func @transform_8(%arg0: i32) -> (i32, i32) {
    %c0_i32 = arith.constant 0 : i32
    %c0_i32_0 = arith.constant 0 : i32
    %c0_i32_1 = arith.constant 0 : i32
    return %c0_i32, %c0_i32_0 : i32, i32
  }
  func.func @transform_9(%arg0: i32) -> (i32, i32) {
    %c0_i32 = arith.constant 0 : i32
    %c0_i32_0 = arith.constant 0 : i32
    return %c0_i32, %arg0 : i32, i32
  }
  func.func @transform_10(%arg0: i32) -> (i32, i32) {
    %c0_i32 = arith.constant 0 : i32
    %c0_i32_0 = arith.constant 0 : i32
    return %c0_i32, %arg0 : i32, i32
  }
  func.func @transform_11(%arg0: i32) -> (i32, i32) {
    %c0_i32 = arith.constant 0 : i32
    %c0_i32_0 = arith.constant 0 : i32
    return %c0_i32, %arg0 : i32, i32
  }
}

</mosaic_0001>

<bundles_post_ra>
// kernel: tpu_custom_call.1
= control target key start
LH: loop header
LB: loop body
LE: loop exit
PB: predicated region body
PF: predicated region fallthrough
CT: control target
= control target key end

     0   :  { %16 = vsyncpa [#allocation4], 0  ;;  %s9393_s0 = inlined_call_operand.hbm [shape: f32[8,32], index: 0, kind: input, shape index: {}]   ;;  %s9394_s1 = inlined_call_operand.hbm [shape: bf16[32,128], index: 1, kind: input, shape index: {}]   ;;  %s9395_s2 = inlined_call_operand.hbm [shape: f32[1,128], index: 2, kind: input, shape index: {}]   ;;  %s9396_s3 = inlined_call_operand.hbm [shape: bf16[128,256], index: 3, kind: input, shape index: {}]   ;;  %s9397_s4 = inlined_call_operand.hbm [shape: f32[2,256], index: 4, kind: input, shape index: {}]   ;;  %s9398_s5 = inlined_call_operand.hbm [shape: bf16[256,512], index: 5, kind: input, shape index: {}]   ;;  %s9399_s6 = inlined_call_operand.hbm [shape: f32[2,512], index: 6, kind: input, shape index: {}]   ;;  %s9400_s7 = inlined_call_operand.hbm [shape: bf16[512,1024], index: 7, kind: input, shape index: {}]   ;;  %s9401_s8 = inlined_call_operand.hbm [shape: f32[2,1024], index: 8, kind: input, shape index: {}]   ;;  %s9402_s9 = inlined_call_operand.hbm [shape: bf16[1024,1024], index: 9, kind: input, shape index: {}]   ;;  %s9403_s10 = inlined_call_operand.hbm [shape: f32[1,1024], index: 10, kind: input, shape index: {}]   ;;  %s9404_s11 = inlined_call_operand.hbm [shape: f32[8,1024], index: 11, kind: output, shape index: {}]  }
   0x1   :  { %17 = vsyncpa [#allocation7], 0 }
   0x2   :  { %18 = vsyncpa [#allocation10], 0 }
   0x3   :  { %19 = vsyncpa [#allocation13], 0 }
   0x4   :  { %20 = vsyncpa [#allocation16], 0 }
   0x5   :  { %21 = vsyncpa [#allocation19], 0 }
   0x6   :  { %22 = vsyncpa [#allocation5], 0  ;;  %s8795_s17 = smov [#allocation6]   ;;  %s8517_s21 = scalar_lea.hbm %s9394_s1, 256 }
   0x7   :  { %s38_s18 = sshll.u32 %s8795_s17, 4  ;;  %p8518_p0 = scmp.ne.s32.totalorder %s9394_s1, %s8517_s21  ;;  %s39_s18 = int_to_ptr.vmem [resolvable:$true] %s38_s18 }
   0x8   :  { %p8521_p1 = scmp.lt.u32.totalorder %s8517_s21, %s9394_s1 }
   0xa   :  { %p8523_p2 = pnand %p8521_p1, %p8518_p0 }
   0xc   :  { %8526 = shalt.err (!%p8523_p2)
}
   0xd   :  { %s8527_s26 = scalar_lea.vmem %s39_s18, 256  ;;  %p8532_p4 = scmp.lt.s32.totalorder %s39_s18, %s39_s18 }
   0xe   :  { %p8528_p3 = scmp.ne.s32.totalorder %s39_s18, %s8527_s26  ;;  %p8533_p5 = scmp.lt.s32.totalorder %s8527_s26, %s8527_s26 }
  0x10   :  { %p8534_p6 = por %p8533_p5, %p8532_p4 }
  0x12   :  { %p8535_p7 = pnand %p8534_p6, %p8528_p3 }
  0x14   :  { %8538 = shalt.err (!%p8535_p7)
}
  0x15   :  { %s8796_s27 = smov 64   ;;  %s8797_s28 = smov 4  }
  0x16   :  { %44 = dma.hbm_to_vmem [thread:$0]  %s9394_s1, 256, %s39_s18, [#allocation7], %s8796_s27, %s8796_s27, %s8797_s28  }
  0x17   :  { %s8798_s12 = smov [#allocation9]   ;;  %s8539_s16 = scalar_lea.hbm %s9396_s3, 2048 }
  0x18   :  { %s60_s13 = sshll.u32 %s8798_s12, 4  ;;  %p8540_p8 = scmp.ne.s32.totalorder %s9396_s3, %s8539_s16  ;;  %s61_s13 = int_to_ptr.vmem [resolvable:$true] %s60_s13 }
  0x19   :  { %p8543_p9 = scmp.lt.u32.totalorder %s8539_s16, %s9396_s3 }
  0x1b   :  { %p8545_p10 = pnand %p8543_p9, %p8540_p8 }
  0x1d   :  { %8548 = shalt.err (!%p8545_p10)
}
  0x1e   :  { %s8549_s22 = scalar_lea.vmem %s61_s13, 2048  ;;  %p8554_p12 = scmp.lt.s32.totalorder %s61_s13, %s61_s13 }
  0x1f   :  { %p8550_p11 = scmp.ne.s32.totalorder %s61_s13, %s8549_s22  ;;  %p8555_p13 = scmp.lt.s32.totalorder %s8549_s22, %s8549_s22 }
  0x21   :  { %p8556_p0 = por %p8555_p13, %p8554_p12 }
  0x23   :  { %p8557_p1 = pnand %p8556_p0, %p8550_p11 }
  0x25   :  { %8560 = shalt.err (!%p8557_p1)
}
  0x26   :  { %s8799_s1 = smov 128   ;;  %s8800_s18 = smov 8  }
  0x27   :  { %66 = dma.hbm_to_vmem [thread:$0]  %s9396_s3, 2048, %s61_s13, [#allocation10], %s8799_s1, %s8799_s1, %s8800_s18  }
  0x28   :  { %s8801_s25 = smov [#allocation12]   ;;  %s8561_s29 = scalar_lea.hbm %s9398_s5, 8192 }
  0x29   :  { %s82_s26 = sshll.u32 %s8801_s25, 4  ;;  %p8562_p2 = scmp.ne.s32.totalorder %s9398_s5, %s8561_s29  ;;  %s83_s26 = int_to_ptr.vmem [resolvable:$true] %s82_s26 }
  0x2a   :  { %p8565_p3 = scmp.lt.u32.totalorder %s8561_s29, %s9398_s5 }
  0x2c   :  { %p8567_p4 = pnand %p8565_p3, %p8562_p2 }
  0x2e   :  { %8570 = shalt.err (!%p8567_p4)
}
  0x2f   :  { %s8571_s16 = scalar_lea.vmem %s83_s26, 8192  ;;  %p8576_p6 = scmp.lt.s32.totalorder %s83_s26, %s83_s26 }
  0x30   :  { %p8572_p5 = scmp.ne.s32.totalorder %s83_s26, %s8571_s16  ;;  %p8577_p7 = scmp.lt.s32.totalorder %s8571_s16, %s8571_s16 }
  0x32   :  { %p8578_p8 = por %p8577_p7, %p8576_p6 }
  0x34   :  { %p8579_p9 = pnand %p8578_p8, %p8572_p5 }
  0x36   :  { %8582 = shalt.err (!%p8579_p9)
}
  0x37   :  { %s8802_s3 = smov 256   ;;  %s8803_s13 = smov 16  }
  0x38   :  { %88 = dma.hbm_to_vmem [thread:$0]  %s9398_s5, 8192, %s83_s26, [#allocation13], %s8802_s3, %s8802_s3, %s8803_s13  }
  0x39   :  { %s8804_s20 = smov [#allocation15]   ;;  %s8583_s18 = scalar_lea.hbm %s9400_s7, 32768 }
  0x3a   :  { %s104_s21 = sshll.u32 %s8804_s20, 4  ;;  %p8584_p10 = scmp.ne.s32.totalorder %s9400_s7, %s8583_s18  ;;  %s105_s21 = int_to_ptr.vmem [resolvable:$true] %s104_s21 }
  0x3b   :  { %p8587_p11 = scmp.lt.u32.totalorder %s8583_s18, %s9400_s7 }
  0x3d   :  { %p8589_p12 = pnand %p8587_p11, %p8584_p10 }
  0x3f   :  { %8592 = shalt.err (!%p8589_p12)
}
  0x40   :  { %s8593_s28 = scalar_lea.vmem %s105_s21, 32768  ;;  %p8598_p0 = scmp.lt.s32.totalorder %s105_s21, %s105_s21 }
  0x41   :  { %p8594_p13 = scmp.ne.s32.totalorder %s105_s21, %s8593_s28  ;;  %p8599_p1 = scmp.lt.s32.totalorder %s8593_s28, %s8593_s28 }
  0x43   :  { %p8600_p2 = por %p8599_p1, %p8598_p0 }
  0x45   :  { %p8601_p3 = pnand %p8600_p2, %p8594_p13 }
  0x47   :  { %8604 = shalt.err (!%p8601_p3)
}
  0x48   :  { %s8805_s5 = smov 512   ;;  %s8806_s26 = smov 32  }
  0x49   :  { %110 = dma.hbm_to_vmem [thread:$0]  %s9400_s7, 32768, %s105_s21, [#allocation16], %s8805_s5, %s8805_s5, %s8806_s26  }
  0x4a   :  { %s8807_s12 = smov [#allocation18]   ;;  %s8808_s15 = smov [#allocation3]  }
  0x4b   :  { %s126_s14 = sshll.u32 %s8807_s12, 4  ;;  %s29_s16 = sshll.u32 %s8808_s15, 4  ;;  %s127_s14 = int_to_ptr.vmem [resolvable:$true] %s126_s14  ;;  %s30_s16 = int_to_ptr.vmem [resolvable:$true] %s29_s16 }
  0x4c   :  { %s8605_s17 = scalar_lea.hbm %s9402_s9, 65536 }
  0x4d   :  { %p8606_p4 = scmp.ne.s32.totalorder %s9402_s9, %s8605_s17  ;;  %p8609_p5 = scmp.lt.u32.totalorder %s8605_s17, %s9402_s9 }
  0x4f   :  { %p8611_p6 = pnand %p8609_p5, %p8606_p4 }
  0x51   :  { %8614 = shalt.err (!%p8611_p6)
}
  0x52   :  { %s8615_s7 = scalar_lea.vmem %s127_s14, 65536  ;;  %p8620_p8 = scmp.lt.s32.totalorder %s127_s14, %s127_s14 }
  0x53   :  { %p8616_p7 = scmp.ne.s32.totalorder %s127_s14, %s8615_s7  ;;  %p8621_p9 = scmp.lt.s32.totalorder %s8615_s7, %s8615_s7 }
  0x55   :  { %p8622_p10 = por %p8621_p9, %p8620_p8 }
  0x57   :  { %p8623_p11 = pnand %p8622_p10, %p8616_p7 }
  0x59   :  { %8626 = shalt.err (!%p8623_p11)
}
  0x5a   :  { %132 = dma.hbm_to_vmem [thread:$0]  %s9402_s9, 65536, %s127_s14, [#allocation19], %s8805_s5, %s8805_s5, %s8806_s26  }
  0x5b   :  { %s8627_s25 = scalar_lea.hbm %s9393_s0, 128 }
  0x5c   :  { %p8628_p12 = scmp.ne.s32.totalorder %s9393_s0, %s8627_s25  ;;  %p8631_p13 = scmp.lt.u32.totalorder %s8627_s25, %s9393_s0 }
  0x5e   :  { %p8633_p0 = pnand %p8631_p13, %p8628_p12 }
  0x60   :  { %8636 = shalt.err (!%p8633_p0)
}
  0x61   :  { %s8637_s12 = scalar_lea.vmem %s30_s16, 128  ;;  %p8642_p2 = scmp.lt.s32.totalorder %s30_s16, %s30_s16 }
  0x62   :  { %p8638_p1 = scmp.ne.s32.totalorder %s30_s16, %s8637_s12  ;;  %p8643_p3 = scmp.lt.s32.totalorder %s8637_s12, %s8637_s12 }
  0x64   :  { %p8644_p4 = por %p8643_p3, %p8642_p2 }
  0x66   :  { %p8645_p5 = pnand %p8644_p4, %p8638_p1 }
  0x68   :  { %8648 = shalt.err (!%p8645_p5)
}
  0x69   :  { %32 = dma.hbm_to_vmem [thread:$0]  %s9393_s0, 128, %s30_s16, [#allocation4]  }
  0x6a   :  { %s8809_s26 = smov [#allocation8]   ;;  %s8810_s15 = smov [#allocation11]  }
  0x6b   :  { %s51_s14 = sshll.u32 %s8809_s26, 4  ;;  %s73_s3 = sshll.u32 %s8810_s15, 4  ;;  %s52_s14 = int_to_ptr.vmem [resolvable:$true] %s51_s14  ;;  %s74_s3 = int_to_ptr.vmem [resolvable:$true] %s73_s3 }
  0x6c   :  { %s8649_s19 = scalar_lea.hbm %s9395_s2, 16 }
  0x6d   :  { %p8650_p6 = scmp.ne.s32.totalorder %s9395_s2, %s8649_s19  ;;  %p8653_p7 = scmp.lt.u32.totalorder %s8649_s19, %s9395_s2 }
  0x6f   :  { %p8655_p8 = pnand %p8653_p7, %p8650_p6 }
  0x71   :  { %8658 = shalt.err (!%p8655_p8)
}
  0x72   :  { %s8659_s0 = scalar_lea.vmem %s52_s14, 16  ;;  %s8663_s16 = scalar_lea.vmem %s52_s14, 32 }
  0x73   :  { %p8660_p9 = scmp.ne.s32.totalorder %s52_s14, %s8659_s0  ;;  %p8664_p10 = scmp.lt.s32.totalorder %s52_s14, %s52_s14 }
  0x74   :  { %p8665_p11 = scmp.lt.s32.totalorder %s8663_s16, %s8659_s0 }
  0x76   :  { %p8666_p12 = por %p8665_p11, %p8664_p10 }
  0x78   :  { %p8667_p13 = pnand %p8666_p12, %p8660_p9 }
  0x7a   :  { %8670 = shalt.err (!%p8667_p13)
}
  0x7b   :  { %54 = dma.hbm_to_vmem [thread:$0]  %s9395_s2, 16, %s52_s14, [#allocation7]  }
  0x7c   :  { %s8671_s25 = scalar_lea.hbm %s9397_s4, 64 }
  0x7d   :  { %p8672_p0 = scmp.ne.s32.totalorder %s9397_s4, %s8671_s25  ;;  %p8675_p1 = scmp.lt.u32.totalorder %s8671_s25, %s9397_s4 }
  0x7f   :  { %p8677_p2 = pnand %p8675_p1, %p8672_p0 }
  0x81   :  { %8680 = shalt.err (!%p8677_p2)
}
  0x82   :  { %s8681_s12 = scalar_lea.vmem %s74_s3, 64  ;;  %p8686_p4 = scmp.lt.s32.totalorder %s74_s3, %s74_s3 }
  0x83   :  { %p8682_p3 = scmp.ne.s32.totalorder %s74_s3, %s8681_s12  ;;  %p8687_p5 = scmp.lt.s32.totalorder %s8681_s12, %s8681_s12 }
  0x85   :  { %p8688_p6 = por %p8687_p5, %p8686_p4 }
  0x87   :  { %p8689_p7 = pnand %p8688_p6, %p8682_p3 }
  0x89   :  { %8692 = shalt.err (!%p8689_p7)
}
  0x8a   :  { %76 = dma.hbm_to_vmem [thread:$0]  %s9397_s4, 64, %s74_s3, [#allocation10]  }
  0x8b   :  { %s8811_s5 = smov [#allocation14]   ;;  %s8812_s14 = smov [#allocation17]  }
  0x8c   :  { %s95_s26 = sshll.u32 %s8811_s5, 4  ;;  %s117_s15 = sshll.u32 %s8812_s14, 4  ;;  %s96_s26 = int_to_ptr.vmem [resolvable:$true] %s95_s26  ;;  %s118_s15 = int_to_ptr.vmem [resolvable:$true] %s117_s15 }
  0x8d   :  { %s8693_s19 = scalar_lea.hbm %s9399_s6, 128 }
  0x8e   :  { %p8694_p8 = scmp.ne.s32.totalorder %s9399_s6, %s8693_s19  ;;  %p8697_p9 = scmp.lt.u32.totalorder %s8693_s19, %s9399_s6 }
  0x90   :  { %p8699_p10 = pnand %p8697_p9, %p8694_p8 }
  0x92   :  { %8702 = shalt.err (!%p8699_p10)
}
  0x93   :  { %s8703_s4 = scalar_lea.vmem %s96_s26, 128  ;;  %p8708_p12 = scmp.lt.s32.totalorder %s96_s26, %s96_s26 }
  0x94   :  { %p8704_p11 = scmp.ne.s32.totalorder %s96_s26, %s8703_s4  ;;  %p8709_p13 = scmp.lt.s32.totalorder %s8703_s4, %s8703_s4 }
  0x96   :  { %p8710_p0 = por %p8709_p13, %p8708_p12 }
  0x98   :  { %p8711_p1 = pnand %p8710_p0, %p8704_p11 }
  0x9a   :  { %8714 = shalt.err (!%p8711_p1)
}
  0x9b   :  { %98 = dma.hbm_to_vmem [thread:$0]  %s9399_s6, 128, %s96_s26, [#allocation13]  }
  0x9c   :  { %s8715_s18 = scalar_lea.hbm %s9401_s8, 256 }
  0x9d   :  { %p8716_p2 = scmp.ne.s32.totalorder %s9401_s8, %s8715_s18  ;;  %p8719_p3 = scmp.lt.u32.totalorder %s8715_s18, %s9401_s8 }
  0x9f   :  { %p8721_p4 = pnand %p8719_p3, %p8716_p2 }
  0xa1   :  { %8724 = shalt.err (!%p8721_p4)
}
  0xa2   :  { %s8725_s28 = scalar_lea.vmem %s118_s15, 256  ;;  %p8730_p6 = scmp.lt.s32.totalorder %s118_s15, %s118_s15 }
  0xa3   :  { %p8726_p5 = scmp.ne.s32.totalorder %s118_s15, %s8725_s28  ;;  %p8731_p7 = scmp.lt.s32.totalorder %s8725_s28, %s8725_s28 }
  0xa5   :  { %p8732_p8 = por %p8731_p7, %p8730_p6 }
  0xa7   :  { %p8733_p9 = pnand %p8732_p8, %p8726_p5 }
  0xa9   :  { %8736 = shalt.err (!%p8733_p9)
}
  0xaa   :  { %120 = dma.hbm_to_vmem [thread:$0]  %s9401_s8, 256, %s118_s15, [#allocation16]  }
  0xab   :  { %s8813_s30 = smov [#allocation20]   ;;  %s8737_s5 = scalar_lea.hbm %s9403_s10, 128 }
  0xac   :  { %s139_s12 = sshll.u32 %s8813_s30, 4  ;;  %p8738_p10 = scmp.ne.s32.totalorder %s9403_s10, %s8737_s5  ;;  %s140_s12 = int_to_ptr.vmem [resolvable:$true] %s139_s12 }
  0xad   :  { %p8741_p11 = scmp.lt.u32.totalorder %s8737_s5, %s9403_s10 }
  0xaf   :  { %p8743_p12 = pnand %p8741_p11, %p8738_p10 }
  0xb1   :  { %8746 = shalt.err (!%p8743_p12)
}
  0xb2   :  { %s8747_s19 = scalar_lea.vmem %s140_s12, 128  ;;  %p8752_p0 = scmp.lt.s32.totalorder %s140_s12, %s140_s12 }
  0xb3   :  { %p8748_p13 = scmp.ne.s32.totalorder %s140_s12, %s8747_s19  ;;  %p8753_p1 = scmp.lt.s32.totalorder %s8747_s19, %s8747_s19 }
  0xb5   :  { %p8754_p2 = por %p8753_p1, %p8752_p0 }
  0xb7   :  { %p8755_p3 = pnand %p8754_p2, %p8748_p13 }
  0xb9   :  { %8758 = shalt.err (!%p8755_p3)
}
  0xba   :  { %142 = dma.hbm_to_vmem [thread:$0]  %s9403_s10, 128, %s140_s12, [#allocation19]  }
  0xbb   :  { %8781 = dma.done.wait [#allocation4], 128  }
  0xbc   :  { %8782 = vsyncadd [#allocation4], 4294967168 }
  0xbd   :  { %8783 = dma.done.wait [#allocation7], 272  }
  0xbe   :  { %8784 = vsyncadd [#allocation7], 4294967024 }
  0xbf   :  { %8785 = dma.done.wait [#allocation10], 2112  }
  0xc0   :  { %8786 = vsyncadd [#allocation10], 4294965184 }
  0xc1   :  { %8787 = dma.done.wait [#allocation13], 8320  }
  0xc2   :  { %8788 = vsyncadd [#allocation13], 4294958976 }
  0xc3   :  { %8789 = dma.done.wait [#allocation16], 33024  }
  0xc4   :  { %8790 = vsyncadd [#allocation16], 4294934272 }
  0xc5   :  { %8791 = dma.done.wait [#allocation19], 65664  }
  0xc6   :  { %8792 = vsyncadd [#allocation19], 4294901632  ;;  %v8814_v0 = vmov 0.0   ;;  %vm8815_vm0 = vmmov 0   ;;  %v8351_v1 = vld [vmem:[#allocation6] sm:$0xff]   ;;  %v8352_v2 = vld [vmem:[#allocation6 + $0x8] sm:$0xff]  }
  0xc7   :  { %8247 = vmatprep.subr.bf16.mxu0 %v8814_v0  ;;  %8251 = vmatprep.mubr.msk.bf16.mxu0 %vm8815_vm0, %v8814_v0  ;;  %v181_v3 = vld [vmem:[#allocation3] sm:$0xff]  ;;  %v8356_v6 = vld [vmem:[#allocation9 + $0x14] ss:$8 sps:$4 sm:$0xff]   ;;  %vm206_vm1 = vcmask 261120   ;;  %v8358_v8 = vld [vmem:[#allocation9 + $0x10] ss:$8 sps:$4 sm:$0xff]  }
  0xc8   :  { %8248 = vmatpush3.bf16.msra.mxu0 %v8351_v1  ;;  %v8353_v4 = vld [vmem:[#allocation9 + $0x4] ss:$8 sps:$4 sm:$0xff]   ;;  %v8355_v5 = vld [vmem:[#allocation9] ss:$8 sps:$4 sm:$0xff]   ;;  %v182_v7 = vpack.c.bf16 %v181_v3, %v181_v3  ;;  %v8362_v11 = vld [vmem:[#allocation9 + $0x34] ss:$8 sps:$4 sm:$0xff]  }
  0xc9   :  { %8249 = vmatprep.subr.bf16.mxu0 %v8814_v0  ;;  %350 = vmatprep.subr.bf16.mxu1 %v8353_v4  ;;  %v8359_v9 = vld [vmem:[#allocation9 + $0x24] ss:$8 sps:$4 sm:$0xff]   ;;  %v8361_v10 = vld [vmem:[#allocation9 + $0x20] ss:$8 sps:$4 sm:$0xff]   ;;  %v8364_v12 = vld [vmem:[#allocation9 + $0x30] ss:$8 sps:$4 sm:$0xff]  }
  0xca   :  { %351 = vmatpush1.bf16.msra.mxu1 %v8355_v5  ;;  %v8365_v13 = vld [vmem:[#allocation9 + $0x44] ss:$8 sps:$4 sm:$0xff]   ;;  %v8367_v14 = vld [vmem:[#allocation9 + $0x40] ss:$8 sps:$4 sm:$0xff]   ;;  %v8368_v15 = vld [vmem:[#allocation9 + $0x54] ss:$8 sps:$4 sm:$0xff]  }
  0xcb   :  { %352 = vmatprep.subr.bf16.mxu1 %v8356_v6  ;;  %v8370_v16 = vld [vmem:[#allocation9 + $0x50] ss:$8 sps:$4 sm:$0xff]   ;;  %v8371_v17 = vld [vmem:[#allocation9 + $0x64] ss:$8 sps:$4 sm:$0xff]   ;;  %v8373_v18 = vld [vmem:[#allocation9 + $0x60] ss:$8 sps:$4 sm:$0xff]  }
  0xcc   :  { %8250 = vmatpush3.bf16.msra.mxu0 %v8352_v2  ;;  %v8374_v19 = vld [vmem:[#allocation9 + $0x74] ss:$8 sps:$4 sm:$0xff]   ;;  %v8376_v20 = vld [vmem:[#allocation9 + $0x70] ss:$8 sps:$4 sm:$0xff]   ;;  %v8816_v21 = vmov 0   ;;  %s8818_s10 = smov [#allocation21]  }
  0xcd   :  { %382 = vmatprep.mubr.bf16.mxu1 %v8816_v21  ;;  %v7368_v22 = vld [vmem:[#allocation8] ss:$0 sm:$0xff]  ;;  %v8379_v31 = vld [vmem:[#allocation12 + $0x4] ss:$16 sps:$4 sm:$0xff]   ;;  %v8382_v32 = vld [vmem:[#allocation12 + $0xc] ss:$16 sps:$4 sm:$0xff]  }
  0xce   :  { %353 = vmatpush1.bf16.msra.mxu1 %v8358_v8  ;;  %v8377_v33 = vld [vmem:[#allocation12] ss:$16 sps:$4 sm:$0xff]   ;;  %v8380_v34 = vld [vmem:[#allocation12 + $0x8] ss:$16 sps:$4 sm:$0xff]   ;;  %890 = vmatprep.subr.bf16.mxu0 %v8379_v31  ;;  %v8385_v35 = vld [vmem:[#allocation12 + $0x24] ss:$16 sps:$4 sm:$0xff]  }
  0xcf   :  { %8252 = vmatmul.mubr.msk.bf16.vlgmr.msra.gmra.mrb[0].mxu0 %vm206_vm1, %v182_v7  ;;  %354 = vmatprep.subr.bf16.mxu1 %v8359_v9  ;;  %v8388_v36 = vld [vmem:[#allocation12 + $0x2c] ss:$16 sps:$4 sm:$0xff]   ;;  %v8383_v37 = vld [vmem:[#allocation12 + $0x20] ss:$16 sps:$4 sm:$0xff]   ;;  %v8386_v38 = vld [vmem:[#allocation12 + $0x28] ss:$16 sps:$4 sm:$0xff]  }
  0xd0   :  { %891 = vmatpush1.bf16.msra.mxu0 %v8377_v33  ;;  %v8391_v39 = vld [vmem:[#allocation12 + $0x44] ss:$16 sps:$4 sm:$0xff]   ;;  %v8394_v40 = vld [vmem:[#allocation12 + $0x4c] ss:$16 sps:$4 sm:$0xff]   ;;  %v8389_v41 = vld [vmem:[#allocation12 + $0x40] ss:$16 sps:$4 sm:$0xff]  }
  0xd1   :  { %892 = vmatprep.subr.bf16.mxu0 %v8385_v35  ;;  %v8392_v42 = vld [vmem:[#allocation12 + $0x48] ss:$16 sps:$4 sm:$0xff]   ;;  %v8397_v43 = vld [vmem:[#allocation12 + $0x64] ss:$16 sps:$4 sm:$0xff]   ;;  %v8400_v44 = vld [vmem:[#allocation12 + $0x6c] ss:$16 sps:$4 sm:$0xff]  }
  0xd2   :  { %355 = vmatpush1.bf16.msra.mxu1 %v8361_v10  ;;  %v8395_v45 = vld [vmem:[#allocation12 + $0x60] ss:$16 sps:$4 sm:$0xff]   ;;  %v8398_v46 = vld [vmem:[#allocation12 + $0x68] ss:$16 sps:$4 sm:$0xff]   ;;  %v8403_v47 = vld [vmem:[#allocation12 + $0x84] ss:$16 sps:$4 sm:$0xff]  }
  0xd3   :  { %356 = vmatprep.subr.bf16.mxu1 %v8362_v11  ;;  %v8406_v48 = vld [vmem:[#allocation12 + $0x8c] ss:$16 sps:$4 sm:$0xff]   ;;  %v8401_v49 = vld [vmem:[#allocation12 + $0x80] ss:$16 sps:$4 sm:$0xff]   ;;  %v8404_v50 = vld [vmem:[#allocation12 + $0x88] ss:$16 sps:$4 sm:$0xff]  }
  0xd4   :  { %893 = vmatpush1.bf16.msra.mxu0 %v8383_v37  ;;  %v8409_v51 = vld [vmem:[#allocation12 + $0xa4] ss:$16 sps:$4 sm:$0xff]   ;;  %v8412_v52 = vld [vmem:[#allocation12 + $0xac] ss:$16 sps:$4 sm:$0xff]   ;;  %v8407_v53 = vld [vmem:[#allocation12 + $0xa0] ss:$16 sps:$4 sm:$0xff]  }
  0xd5   :  { %894 = vmatprep.subr.bf16.mxu0 %v8391_v39  ;;  %v8410_v54 = vld [vmem:[#allocation12 + $0xa8] ss:$16 sps:$4 sm:$0xff]   ;;  %v8415_v55 = vld [vmem:[#allocation12 + $0xc4] ss:$16 sps:$4 sm:$0xff]   ;;  %v8418_v56 = vld [vmem:[#allocation12 + $0xcc] ss:$16 sps:$4 sm:$0xff]  }
  0xd6   :  { %357 = vmatpush1.bf16.msra.mxu1 %v8364_v12  ;;  %v8413_v57 = vld [vmem:[#allocation12 + $0xc0] ss:$16 sps:$4 sm:$0xff]   ;;  %v8416_v58 = vld [vmem:[#allocation12 + $0xc8] ss:$16 sps:$4 sm:$0xff]   ;;  %v8421_v59 = vld [vmem:[#allocation12 + $0xe4] ss:$16 sps:$4 sm:$0xff]  }
  0xd7   :  { %358 = vmatprep.subr.bf16.mxu1 %v8365_v13  ;;  %v8424_v60 = vld [vmem:[#allocation12 + $0xec] ss:$16 sps:$4 sm:$0xff]   ;;  %v8419_v61 = vld [vmem:[#allocation12 + $0xe0] ss:$16 sps:$4 sm:$0xff]   ;;  %v8422_v62 = vld [vmem:[#allocation12 + $0xe8] ss:$16 sps:$4 sm:$0xff]  }
  0xd8   :  { %895 = vmatpush1.bf16.msra.mxu0 %v8389_v41  ;;  %v8427_v63 = vld [vmem:[#allocation12 + $0x104] ss:$16 sps:$4 sm:$0xff]   ;;  %v8430_v0 = vld [vmem:[#allocation12 + $0x10c] ss:$16 sps:$4 sm:$0xff]   ;;  %v8425_v1 = vld [vmem:[#allocation12 + $0x100] ss:$16 sps:$4 sm:$0xff]  }
  0xd9   :  { %896 = vmatprep.subr.bf16.mxu0 %v8397_v43  ;;  %v8428_v2 = vld [vmem:[#allocation12 + $0x108] ss:$16 sps:$4 sm:$0xff]   ;;  %v8433_v3 = vld [vmem:[#allocation12 + $0x124] ss:$16 sps:$4 sm:$0xff]   ;;  %v8436_v4 = vld [vmem:[#allocation12 + $0x12c] ss:$16 sps:$4 sm:$0xff]  }
  0xda   :  { %359 = vmatpush1.bf16.msra.mxu1 %v8367_v14  ;;  %v8431_v5 = vld [vmem:[#allocation12 + $0x120] ss:$16 sps:$4 sm:$0xff]   ;;  %v8434_v6 = vld [vmem:[#allocation12 + $0x128] ss:$16 sps:$4 sm:$0xff]   ;;  %v8439_v7 = vld [vmem:[#allocation12 + $0x144] ss:$16 sps:$4 sm:$0xff]  }
  0xdb   :  { %360 = vmatprep.subr.bf16.mxu1 %v8368_v15  ;;  %v8442_v8 = vld [vmem:[#allocation12 + $0x14c] ss:$16 sps:$4 sm:$0xff]   ;;  %v8437_v9 = vld [vmem:[#allocation12 + $0x140] ss:$16 sps:$4 sm:$0xff]   ;;  %v8440_v10 = vld [vmem:[#allocation12 + $0x148] ss:$16 sps:$4 sm:$0xff]  }
  0xdc   :  { %897 = vmatpush1.bf16.msra.mxu0 %v8395_v45  ;;  %v8445_v11 = vld [vmem:[#allocation12 + $0x164] ss:$16 sps:$4 sm:$0xff]   ;;  %v8448_v12 = vld [vmem:[#allocation12 + $0x16c] ss:$16 sps:$4 sm:$0xff]   ;;  %v8443_v13 = vld [vmem:[#allocation12 + $0x160] ss:$16 sps:$4 sm:$0xff]  }
  0xdd   :  { %898 = vmatprep.subr.bf16.mxu0 %v8403_v47  ;;  %v8446_v14 = vld [vmem:[#allocation12 + $0x168] ss:$16 sps:$4 sm:$0xff]   ;;  %v8451_v15 = vld [vmem:[#allocation12 + $0x184] ss:$16 sps:$4 sm:$0xff]   ;;  %v8455_v21 = vld [vmem:[#allocation12 + $0x1a0] ss:$16 sps:$4 sm:$0xff]  }
  0xde   :  { %361 = vmatpush1.bf16.msra.mxu1 %v8370_v16  ;;  %v8454_v16 = vld [vmem:[#allocation12 + $0x18c] ss:$16 sps:$4 sm:$0xff]   ;;  %s7354_s20 = sshll.u32 %s8818_s10, 4  ;;  %s7355_s20 = int_to_ptr.vmem [resolvable:$true] %s7354_s20 }
  0xdf   :  { %362 = vmatprep.subr.bf16.mxu1 %v8371_v17  ;;  %v8449_v17 = vld [vmem:[#allocation12 + $0x180] ss:$16 sps:$4 sm:$0xff]   ;;  %s8759_s22 = scalar_lea.vmem %s7355_s20, 1024  ;;  %p8764_p5 = scmp.lt.s32.totalorder %s7355_s20, %s7355_s20 }
  0xe0   :  { %899 = vmatpush1.bf16.msra.mxu0 %v8401_v49  ;;  %p8760_p4 = scmp.ne.s32.totalorder %s7355_s20, %s8759_s22  ;;  %p8765_p6 = scmp.lt.s32.totalorder %s8759_s22, %s8759_s22 }
  0xe1   :  { %900 = vmatprep.subr.bf16.mxu0 %v8409_v51 }
  0xe2   :  { %363 = vmatpush1.bf16.msra.mxu1 %v8373_v18  ;;  %v8452_v18 = vld [vmem:[#allocation12 + $0x188] ss:$16 sps:$4 sm:$0xff]   ;;  %p8766_p7 = por %p8765_p6, %p8764_p5 }
  0xe3   :  { %364 = vmatprep.subr.bf16.mxu1 %v8374_v19  ;;  %v8457_v19 = vld [vmem:[#allocation12 + $0x1a4] ss:$16 sps:$4 sm:$0xff]  }
  0xe4   :  { %901 = vmatpush1.bf16.msra.mxu0 %v8407_v53  ;;  %p8767_p8 = pnand %p8766_p7, %p8760_p4 }
  0xe5   :  { %902 = vmatprep.subr.bf16.mxu0 %v8415_v55 }
  0xe6   :  { %365 = vmatpush1.bf16.msra.mxu1 %v8376_v20  ;;  %v8460_v20 = vld [vmem:[#allocation12 + $0x1ac] ss:$16 sps:$4 sm:$0xff]  }
  0xe7   :  { %931 = vmatprep.subr.bf16.mxu1 %v8382_v32 }
  0xe8   :  { %903 = vmatpush1.bf16.msra.mxu0 %v8413_v57 }
  0xe9   :  { %904 = vmatprep.subr.bf16.mxu0 %v8421_v59 }
  0xec   :  { %905 = vmatpush1.bf16.msra.mxu0 %v8419_v61 }
  0xed   :  { %906 = vmatprep.subr.bf16.mxu0 %v8427_v63 }
  0xf0   :  { %907 = vmatpush1.bf16.msra.mxu0 %v8425_v1 }
  0xf1   :  { %908 = vmatprep.subr.bf16.mxu0 %v8433_v3 }
  0xf4   :  { %909 = vmatpush1.bf16.msra.mxu0 %v8431_v5  ;;  %v8817_v5 = vmov 1983009808  }
  0xf5   :  { %910 = vmatprep.subr.bf16.mxu0 %v8439_v7  ;;  %v435_v7 = vlaneseq }
  0xf8   :  { %911 = vmatpush1.bf16.msra.mxu0 %v8437_v9  ;;  %v9011_v9 = vshrl.u32 %v435_v7, 7  ;;  %v1219_v7 = vld [vmem:[#allocation15 + $0xc8] sm:$0xff] }
  0xf9   :  { %912 = vmatprep.subr.bf16.mxu0 %v8445_v11 }
  0xfc   :  { %913 = vmatpush1.bf16.msra.mxu0 %v8443_v13 }
  0xfd   :  { %914 = vmatprep.subr.bf16.mxu0 %v8451_v15 }
 0x100   :  { %915 = vmatpush1.bf16.msra.mxu0 %v8449_v17  ;;  %v9021_v17 = vsub.s32 2, %v9011_v9 }
 0x101   :  { %916 = vmatprep.subr.bf16.mxu0 %v8457_v19 }
 0x104   :  { %917 = vmatpush1.bf16.msra.mxu0 %v8455_v21 }
 0x1a2   :  { %v244_v23 = vpop.f32.mrb[0].mxu0 }
 0x1a3   :  { %v245_v24 = vadd.f32 %v7368_v22, %v244_v23  ;;  %v8253_v25 = vpop.f32.mrb[1].mxu0  ;;  %v8458_v22 = vld [vmem:[#allocation12 + $0x1a8] ss:$16 sps:$4 sm:$0xff]   ;;  %v8463_v23 = vld [vmem:[#allocation12 + $0x1c4] ss:$16 sps:$4 sm:$0xff]  }
 0x1a4   :  { %v247_v26 = vpop.f32.mrb[2].mxu0  ;;  %v8461_v25 = vld [vmem:[#allocation12 + $0x1c0] ss:$16 sps:$4 sm:$0xff]   ;;  %918 = vmatprep.subr.bf16.mxu0 %v8463_v23 }
 0x1a5   :  { %vm250_vm2 = vcmp.gt.f32.partialorder %v245_v24, 0.0  ;;  %v251_v27 = vmul.f32 0.2, %v245_v24  ;;  %v8254_v28 = vpop.f32.mrb[3].mxu0  ;;  %v8464_v26 = vld [vmem:[#allocation12 + $0x1c8] ss:$16 sps:$4 sm:$0xff]   ;;  %919 = vmatpush1.bf16.msra.mxu0 %v8461_v25 }
 0x1a6   :  { %v8467_v28 = vld [vmem:[#allocation12 + $0x1e0] ss:$16 sps:$4 sm:$0xff]  }
 0x1a7   :  { %v252_v29 = vsel %vm250_vm2, %v245_v24, %v251_v27  ;;  %v8466_v24 = vld [vmem:[#allocation12 + $0x1cc] ss:$16 sps:$4 sm:$0xff]   ;;  %v8469_v27 = vld [vmem:[#allocation12 + $0x1e4] ss:$16 sps:$4 sm:$0xff]  }
 0x1a8   :  { %v253_v30 = vpack.c.bf16 %v252_v29, %v252_v29  ;;  %v8470_v29 = vld [vmem:[#allocation12 + $0x1e8] ss:$16 sps:$4 sm:$0xff]   ;;  %920 = vmatprep.subr.bf16.mxu0 %v8469_v27 }
 0x1a9   :  { %921 = vmatpush1.bf16.msra.mxu0 %v8467_v28 }
 0x1aa   :  { %383 = vmatmul.mubr.bf16.vlgmr.msra.gmra.mrb[0].mxu1 %v253_v30  ;;  %v8472_v30 = vld [vmem:[#allocation12 + $0x1ec] ss:$16 sps:$4 sm:$0xff]  }
 0x1ab   :  { %932 = vmatpush1.bf16.msra.mxu1 %v8380_v34 }
 0x1ac   :  { %933 = vmatprep.subr.bf16.mxu1 %v8388_v36 }
 0x1af   :  { %934 = vmatpush1.bf16.msra.mxu1 %v8386_v38 }
 0x1b0   :  { %935 = vmatprep.subr.bf16.mxu1 %v8394_v40 }
 0x1b3   :  { %936 = vmatpush1.bf16.msra.mxu1 %v8392_v42 }
 0x1b4   :  { %937 = vmatprep.subr.bf16.mxu1 %v8400_v44 }
 0x1b7   :  { %938 = vmatpush1.bf16.msra.mxu1 %v8398_v46 }
 0x1b8   :  { %939 = vmatprep.subr.bf16.mxu1 %v8406_v48 }
 0x1bb   :  { %940 = vmatpush1.bf16.msra.mxu1 %v8404_v50 }
 0x1bc   :  { %941 = vmatprep.subr.bf16.mxu1 %v8412_v52 }
 0x1bf   :  { %942 = vmatpush1.bf16.msra.mxu1 %v8410_v54 }
 0x1c0   :  { %943 = vmatprep.subr.bf16.mxu1 %v8418_v56 }
 0x1c3   :  { %944 = vmatpush1.bf16.msra.mxu1 %v8416_v58 }
 0x1c4   :  { %945 = vmatprep.subr.bf16.mxu1 %v8424_v60 }
 0x1c7   :  { %946 = vmatpush1.bf16.msra.mxu1 %v8422_v62 }
 0x1c8   :  { %947 = vmatprep.subr.bf16.mxu1 %v8430_v0 }
 0x1cb   :  { %948 = vmatpush1.bf16.msra.mxu1 %v8428_v2 }
 0x1cc   :  { %949 = vmatprep.subr.bf16.mxu1 %v8436_v4 }
 0x1cf   :  { %950 = vmatpush1.bf16.msra.mxu1 %v8434_v6  ;;  %v433_v6 = vunpack.c.l.s4 %v8817_v5  ;;  %v1218_v5 = vld [vmem:[#allocation15 + $0xc0] sm:$0xff] }
 0x1d0   :  { %951 = vmatprep.subr.bf16.mxu1 %v8442_v8 }
 0x1d1   :  { %v434_v8 = vunpack.c.0.s8 %v433_v6  ;;  %v1222_v6 = vld [vmem:[#allocation15 + $0xe0] sm:$0xff] }
 0x1d3   :  { %952 = vmatpush1.bf16.msra.mxu1 %v8440_v10  ;;  %v9014_v11 = vsub.s32 %v434_v8, %v9011_v9  ;;  %v7477_v8 = vcombine.high %v1218_v5, %v1222_v6 }
 0x1d4   :  { %953 = vmatprep.subr.bf16.mxu1 %v8448_v12 }
 0x1d7   :  { %954 = vmatpush1.bf16.msra.mxu1 %v8446_v14  ;;  %v424_v14 = vld [vmem:[#allocation11] sm:$0xf] }
 0x1d8   :  { %955 = vmatprep.subr.bf16.mxu1 %v8454_v16  ;;  %v9018_v16 = vsub.s32 0, %v9011_v9 }
 0x1db   :  { %956 = vmatpush1.bf16.msra.mxu1 %v8452_v18 }
 0x1dc   :  { %957 = vmatprep.subr.bf16.mxu1 %v8460_v20 }
 0x1df   :  { %958 = vmatpush1.bf16.msra.mxu1 %v8458_v22 }
 0x1e0   :  { %959 = vmatprep.subr.bf16.mxu1 %v8466_v24 }
 0x1e3   :  { %960 = vmatpush1.bf16.msra.mxu1 %v8464_v26 }
 0x1e4   :  { %961 = vmatprep.subr.bf16.mxu1 %v8472_v30  ;;  %v9029_v30 = vsub.s32 1, %v9011_v9 }
 0x1e7   :  { %962 = vmatpush1.bf16.msra.mxu1 %v8470_v29 }
 0x27d   :  { %v384_v31 = vpop.f32.mrb[0].mxu1 }
 0x27e   :  { %v391_v32 = vrot.slane %v384_v31, 4  ;;  %v386_v33 = vpop.f32.mrb[1].mxu1 }
 0x27f   :  { %v397_v34 = vrot.slane %v386_v33, 4  ;;  %v388_v35 = vpop.f32.mrb[2].mxu1 }
 0x280   :  { %v392_v36 = vadd.f32 %v391_v32, %v384_v31  ;;  %v389_v37 = vpop.f32.mrb[3].mxu1  ;;  %v9032_v32 = vsub.s32 3, %v9011_v9 }
 0x281   :  { %v398_v38 = vadd.f32 %v397_v34, %v386_v33 }
 0x282   :  { %v393_v39 = vrot.slane %v392_v36, 2 }
 0x283   :  { %v399_v40 = vrot.slane %v398_v38, 2 }
 0x284   :  { %v394_v41 = vadd.f32 %v393_v39, %v392_v36 }
 0x285   :  { %v400_v42 = vadd.f32 %v399_v40, %v398_v38 }
 0x286   :  { %v395_v43 = vrot.slane %v394_v41, 1 }
 0x287   :  { %v401_v44 = vrot.slane %v400_v42, 1 }
 0x288   :  { %v396_v45 = vadd.f32 %v395_v43, %v394_v41 }
 0x289   :  { %v402_v46 = vadd.f32 %v401_v44, %v400_v42 }
 0x28a   :  { %v404_v47 = vmul.f32 0.125, %v396_v45  ;;  %v1194_v45 = vld [vmem:[#allocation15] sm:$0xff] }
 0x28b   :  { %v405_v48 = vmul.f32 0.125, %v402_v46  ;;  %v1198_v46 = vld [vmem:[#allocation15 + $0x20] sm:$0xff] }
 0x28c   :  { %v406_v49 = vsub.f32 %v384_v31, %v404_v47 }
 0x28d   :  { %v407_v50 = vsub.f32 %v386_v33, %v405_v48 }
 0x28e   :  { %v408_v51 = vmul.f32 %v406_v49, %v406_v49  ;;  %v1199_v49 = vld [vmem:[#allocation15 + $0x28] sm:$0xff] }
 0x28f   :  { %v409_v52 = vmul.f32 %v407_v50, %v407_v50  ;;  %v7452_v50 = vcombine.low %v1194_v45, %v1198_v46 }
 0x290   :  { %v410_v53 = vrot.slane %v408_v51, 4 }
 0x291   :  { %v416_v54 = vrot.slane %v409_v52, 4 }
 0x292   :  { %v411_v55 = vadd.f32 %v410_v53, %v408_v51  ;;  %v1202_v53 = vld [vmem:[#allocation15 + $0x40] sm:$0xff] }
 0x293   :  { %v417_v56 = vadd.f32 %v416_v54, %v409_v52  ;;  %v1206_v54 = vld [vmem:[#allocation15 + $0x60] sm:$0xff] }
 0x294   :  { %v412_v57 = vrot.slane %v411_v55, 2 }
 0x295   :  { %v418_v58 = vrot.slane %v417_v56, 2 }
 0x296   :  { %v413_v59 = vadd.f32 %v412_v57, %v411_v55  ;;  %v1203_v55 = vld [vmem:[#allocation15 + $0x48] sm:$0xff] }
 0x297   :  { %v419_v60 = vadd.f32 %v418_v58, %v417_v56  ;;  %v7461_v56 = vcombine.high %v1202_v53, %v1206_v54  ;;  %v1207_v57 = vld [vmem:[#allocation15 + $0x68] sm:$0xff]  ;;  %v7460_v58 = vcombine.low %v1202_v53, %v1206_v54 }
 0x298   :  { %v414_v61 = vrot.slane %v413_v59, 1  ;;  %v1259_v53 = vld [vmem:[#allocation15 + $0x208] sm:$0xff] }
 0x299   :  { %v420_v62 = vrot.slane %v419_v60, 1 }
 0x29a   :  { %v415_v63 = vadd.f32 %v414_v61, %v413_v59  ;;  %v7462_v59 = vcombine.low %v1203_v55, %v1207_v57  ;;  %v1210_v61 = vld [vmem:[#allocation15 + $0x80] sm:$0xff] }
 0x29b   :  { %v421_v0 = vadd.f32 %v420_v62, %v419_v60  ;;  %v7463_v60 = vcombine.high %v1203_v55, %v1207_v57  ;;  %v1214_v62 = vld [vmem:[#allocation15 + $0xa0] sm:$0xff]  ;;  %v1263_v55 = vld [vmem:[#allocation15 + $0x228] sm:$0xff] }
 0x29c   :  { %v422_v1 = vmul.f32 0.125, %v415_v63  ;;  %v1211_v63 = vld [vmem:[#allocation15 + $0x88] sm:$0xff]  ;;  %v7518_v57 = vcombine.low %v1259_v53, %v1263_v55 }
 0x29d   :  { %v423_v2 = vmul.f32 0.125, %v421_v0  ;;  %v7469_v0 = vcombine.high %v1210_v61, %v1214_v62 }
 0x29e   :  { %v425_v3 = vadd.f32 0.8, %v422_v1  ;;  %v1215_v1 = vld [vmem:[#allocation15 + $0xa8] sm:$0xff] }
 0x29f   :  { %v426_v4 = vadd.f32 0.8, %v423_v2  ;;  %v7468_v2 = vcombine.low %v1210_v61, %v1214_v62  ;;  %v1267_v61 = vld [vmem:[#allocation15 + $0x248] sm:$0xff] }
 0x2a0   :  { %8473 = vrsqrt.f32 %v425_v3  ;;  %v7470_v3 = vcombine.low %v1211_v63, %v1215_v1 }
 0x2a1   :  { %8475 = vrsqrt.f32 %v426_v4  ;;  %v7471_v4 = vcombine.high %v1211_v63, %v1215_v1  ;;  %v1271_v63 = vld [vmem:[#allocation15 + $0x268] sm:$0xff] }
 0x2a2   :  { %v7526_v1 = vcombine.low %v1267_v61, %v1271_v63 }
 0x2aa   :  { %v8474_v10 = vpop.eup %8473 }
 0x2ab   :  { %v8476_v12 = vpop.eup %8475 }
 0x2ac   :  { %v431_v13 = vcombine.low %v8474_v10, %v8476_v12  ;;  %v1223_v10 = vld [vmem:[#allocation15 + $0xe8] sm:$0xff]  ;;  %v7476_v12 = vcombine.low %v1218_v5, %v1222_v6 }
 0x2ad   :  { %v1275_v5 = vld [vmem:[#allocation15 + $0x288] sm:$0xff] }
 0x2ae   :  { %v438_v15 = vrot.slane %v431_v13, %v9014_v11  ;;  %v7478_v13 = vcombine.low %v1219_v7, %v1223_v10 }
 0x2b0   :  { %v440_v18 = vmul.f32 %v438_v15, %v424_v14  ;;  %v1226_v15 = vld [vmem:[#allocation15 + $0x100] sm:$0xff] }
 0x2b2   :  { %v445_v19 = vrot.slane %v440_v18, %v9018_v16  ;;  %v449_v20 = vrot.slane %v440_v18, %v9021_v17  ;;  %v1230_v18 = vld [vmem:[#allocation15 + $0x120] sm:$0xff] }
 0x2b4   :  { %v452_v21 = vmul.f32 %v445_v19, %v404_v47  ;;  %v453_v22 = vmul.f32 %v449_v20, %v405_v48  ;;  %v470_v23 = vrot.slane %v445_v19, %v9018_v16  ;;  %v474_v24 = vrot.slane %v449_v20, %v9018_v16  ;;  %v1195_v47 = vld [vmem:[#allocation15 + $0x8] sm:$0xff] }
 0x2b5   :  { %v7453_v48 = vcombine.high %v1194_v45, %v1198_v46  ;;  %v7454_v51 = vcombine.low %v1195_v47, %v1199_v49  ;;  %v7455_v52 = vcombine.high %v1195_v47, %v1199_v49  ;;  %v1227_v19 = vld [vmem:[#allocation15 + $0x108] sm:$0xff]  ;;  %v7485_v20 = vcombine.high %v1226_v15, %v1230_v18 }
 0x2b6   :  { %v456_v25 = vcombine.low %v452_v21, %v453_v22  ;;  %v476_v26 = vmul.f32 %v474_v24, %v386_v33  ;;  %v475_v27 = vmul.f32 %v470_v23, %v384_v31  ;;  %v1231_v21 = vld [vmem:[#allocation15 + $0x128] sm:$0xff]  ;;  %v7484_v22 = vcombine.low %v1226_v15, %v1230_v18 }
 0x2b7   :  { %2730 = vmatprep.subr.bf16.mxu0 %v7453_v48  ;;  %2812 = vmatprep.subr.bf16.mxu1 %v7455_v52  ;;  %v7486_v23 = vcombine.low %v1227_v19, %v1231_v21  ;;  %v7487_v24 = vcombine.high %v1227_v19, %v1231_v21  ;;  %v1251_v45 = vld [vmem:[#allocation15 + $0x1c8] sm:$0xff]  ;;  %v1262_v52 = vld [vmem:[#allocation15 + $0x220] sm:$0xff] }
 0x2b8   :  { %v463_v28 = vrot.slane %v456_v25, %v9014_v11  ;;  %v1234_v25 = vld [vmem:[#allocation15 + $0x140] sm:$0xff]  ;;  %v1255_v47 = vld [vmem:[#allocation15 + $0x1e8] sm:$0xff] }
 0x2b9   :  { %v7510_v49 = vcombine.low %v1251_v45, %v1255_v47  ;;  %v1283_v15 = vld [vmem:[#allocation15 + $0x2c8] sm:$0xff] }
 0x2ba   :  { %v464_v29 = vrot.slane %v463_v28, 7  ;;  %v1287_v19 = vld [vmem:[#allocation15 + $0x2e8] sm:$0xff] }
 0x2bb   :  { %v7542_v21 = vcombine.low %v1283_v15, %v1287_v19 }
 0x2bc   :  { %v466_v34 = vsub.f32 %v424_v14, %v464_v29  ;;  %v7479_v14 = vcombine.high %v1219_v7, %v1223_v10  ;;  %v1239_v29 = vld [vmem:[#allocation15 + $0x168] sm:$0xff] }
 0x2bd   :  { %v1279_v7 = vld [vmem:[#allocation15 + $0x2a8] sm:$0xff] }
 0x2be   :  { %v481_v35 = vrot.slane %v466_v34, %v9029_v30  ;;  %v485_v36 = vrot.slane %v466_v34, %v9032_v32  ;;  %v7534_v10 = vcombine.low %v1275_v5, %v1279_v7 }
 0x2c0   :  { %v495_v37 = vrot.slane %v485_v36, %v9029_v30  ;;  %v491_v38 = vrot.slane %v481_v35, %v9029_v30 }
 0x2c2   :  { %v497_v33 = vadd.f32 %v495_v37, %v476_v26  ;;  %v496_v31 = vadd.f32 %v491_v38, %v475_v27  ;;  %v1238_v26 = vld [vmem:[#allocation15 + $0x160] sm:$0xff]  ;;  %v1235_v27 = vld [vmem:[#allocation15 + $0x148] sm:$0xff] }
 0x2c3   :  { %v7493_v28 = vcombine.high %v1234_v25, %v1238_v26  ;;  %v7492_v34 = vcombine.low %v1234_v25, %v1238_v26  ;;  %v7494_v35 = vcombine.low %v1235_v27, %v1239_v29  ;;  %v7495_v36 = vcombine.high %v1235_v27, %v1239_v29  ;;  %v1242_v37 = vld [vmem:[#allocation15 + $0x180] sm:$0xff]  ;;  %v1291_v25 = vld [vmem:[#allocation15 + $0x308] sm:$0xff] }
 0x2c4   :  { %vm499_vm3 = vcmp.gt.f32.partialorder %v497_v33, 0.0  ;;  %v501_v39 = vmul.f32 0.2, %v497_v33  ;;  %vm498_vm4 = vcmp.gt.f32.partialorder %v496_v31, 0.0  ;;  %v500_v40 = vmul.f32 0.2, %v496_v31 }
 0x2c5   :  { %v1246_v38 = vld [vmem:[#allocation15 + $0x1a0] sm:$0xff]  ;;  %v1295_v27 = vld [vmem:[#allocation15 + $0x328] sm:$0xff] }
 0x2c6   :  { %v503_v41 = vsel %vm499_vm3, %v497_v33, %v501_v39  ;;  %v502_v42 = vsel %vm498_vm4, %v496_v31, %v500_v40  ;;  %v1243_v33 = vld [vmem:[#allocation15 + $0x188] sm:$0xff]  ;;  %v7501_v31 = vcombine.high %v1242_v37, %v1246_v38  ;;  %v7500_v40 = vcombine.low %v1242_v37, %v1246_v38 }
 0x2c7   :  { %v505_v43 = vpack.c.bf16 %v503_v41, %v503_v41  ;;  %v504_v44 = vpack.c.bf16 %v502_v42, %v502_v42  ;;  %v1247_v39 = vld [vmem:[#allocation15 + $0x1a8] sm:$0xff]  ;;  %v7550_v29 = vcombine.low %v1291_v25, %v1295_v27 }
 0x2c8   :  { %v7502_v41 = vcombine.low %v1243_v33, %v1247_v39  ;;  %v7503_v42 = vcombine.high %v1243_v33, %v1247_v39  ;;  %v1299_v37 = vld [vmem:[#allocation15 + $0x348] sm:$0xff] }
 0x2c9   :  { %922 = vmatprep.mubr.bf16.mxu0 %v505_v43  ;;  %963 = vmatprep.mubr.bf16.mxu1 %v505_v43  ;;  %v1250_v43 = vld [vmem:[#allocation15 + $0x1c0] sm:$0xff]  ;;  %v1303_v33 = vld [vmem:[#allocation15 + $0x368] sm:$0xff] }
 0x2ca   :  { %923 = vmatmul.mubr.bf16.vlgmr.msra.gmra.mrb[4].mxu0 %v504_v44  ;;  %964 = vmatmul.mubr.bf16.vlgmr.msra.gmra.mrb[4].mxu1 %v504_v44  ;;  %v1254_v44 = vld [vmem:[#allocation15 + $0x1e0] sm:$0xff]  ;;  %v7558_v39 = vcombine.low %v1299_v37, %v1303_v33 }
 0x2cb   :  { %2731 = vmatpush1.bf16.msra.mxu0 %v7452_v50  ;;  %2813 = vmatpush1.bf16.msra.mxu1 %v7454_v51  ;;  %v7509_v46 = vcombine.high %v1250_v43, %v1254_v44  ;;  %v7508_v48 = vcombine.low %v1250_v43, %v1254_v44  ;;  %v7511_v50 = vcombine.high %v1251_v45, %v1255_v47  ;;  %v1258_v51 = vld [vmem:[#allocation15 + $0x200] sm:$0xff]  ;;  %v1307_v43 = vld [vmem:[#allocation15 + $0x388] sm:$0xff] }
 0x2cc   :  { %2732 = vmatprep.subr.bf16.mxu0 %v7461_v56  ;;  %2814 = vmatprep.subr.bf16.mxu1 %v7463_v60  ;;  %v7517_v54 = vcombine.high %v1258_v51, %v1262_v52  ;;  %v7516_v56 = vcombine.low %v1258_v51, %v1262_v52  ;;  %v1270_v60 = vld [vmem:[#allocation15 + $0x260] sm:$0xff]  ;;  %v1311_v45 = vld [vmem:[#allocation15 + $0x3a8] sm:$0xff] }
 0x2cd   :  { %v7566_v47 = vcombine.low %v1307_v43, %v1311_v45  ;;  %v1315_v51 = vld [vmem:[#allocation15 + $0x3c8] sm:$0xff] }
 0x2cf   :  { %2733 = vmatpush1.bf16.msra.mxu0 %v7460_v58  ;;  %2815 = vmatpush1.bf16.msra.mxu1 %v7462_v59  ;;  %v7519_v58 = vcombine.high %v1259_v53, %v1263_v55  ;;  %v1266_v59 = vld [vmem:[#allocation15 + $0x240] sm:$0xff] }
 0x2d0   :  { %2734 = vmatprep.subr.bf16.mxu0 %v7469_v0  ;;  %2816 = vmatprep.subr.bf16.mxu1 %v7471_v4  ;;  %v7525_v62 = vcombine.high %v1266_v59, %v1270_v60  ;;  %v7524_v0 = vcombine.low %v1266_v59, %v1270_v60  ;;  %v1278_v4 = vld [vmem:[#allocation15 + $0x2a0] sm:$0xff]  ;;  %v9042_v59 = vld [vmem:[#allocation15 + $0x408] sm:$0xff] }
 0x2d3   :  { %2735 = vmatpush1.bf16.msra.mxu0 %v7468_v2  ;;  %2817 = vmatpush1.bf16.msra.mxu1 %v7470_v3  ;;  %v7527_v2 = vcombine.high %v1267_v61, %v1271_v63  ;;  %v1274_v3 = vld [vmem:[#allocation15 + $0x280] sm:$0xff]  ;;  %v9046_v61 = vld [vmem:[#allocation15 + $0x428] sm:$0xff] }
 0x2d4   :  { %2736 = vmatprep.subr.bf16.mxu0 %v7477_v8  ;;  %2818 = vmatprep.subr.bf16.mxu1 %v7479_v14  ;;  %v7533_v6 = vcombine.high %v1274_v3, %v1278_v4  ;;  %v7532_v8 = vcombine.low %v1274_v3, %v1278_v4  ;;  %v1286_v14 = vld [vmem:[#allocation15 + $0x2e0] sm:$0xff]  ;;  %v7582_v63 = vcombine.low %v9042_v59, %v9046_v61 }
 0x2d7   :  { %2737 = vmatpush1.bf16.msra.mxu0 %v7476_v12  ;;  %2819 = vmatpush1.bf16.msra.mxu1 %v7478_v13  ;;  %v7535_v12 = vcombine.high %v1275_v5, %v1279_v7  ;;  %v1282_v13 = vld [vmem:[#allocation15 + $0x2c0] sm:$0xff] }
 0x2d8   :  { %2738 = vmatprep.subr.bf16.mxu0 %v7485_v20  ;;  %2820 = vmatprep.subr.bf16.mxu1 %v7487_v24  ;;  %v7541_v18 = vcombine.high %v1282_v13, %v1286_v14  ;;  %v7540_v20 = vcombine.low %v1282_v13, %v1286_v14  ;;  %v1294_v24 = vld [vmem:[#allocation15 + $0x320] sm:$0xff] }
 0x2db   :  { %2739 = vmatpush1.bf16.msra.mxu0 %v7484_v22  ;;  %2821 = vmatpush1.bf16.msra.mxu1 %v7486_v23  ;;  %v7543_v22 = vcombine.high %v1283_v15, %v1287_v19  ;;  %v1290_v23 = vld [vmem:[#allocation15 + $0x300] sm:$0xff] }
 0x2dc   :  { %2740 = vmatprep.subr.bf16.mxu0 %v7493_v28  ;;  %2822 = vmatprep.subr.bf16.mxu1 %v7495_v36  ;;  %v7549_v26 = vcombine.high %v1290_v23, %v1294_v24  ;;  %v7548_v28 = vcombine.low %v1290_v23, %v1294_v24  ;;  %v1302_v36 = vld [vmem:[#allocation15 + $0x360] sm:$0xff] }
 0x2df   :  { %2741 = vmatpush1.bf16.msra.mxu0 %v7492_v34  ;;  %2823 = vmatpush1.bf16.msra.mxu1 %v7494_v35  ;;  %v7551_v34 = vcombine.high %v1291_v25, %v1295_v27  ;;  %v1298_v35 = vld [vmem:[#allocation15 + $0x340] sm:$0xff] }
 0x2e0   :  { %2742 = vmatprep.subr.bf16.mxu0 %v7501_v31  ;;  %2824 = vmatprep.subr.bf16.mxu1 %v7503_v42  ;;  %v7557_v38 = vcombine.high %v1298_v35, %v1302_v36  ;;  %v7556_v31 = vcombine.low %v1298_v35, %v1302_v36  ;;  %v1310_v42 = vld [vmem:[#allocation15 + $0x3a0] sm:$0xff] }
 0x2e3   :  { %2743 = vmatpush1.bf16.msra.mxu0 %v7500_v40  ;;  %2825 = vmatpush1.bf16.msra.mxu1 %v7502_v41  ;;  %v7559_v40 = vcombine.high %v1299_v37, %v1303_v33  ;;  %v1306_v41 = vld [vmem:[#allocation15 + $0x380] sm:$0xff] }
 0x2e4   :  { %2744 = vmatprep.subr.bf16.mxu0 %v7509_v46  ;;  %2826 = vmatprep.subr.bf16.mxu1 %v7511_v50  ;;  %v7565_v44 = vcombine.high %v1306_v41, %v1310_v42  ;;  %v7564_v46 = vcombine.low %v1306_v41, %v1310_v42  ;;  %v1318_v50 = vld [vmem:[#allocation15 + $0x3e0] sm:$0xff] }
 0x2e7   :  { %2745 = vmatpush1.bf16.msra.mxu0 %v7508_v48  ;;  %2827 = vmatpush1.bf16.msra.mxu1 %v7510_v49  ;;  %v7567_v48 = vcombine.high %v1307_v43, %v1311_v45  ;;  %v1314_v49 = vld [vmem:[#allocation15 + $0x3c0] sm:$0xff] }
 0x2e8   :  { %2746 = vmatprep.subr.bf16.mxu0 %v7517_v54  ;;  %2828 = vmatprep.subr.bf16.mxu1 %v7519_v58  ;;  %v7572_v52 = vcombine.low %v1314_v49, %v1318_v50  ;;  %v7573_v53 = vcombine.high %v1314_v49, %v1318_v50  ;;  %v1319_v54 = vld [vmem:[#allocation15 + $0x3e8] sm:$0xff]  ;;  %v9040_v58 = vld [vmem:[#allocation15 + $0x420] sm:$0xff] }
 0x2e9   :  { %v7574_v55 = vcombine.low %v1315_v51, %v1319_v54 }
 0x2eb   :  { %2747 = vmatpush1.bf16.msra.mxu0 %v7516_v56  ;;  %2829 = vmatpush1.bf16.msra.mxu1 %v7518_v57  ;;  %v7575_v56 = vcombine.high %v1315_v51, %v1319_v54  ;;  %v9038_v57 = vld [vmem:[#allocation15 + $0x400] sm:$0xff] }
 0x2ec   :  { %2748 = vmatprep.subr.bf16.mxu0 %v7525_v62  ;;  %2830 = vmatprep.subr.bf16.mxu1 %v7527_v2  ;;  %v7581_v60 = vcombine.high %v9038_v57, %v9040_v58  ;;  %v7580_v62 = vcombine.low %v9038_v57, %v9040_v58 }
 0x2ef   :  { %2749 = vmatpush1.bf16.msra.mxu0 %v7524_v0  ;;  %2831 = vmatpush1.bf16.msra.mxu1 %v7526_v1  ;;  %v7583_v0 = vcombine.high %v9042_v59, %v9046_v61 }
 0x2f0   :  { %2750 = vmatprep.subr.bf16.mxu0 %v7533_v6  ;;  %2832 = vmatprep.subr.bf16.mxu1 %v7535_v12 }
 0x2f3   :  { %2751 = vmatpush1.bf16.msra.mxu0 %v7532_v8  ;;  %2833 = vmatpush1.bf16.msra.mxu1 %v7534_v10 }
 0x2f4   :  { %2752 = vmatprep.subr.bf16.mxu0 %v7541_v18  ;;  %2834 = vmatprep.subr.bf16.mxu1 %v7543_v22 }
 0x2f7   :  { %2753 = vmatpush1.bf16.msra.mxu0 %v7540_v20  ;;  %2835 = vmatpush1.bf16.msra.mxu1 %v7542_v21 }
 0x2f8   :  { %2754 = vmatprep.subr.bf16.mxu0 %v7549_v26  ;;  %2836 = vmatprep.subr.bf16.mxu1 %v7551_v34 }
 0x2fb   :  { %2755 = vmatpush1.bf16.msra.mxu0 %v7548_v28  ;;  %2837 = vmatpush1.bf16.msra.mxu1 %v7550_v29 }
 0x2fc   :  { %2756 = vmatprep.subr.bf16.mxu0 %v7557_v38  ;;  %2838 = vmatprep.subr.bf16.mxu1 %v7559_v40 }
 0x2ff   :  { %2757 = vmatpush1.bf16.msra.mxu0 %v7556_v31  ;;  %2839 = vmatpush1.bf16.msra.mxu1 %v7558_v39 }
 0x300   :  { %2758 = vmatprep.subr.bf16.mxu0 %v7565_v44  ;;  %2840 = vmatprep.subr.bf16.mxu1 %v7567_v48 }
 0x303   :  { %2759 = vmatpush1.bf16.msra.mxu0 %v7564_v46  ;;  %2841 = vmatpush1.bf16.msra.mxu1 %v7566_v47 }
 0x304   :  { %2760 = vmatprep.subr.bf16.mxu0 %v7573_v53  ;;  %2842 = vmatprep.subr.bf16.mxu1 %v7575_v56 }
 0x307   :  { %2761 = vmatpush1.bf16.msra.mxu0 %v7572_v52  ;;  %2843 = vmatpush1.bf16.msra.mxu1 %v7574_v55 }
 0x308   :  { %2771 = vmatprep.subr.bf16.mxu0 %v7581_v60  ;;  %2853 = vmatprep.subr.bf16.mxu1 %v7583_v0 }
 0x39d   :  { %v9054_v1 = vpop.f32.mrb[4].mxu0  ;;  %v9056_v2 = vpop.f32.mrb[4].mxu1 }
 0x39e   :  { %v972_v3 = vrot.slane %v9054_v1, 4  ;;  %v984_v4 = vrot.slane %v9056_v2, 4  ;;  %v9060_v5 = vpop.f32.mrb[5].mxu0  ;;  %v9062_v6 = vpop.f32.mrb[5].mxu1 }
 0x39f   :  { %v978_v7 = vrot.slane %v9060_v5, 4  ;;  %v990_v8 = vrot.slane %v9062_v6, 4  ;;  %v928_v10 = vpop.f32.mrb[6].mxu0  ;;  %v969_v12 = vpop.f32.mrb[6].mxu1 }
 0x3a0   :  { %v973_v13 = vadd.f32 %v972_v3, %v9054_v1  ;;  %v985_v14 = vadd.f32 %v984_v4, %v9056_v2  ;;  %v929_v15 = vpop.f32.mrb[7].mxu0  ;;  %v970_v18 = vpop.f32.mrb[7].mxu1 }
 0x3a1   :  { %v979_v19 = vadd.f32 %v978_v7, %v9060_v5  ;;  %v991_v20 = vadd.f32 %v990_v8, %v9062_v6 }
 0x3a2   :  { %v974_v21 = vrot.slane %v973_v13, 2  ;;  %v986_v22 = vrot.slane %v985_v14, 2 }
 0x3a3   :  { %v980_v23 = vrot.slane %v979_v19, 2  ;;  %v992_v24 = vrot.slane %v991_v20, 2 }
 0x3a4   :  { %v975_v25 = vadd.f32 %v974_v21, %v973_v13  ;;  %v987_v26 = vadd.f32 %v986_v22, %v985_v14 }
 0x3a5   :  { %v981_v27 = vadd.f32 %v980_v23, %v979_v19  ;;  %v993_v28 = vadd.f32 %v992_v24, %v991_v20 }
 0x3a6   :  { %v976_v29 = vrot.slane %v975_v25, 1  ;;  %v988_v34 = vrot.slane %v987_v26, 1 }
 0x3a7   :  { %v982_v35 = vrot.slane %v981_v27, 1  ;;  %v994_v36 = vrot.slane %v993_v28, 1 }
 0x3a8   :  { %v977_v37 = vadd.f32 %v976_v29, %v975_v25  ;;  %v989_v38 = vadd.f32 %v988_v34, %v987_v26 }
 0x3a9   :  { %v983_v33 = vadd.f32 %v982_v35, %v981_v27  ;;  %v995_v31 = vadd.f32 %v994_v36, %v993_v28 }
 0x3aa   :  { %v9070_v39 = vmul.f32 0.125, %v977_v37  ;;  %v9072_v40 = vmul.f32 0.125, %v989_v38 }
 0x3ab   :  { %v9074_v41 = vmul.f32 0.125, %v983_v33  ;;  %v9076_v42 = vmul.f32 0.125, %v995_v31 }
 0x3ac   :  { %v1000_v43 = vsub.f32 %v9054_v1, %v9070_v39  ;;  %v1002_v44 = vsub.f32 %v9056_v2, %v9072_v40 }
 0x3ad   :  { %v1001_v45 = vsub.f32 %v9060_v5, %v9074_v41  ;;  %v1003_v46 = vsub.f32 %v9062_v6, %v9076_v42 }
 0x3ae   :  { %v1004_v47 = vmul.f32 %v1000_v43, %v1000_v43  ;;  %v1006_v48 = vmul.f32 %v1002_v44, %v1002_v44 }
 0x3af   :  { %v1005_v49 = vmul.f32 %v1001_v45, %v1001_v45  ;;  %v1007_v50 = vmul.f32 %v1003_v46, %v1003_v46 }
 0x3b0   :  { %v1008_v51 = vrot.slane %v1004_v47, 4  ;;  %v1020_v52 = vrot.slane %v1006_v48, 4 }
 0x3b1   :  { %v1014_v53 = vrot.slane %v1005_v49, 4  ;;  %v1026_v54 = vrot.slane %v1007_v50, 4 }
 0x3b2   :  { %v1009_v55 = vadd.f32 %v1008_v51, %v1004_v47  ;;  %v1021_v56 = vadd.f32 %v1020_v52, %v1006_v48  ;;  %v1036_v47 = vld [vmem:[#allocation14] sm:$0xff] }
 0x3b3   :  { %v1015_v60 = vadd.f32 %v1014_v53, %v1005_v49  ;;  %v1027_v0 = vadd.f32 %v1026_v54, %v1007_v50  ;;  %v9089_v49 = vsub.s32 4, %v9011_v9  ;;  %v9092_v50 = vsub.s32 6, %v9011_v9 }
 0x3b4   :  { %v1010_v3 = vrot.slane %v1009_v55, 2  ;;  %v1022_v4 = vrot.slane %v1021_v56, 2 }
 0x3b5   :  { %v1016_v7 = vrot.slane %v1015_v60, 2  ;;  %v1028_v8 = vrot.slane %v1027_v0, 2 }
 0x3b6   :  { %v1011_v10 = vadd.f32 %v1010_v3, %v1009_v55  ;;  %v1023_v12 = vadd.f32 %v1022_v4, %v1021_v56 }
 0x3b7   :  { %v1017_v13 = vadd.f32 %v1016_v7, %v1015_v60  ;;  %v1029_v14 = vadd.f32 %v1028_v8, %v1027_v0 }
 0x3b8   :  { %v1012_v15 = vrot.slane %v1011_v10, 1  ;;  %v1024_v18 = vrot.slane %v1023_v12, 1 }
 0x3b9   :  { %v1018_v19 = vrot.slane %v1017_v13, 1  ;;  %v1030_v20 = vrot.slane %v1029_v14, 1 }
 0x3ba   :  { %v1013_v21 = vadd.f32 %v1012_v15, %v1011_v10  ;;  %v1025_v22 = vadd.f32 %v1024_v18, %v1023_v12 }
 0x3bb   :  { %v1019_v23 = vadd.f32 %v1018_v19, %v1017_v13  ;;  %v1031_v24 = vadd.f32 %v1030_v20, %v1029_v14  ;;  %v9113_v20 = vsub.s32 7, %v9011_v9 }
 0x3bc   :  { %v1032_v25 = vmul.f32 0.125, %v1013_v21  ;;  %v1034_v26 = vmul.f32 0.125, %v1025_v22  ;;  %v9116_v21 = vsub.s32 5, %v9011_v9 }
 0x3bd   :  { %v1033_v27 = vmul.f32 0.125, %v1019_v23  ;;  %v1035_v28 = vmul.f32 0.125, %v1031_v24 }
 0x3be   :  { %v1037_v29 = vadd.f32 0.8, %v1032_v25  ;;  %v1039_v34 = vadd.f32 0.8, %v1034_v26 }
 0x3bf   :  { %v1038_v35 = vadd.f32 0.8, %v1033_v27  ;;  %v1040_v36 = vadd.f32 0.8, %v1035_v28 }
 0x3c0   :  { %8477 = vrsqrt.f32 %v1037_v29 }
 0x3c1   :  { %8479 = vrsqrt.f32 %v1039_v34 }
 0x3c2   :  { %8481 = vrsqrt.f32 %v1038_v35 }
 0x3c3   :  { %8483 = vrsqrt.f32 %v1040_v36 }
 0x3ca   :  { %v8478_v37 = vpop.eup %8477 }
 0x3cb   :  { %v8480_v38 = vpop.eup %8479 }
 0x3cc   :  { %v8482_v33 = vpop.eup %8481 }
 0x3cd   :  { %v8484_v31 = vpop.eup %8483  ;;  %v1049_v43 = vcombine.low %v8478_v37, %v8482_v33  ;;  %v1330_v37 = vld [vmem:[#allocation15 + $0x440] sm:$0xff] }
 0x3ce   :  { %v1050_v44 = vcombine.low %v8480_v38, %v8484_v31  ;;  %v1334_v31 = vld [vmem:[#allocation15 + $0x460] sm:$0xff] }
 0x3cf   :  { %v1057_v45 = vrot.slane %v1049_v43, %v9014_v11  ;;  %v1331_v43 = vld [vmem:[#allocation15 + $0x448] sm:$0xff] }
 0x3d0   :  { %v1064_v46 = vrot.slane %v1050_v44, %v9014_v11  ;;  %v1335_v44 = vld [vmem:[#allocation15 + $0x468] sm:$0xff] }
 0x3d2   :  { %v1065_v48 = vcombine.low %v1057_v45, %v1064_v46 }
 0x3d4   :  { %v1067_v51 = vmul.f32 %v1065_v48, %v1036_v47  ;;  %v1338_v48 = vld [vmem:[#allocation15 + $0x480] sm:$0xff] }
 0x3d6   :  { %v1072_v52 = vrot.slane %v1067_v51, %v9018_v16  ;;  %v1076_v53 = vrot.slane %v1067_v51, %v9021_v17  ;;  %v1080_v54 = vrot.slane %v1067_v51, %v9089_v49  ;;  %v1084_v55 = vrot.slane %v1067_v51, %v9092_v50 }
 0x3d7   :  { %v7589_v51 = vcombine.high %v1330_v37, %v1334_v31 }
 0x3d8   :  { %v1089_v56 = vmul.f32 %v1072_v52, %v9070_v39  ;;  %v1090_v60 = vmul.f32 %v1076_v53, %v9074_v41  ;;  %v1091_v0 = vmul.f32 %v1080_v54, %v9072_v40  ;;  %v1092_v3 = vmul.f32 %v1084_v55, %v9076_v42 }
 0x3d9   :  { %v1132_v4 = vrot.slane %v1084_v55, %v9018_v16  ;;  %v1124_v7 = vrot.slane %v1076_v53, %v9018_v16  ;;  %v1120_v8 = vrot.slane %v1072_v52, %v9018_v16  ;;  %v1128_v10 = vrot.slane %v1080_v54, %v9018_v16  ;;  %v1342_v53 = vld [vmem:[#allocation15 + $0x4a0] sm:$0xff]  ;;  %v1339_v54 = vld [vmem:[#allocation15 + $0x488] sm:$0xff] }
 0x3da   :  { %v1097_v12 = vcombine.low %v1089_v56, %v1090_v60  ;;  %v1098_v13 = vcombine.low %v1091_v0, %v1092_v3  ;;  %v7591_v52 = vcombine.high %v1331_v43, %v1335_v44  ;;  %v1343_v55 = vld [vmem:[#allocation15 + $0x4a8] sm:$0xff]  ;;  %v7588_v60 = vcombine.low %v1330_v37, %v1334_v31 }
 0x3db   :  { %v1136_v14 = vmul.f32 %v1132_v4, %v9062_v6  ;;  %v1134_v39 = vmul.f32 %v1124_v7, %v9060_v5  ;;  %v1133_v41 = vmul.f32 %v1120_v8, %v9054_v1  ;;  %v1135_v40 = vmul.f32 %v1128_v10, %v9056_v2  ;;  %v1346_v7 = vld [vmem:[#allocation15 + $0x4c0] sm:$0xff]  ;;  %v1347_v10 = vld [vmem:[#allocation15 + $0x4c8] sm:$0xff] }
 0x3dc   :  { %v1105_v42 = vrot.slane %v1097_v12, %v9014_v11  ;;  %v1112_v15 = vrot.slane %v1098_v13, %v9014_v11  ;;  %v7590_v0 = vcombine.low %v1331_v43, %v1335_v44  ;;  %v7597_v3 = vcombine.high %v1338_v48, %v1342_v53  ;;  %v1350_v8 = vld [vmem:[#allocation15 + $0x4e0] sm:$0xff]  ;;  %v1351_v12 = vld [vmem:[#allocation15 + $0x4e8] sm:$0xff] }
 0x3dd   :  { %v7599_v4 = vcombine.high %v1339_v54, %v1343_v55  ;;  %v7596_v57 = vcombine.low %v1338_v48, %v1342_v53  ;;  %v7598_v58 = vcombine.low %v1339_v54, %v1343_v55  ;;  %v7605_v59 = vcombine.high %v1346_v7, %v1350_v8  ;;  %v1355_v13 = vld [vmem:[#allocation15 + $0x508] sm:$0xff]  ;;  %v1390_v48 = vld [vmem:[#allocation15 + $0x620] sm:$0xff] }
 0x3de   :  { %v1113_v18 = vcombine.low %v1105_v42, %v1112_v15  ;;  %v7607_v61 = vcombine.high %v1347_v10, %v1351_v12  ;;  %v1362_v15 = vld [vmem:[#allocation15 + $0x540] sm:$0xff]  ;;  %v1379_v37 = vld [vmem:[#allocation15 + $0x5c8] sm:$0xff] }
 0x3e0   :  { %v1114_v19 = vrot.slane %v1113_v18, 7  ;;  %v1366_v18 = vld [vmem:[#allocation15 + $0x560] sm:$0xff] }
 0x3e2   :  { %v1116_v22 = vsub.f32 %v1036_v47, %v1114_v19  ;;  %v1363_v19 = vld [vmem:[#allocation15 + $0x548] sm:$0xff] }
 0x3e4   :  { %v1153_v6 = vrot.slane %v1116_v22, %v9113_v20  ;;  %v1145_v5 = vrot.slane %v1116_v22, %v9032_v32  ;;  %v1141_v1 = vrot.slane %v1116_v22, %v9029_v30  ;;  %v1149_v2 = vrot.slane %v1116_v22, %v9116_v21  ;;  %v1367_v22 = vld [vmem:[#allocation15 + $0x568] sm:$0xff] }
 0x3e6   :  { %v1173_v23 = vrot.slane %v1153_v6, %v9029_v30  ;;  %v1165_v24 = vrot.slane %v1145_v5, %v9029_v30  ;;  %v1161_v25 = vrot.slane %v1141_v1, %v9029_v30  ;;  %v1169_v26 = vrot.slane %v1149_v2, %v9029_v30 }
 0x3e7   :  { %v7621_v1 = vcombine.high %v1362_v15, %v1366_v18  ;;  %v7623_v2 = vcombine.high %v1363_v19, %v1367_v22 }
 0x3e8   :  { %v1177_v27 = vadd.f32 %v1173_v23, %v1136_v14  ;;  %v1175_v9 = vadd.f32 %v1165_v24, %v1134_v39  ;;  %v1174_v28 = vadd.f32 %v1161_v25, %v1133_v41  ;;  %v9126_v29 = vadd.f32 %v1169_v26, %v1135_v40  ;;  %v1359_v14 = vld [vmem:[#allocation15 + $0x528] sm:$0xff]  ;;  %v1370_v23 = vld [vmem:[#allocation15 + $0x580] sm:$0xff] }
 0x3e9   :  { %v7604_v39 = vcombine.low %v1346_v7, %v1350_v8  ;;  %v7606_v41 = vcombine.low %v1347_v10, %v1351_v12  ;;  %v7615_v42 = vcombine.high %v1355_v13, %v1359_v14  ;;  %v7614_v5 = vcombine.low %v1355_v13, %v1359_v14  ;;  %v1374_v24 = vld [vmem:[#allocation15 + $0x5a0] sm:$0xff]  ;;  %v1371_v25 = vld [vmem:[#allocation15 + $0x588] sm:$0xff] }
 0x3ea   :  { %vm1179_vm5 = vcmp.gt.f32.partialorder %v1175_v9, 0.0  ;;  %v1183_v34 = vmul.f32 0.2, %v1175_v9  ;;  %vm1178_vm6 = vcmp.gt.f32.partialorder %v1174_v28, 0.0  ;;  %v1182_v35 = vmul.f32 0.2, %v1174_v28 }
 0x3eb   :  { %vm1181_vm7 = vcmp.gt.f32.partialorder %v1177_v27, 0.0  ;;  %v1185_v36 = vmul.f32 0.2, %v1177_v27  ;;  %v1375_v26 = vld [vmem:[#allocation15 + $0x5a8] sm:$0xff]  ;;  %vm1180_vm8 = vcmp.gt.f32.partialorder %v9126_v29, 0.0 }
 0x3ec   :  { %v1187_v38 = vsel %vm1179_vm5, %v1175_v9, %v1183_v34  ;;  %v1186_v33 = vsel %vm1178_vm6, %v1174_v28, %v1182_v35  ;;  %v7622_v9 = vcombine.low %v1363_v19, %v1367_v22  ;;  %v7629_v28 = vcombine.high %v1370_v23, %v1374_v24  ;;  %v1378_v35 = vld [vmem:[#allocation15 + $0x5c0] sm:$0xff]  ;;  %v1399_v7 = vld [vmem:[#allocation15 + $0x668] sm:$0xff] }
 0x3ed   :  { %v9128_v45 = vpack.c.bf16 %v1187_v38, %v1187_v38  ;;  %v9130_v46 = vpack.c.bf16 %v1186_v33, %v1186_v33  ;;  %v1189_v47 = vsel %vm1181_vm7, %v1177_v27, %v1185_v36  ;;  %v7620_v27 = vcombine.low %v1362_v15, %v1366_v18  ;;  %v1382_v36 = vld [vmem:[#allocation15 + $0x5e0] sm:$0xff]  ;;  %v1383_v38 = vld [vmem:[#allocation15 + $0x5e8] sm:$0xff] }
 0x3ee   :  { %v9136_v56 = vpack.c.bf16 %v1189_v47, %v1189_v47  ;;  %v7631_v34 = vcombine.high %v1371_v25, %v1375_v26  ;;  %v7628_v33 = vcombine.low %v1370_v23, %v1374_v24  ;;  %v7630_v31 = vcombine.low %v1371_v25, %v1375_v26  ;;  %v1386_v47 = vld [vmem:[#allocation15 + $0x600] sm:$0xff]  ;;  %v1415_v15 = vld [vmem:[#allocation15 + $0x6e8] sm:$0xff] }
 0x3ef   :  { %2762 = vmatprep.mubr.bf16.mxu0 %v9128_v45  ;;  %2844 = vmatprep.mubr.bf16.mxu1 %v9128_v45  ;;  %v7637_v43 = vcombine.high %v1378_v35, %v1382_v36  ;;  %v7639_v44 = vcombine.high %v1379_v37, %v1383_v38  ;;  %v7636_v53 = vcombine.low %v1378_v35, %v1382_v36  ;;  %v1423_v23 = vld [vmem:[#allocation15 + $0x728] sm:$0xff] }
 0x3f0   :  { %2763 = vmatmul.mubr.bf16.vlgmr.msra.gmra.mrb[8].mxu0 %v9130_v46  ;;  %2845 = vmatmul.mubr.bf16.vlgmr.msra.gmra.mrb[8].mxu1 %v9130_v46  ;;  %v7638_v54 = vcombine.low %v1379_v37, %v1383_v38  ;;  %v7645_v55 = vcombine.high %v1386_v47, %v1390_v48  ;;  %v7644_v8 = vcombine.low %v1386_v47, %v1390_v48  ;;  %v1431_v35 = vld [vmem:[#allocation15 + $0x768] sm:$0xff] }
 0x3f1   :  { %2772 = vmatpush1.bf16.msra.mxu0 %v7580_v62  ;;  %2854 = vmatpush1.bf16.msra.mxu1 %v7582_v63  ;;  %v1354_v62 = vld [vmem:[#allocation15 + $0x500] sm:$0xff]  ;;  %v1439_v47 = vld [vmem:[#allocation15 + $0x7a8] sm:$0xff] }
 0x3f2   :  { %2803 = vmatprep.mubr.bf16.mxu0 %v9136_v56  ;;  %2885 = vmatprep.mubr.bf16.mxu1 %v9136_v56  ;;  %v1358_v63 = vld [vmem:[#allocation15 + $0x520] sm:$0xff] }
 0x3f3   :  { %2773 = vmatprep.subr.bf16.mxu0 %v7589_v51  ;;  %2855 = vmatprep.subr.bf16.mxu1 %v7591_v52  ;;  %v7613_v40 = vcombine.high %v1354_v62, %v1358_v63  ;;  %v7612_v6 = vcombine.low %v1354_v62, %v1358_v63  ;;  %v1387_v51 = vld [vmem:[#allocation15 + $0x608] sm:$0xff] }
 0x3f4   :  { %v1391_v52 = vld [vmem:[#allocation15 + $0x628] sm:$0xff] }
 0x3f5   :  { %2774 = vmatpush1.bf16.msra.mxu0 %v7588_v60  ;;  %2856 = vmatpush1.bf16.msra.mxu1 %v7590_v0  ;;  %v7647_v60 = vcombine.high %v1387_v51, %v1391_v52  ;;  %v1394_v0 = vld [vmem:[#allocation15 + $0x640] sm:$0xff]  ;;  %v7646_v10 = vcombine.low %v1387_v51, %v1391_v52  ;;  %v1407_v62 = vld [vmem:[#allocation15 + $0x6a8] sm:$0xff] }
 0x3f6   :  { %2775 = vmatprep.subr.bf16.mxu0 %v7597_v3  ;;  %2857 = vmatprep.subr.bf16.mxu1 %v7599_v4  ;;  %v1398_v3 = vld [vmem:[#allocation15 + $0x660] sm:$0xff]  ;;  %v1395_v4 = vld [vmem:[#allocation15 + $0x648] sm:$0xff] }
 0x3f7   :  { %v7653_v12 = vcombine.high %v1394_v0, %v1398_v3  ;;  %v7652_v63 = vcombine.low %v1394_v0, %v1398_v3  ;;  %v7654_v13 = vcombine.low %v1395_v4, %v1399_v7  ;;  %v1447_v0 = vld [vmem:[#allocation15 + $0x7e8] sm:$0xff] }
 0x3f9   :  { %2776 = vmatpush1.bf16.msra.mxu0 %v7596_v57  ;;  %2858 = vmatpush1.bf16.msra.mxu1 %v7598_v58  ;;  %v7655_v57 = vcombine.high %v1395_v4, %v1399_v7  ;;  %v1402_v58 = vld [vmem:[#allocation15 + $0x680] sm:$0xff] }
 0x3fa   :  { %2777 = vmatprep.subr.bf16.mxu0 %v7605_v59  ;;  %2859 = vmatprep.subr.bf16.mxu1 %v7607_v61  ;;  %v1406_v59 = vld [vmem:[#allocation15 + $0x6a0] sm:$0xff]  ;;  %v1403_v61 = vld [vmem:[#allocation15 + $0x688] sm:$0xff] }
 0x3fb   :  { %v7661_v14 = vcombine.high %v1402_v58, %v1406_v59  ;;  %v7660_v18 = vcombine.low %v1402_v58, %v1406_v59  ;;  %v7662_v19 = vcombine.low %v1403_v61, %v1407_v62  ;;  %v1197_v58 = vld [vmem:[#allocation15 + $0x18] sm:$0xff] }
 0x3fc   :  { %v1201_v59 = vld [vmem:[#allocation15 + $0x38] sm:$0xff] }
 0x3fd   :  { %2778 = vmatpush1.bf16.msra.mxu0 %v7604_v39  ;;  %2860 = vmatpush1.bf16.msra.mxu1 %v7606_v41  ;;  %v7663_v39 = vcombine.high %v1403_v61, %v1407_v62  ;;  %v1410_v41 = vld [vmem:[#allocation15 + $0x6c0] sm:$0xff] }
 0x3fe   :  { %2779 = vmatprep.subr.bf16.mxu0 %v7613_v40  ;;  %2861 = vmatprep.subr.bf16.mxu1 %v7615_v42  ;;  %v1414_v40 = vld [vmem:[#allocation15 + $0x6e0] sm:$0xff]  ;;  %v1411_v42 = vld [vmem:[#allocation15 + $0x6c8] sm:$0xff] }
 0x3ff   :  { %v7669_v22 = vcombine.high %v1410_v41, %v1414_v40  ;;  %v7668_v24 = vcombine.low %v1410_v41, %v1414_v40  ;;  %v7670_v25 = vcombine.low %v1411_v42, %v1415_v15  ;;  %v1208_v41 = vld [vmem:[#allocation15 + $0x70] sm:$0xff]  ;;  %v1205_v40 = vld [vmem:[#allocation15 + $0x58] sm:$0xff] }
 0x401   :  { %2780 = vmatpush1.bf16.msra.mxu0 %v7612_v6  ;;  %2862 = vmatpush1.bf16.msra.mxu1 %v7614_v5  ;;  %v7671_v6 = vcombine.high %v1411_v42, %v1415_v15  ;;  %v1418_v5 = vld [vmem:[#allocation15 + $0x700] sm:$0xff]  ;;  %v1209_v42 = vld [vmem:[#allocation15 + $0x78] sm:$0xff] }
 0x402   :  { %2781 = vmatprep.subr.bf16.mxu0 %v7621_v1  ;;  %2863 = vmatprep.subr.bf16.mxu1 %v7623_v2  ;;  %v1422_v1 = vld [vmem:[#allocation15 + $0x720] sm:$0xff]  ;;  %v1419_v2 = vld [vmem:[#allocation15 + $0x708] sm:$0xff] }
 0x403   :  { %v7677_v26 = vcombine.high %v1418_v5, %v1422_v1  ;;  %v7676_v36 = vcombine.low %v1418_v5, %v1422_v1  ;;  %v7678_v37 = vcombine.low %v1419_v2, %v1423_v23  ;;  %v1212_v5 = vld [vmem:[#allocation15 + $0x90] sm:$0xff] }
 0x404   :  { %v1216_v1 = vld [vmem:[#allocation15 + $0xb0] sm:$0xff] }
 0x405   :  { %2782 = vmatpush1.bf16.msra.mxu0 %v7620_v27  ;;  %2864 = vmatpush1.bf16.msra.mxu1 %v7622_v9  ;;  %v7679_v27 = vcombine.high %v1419_v2, %v1423_v23  ;;  %v1426_v9 = vld [vmem:[#allocation15 + $0x740] sm:$0xff]  ;;  %v1217_v2 = vld [vmem:[#allocation15 + $0xb8] sm:$0xff] }
 0x406   :  { %2783 = vmatprep.subr.bf16.mxu0 %v7629_v28  ;;  %2865 = vmatprep.subr.bf16.mxu1 %v7631_v34  ;;  %v1430_v28 = vld [vmem:[#allocation15 + $0x760] sm:$0xff]  ;;  %v1427_v34 = vld [vmem:[#allocation15 + $0x748] sm:$0xff] }
 0x407   :  { %v7685_v38 = vcombine.high %v1426_v9, %v1430_v28  ;;  %v7684_v48 = vcombine.low %v1426_v9, %v1430_v28  ;;  %v7686_v51 = vcombine.low %v1427_v34, %v1431_v35  ;;  %v1224_v9 = vld [vmem:[#allocation15 + $0xf0] sm:$0xff]  ;;  %v1221_v28 = vld [vmem:[#allocation15 + $0xd8] sm:$0xff] }
 0x409   :  { %2784 = vmatpush1.bf16.msra.mxu0 %v7628_v33  ;;  %2866 = vmatpush1.bf16.msra.mxu1 %v7630_v31  ;;  %v7687_v33 = vcombine.high %v1427_v34, %v1431_v35  ;;  %v1434_v31 = vld [vmem:[#allocation15 + $0x780] sm:$0xff]  ;;  %v1225_v34 = vld [vmem:[#allocation15 + $0xf8] sm:$0xff]  ;;  %v7472_v35 = vcombine.low %v1212_v5, %v1216_v1 }
 0x40a   :  { %2785 = vmatprep.subr.bf16.mxu0 %v7637_v43  ;;  %2867 = vmatprep.subr.bf16.mxu1 %v7639_v44  ;;  %v1438_v43 = vld [vmem:[#allocation15 + $0x7a0] sm:$0xff]  ;;  %v1435_v44 = vld [vmem:[#allocation15 + $0x788] sm:$0xff] }
 0x40b   :  { %v7693_v52 = vcombine.high %v1434_v31, %v1438_v43  ;;  %v7692_v3 = vcombine.low %v1434_v31, %v1438_v43  ;;  %v7694_v4 = vcombine.low %v1435_v44, %v1439_v47  ;;  %v1232_v31 = vld [vmem:[#allocation15 + $0x130] sm:$0xff]  ;;  %v1233_v43 = vld [vmem:[#allocation15 + $0x138] sm:$0xff] }
 0x40d   :  { %2786 = vmatpush1.bf16.msra.mxu0 %v7636_v53  ;;  %2868 = vmatpush1.bf16.msra.mxu1 %v7638_v54  ;;  %v7695_v53 = vcombine.high %v1435_v44, %v1439_v47  ;;  %v1442_v54 = vld [vmem:[#allocation15 + $0x7c0] sm:$0xff]  ;;  %v7482_v47 = vcombine.low %v1221_v28, %v1225_v34 }
 0x40e   :  { %2787 = vmatprep.subr.bf16.mxu0 %v7645_v55  ;;  %2869 = vmatprep.subr.bf16.mxu1 %v7647_v60  ;;  %v1446_v55 = vld [vmem:[#allocation15 + $0x7e0] sm:$0xff]  ;;  %v1443_v60 = vld [vmem:[#allocation15 + $0x7c8] sm:$0xff] }
 0x40f   :  { %v7701_v7 = vcombine.high %v1442_v54, %v1446_v55  ;;  %v7700_v61 = vcombine.low %v1442_v54, %v1446_v55  ;;  %v7702_v62 = vcombine.low %v1443_v60, %v1447_v0  ;;  %v1237_v54 = vld [vmem:[#allocation15 + $0x158] sm:$0xff] }
 0x410   :  { %v1241_v55 = vld [vmem:[#allocation15 + $0x178] sm:$0xff] }
 0x411   :  { %2788 = vmatpush1.bf16.msra.mxu0 %v7644_v8  ;;  %2870 = vmatpush1.bf16.msra.mxu1 %v7646_v10  ;;  %v7703_v8 = vcombine.high %v1443_v60, %v1447_v0  ;;  %v1196_v10 = vld [vmem:[#allocation15 + $0x10] sm:$0xff] }
 0x412   :  { %2789 = vmatprep.subr.bf16.mxu0 %v7653_v12  ;;  %2871 = vmatprep.subr.bf16.mxu1 %v7655_v57  ;;  %v1184_v12 = vmul.f32 0.2, %v9126_v29  ;;  %v1200_v57 = vld [vmem:[#allocation15 + $0x30] sm:$0xff] }
 0x413   :  { %v7456_v15 = vcombine.low %v1196_v10, %v1200_v57 }
 0x415   :  { %2790 = vmatpush1.bf16.msra.mxu0 %v7652_v63  ;;  %2872 = vmatpush1.bf16.msra.mxu1 %v7654_v13  ;;  %v7457_v63 = vcombine.high %v1196_v10, %v1200_v57  ;;  %v7459_v13 = vcombine.high %v1197_v58, %v1201_v59  ;;  %v1245_v10 = vld [vmem:[#allocation15 + $0x198] sm:$0xff] }
 0x416   :  { %2791 = vmatprep.subr.bf16.mxu0 %v7661_v14  ;;  %2873 = vmatprep.subr.bf16.mxu1 %v7663_v39  ;;  %v1188_v14 = vsel %vm1180_vm8, %v9126_v29, %v1184_v12  ;;  %v1204_v39 = vld [vmem:[#allocation15 + $0x50] sm:$0xff]  ;;  %v1213_v29 = vld [vmem:[#allocation15 + $0x98] sm:$0xff] }
 0x417   :  { %v7464_v23 = vcombine.low %v1204_v39, %v1208_v41  ;;  %v1249_v12 = vld [vmem:[#allocation15 + $0x1b8] sm:$0xff] }
 0x419   :  { %2792 = vmatpush1.bf16.msra.mxu0 %v7660_v18  ;;  %2874 = vmatpush1.bf16.msra.mxu1 %v7662_v19  ;;  %v9149_v18 = vpack.c.bf16 %v1188_v14, %v1188_v14  ;;  %v7458_v19 = vcombine.low %v1197_v58, %v1201_v59  ;;  %v7498_v58 = vcombine.low %v1237_v54, %v1241_v55  ;;  %v1257_v14 = vld [vmem:[#allocation15 + $0x1f8] sm:$0xff] }
 0x41a   :  { %2793 = vmatprep.subr.bf16.mxu0 %v7669_v22  ;;  %2875 = vmatprep.subr.bf16.mxu1 %v7671_v6  ;;  %v7465_v22 = vcombine.high %v1204_v39, %v1208_v41  ;;  %v7467_v6 = vcombine.high %v1205_v40, %v1209_v42  ;;  %v7506_v41 = vcombine.low %v1245_v10, %v1249_v12 }
 0x41d   :  { %2794 = vmatpush1.bf16.msra.mxu0 %v7668_v24  ;;  %2876 = vmatpush1.bf16.msra.mxu1 %v7670_v25  ;;  %v7466_v24 = vcombine.low %v1205_v40, %v1209_v42  ;;  %v7473_v25 = vcombine.high %v1212_v5, %v1216_v1 }
 0x41e   :  { %2795 = vmatprep.subr.bf16.mxu0 %v7677_v26  ;;  %2877 = vmatprep.subr.bf16.mxu1 %v7679_v27  ;;  %v7475_v26 = vcombine.high %v1213_v29, %v1217_v2  ;;  %v1220_v27 = vld [vmem:[#allocation15 + $0xd0] sm:$0xff] }
 0x41f   :  { %v7480_v44 = vcombine.low %v1220_v27, %v1224_v9 }
 0x421   :  { %2796 = vmatpush1.bf16.msra.mxu0 %v7676_v36  ;;  %2878 = vmatpush1.bf16.msra.mxu1 %v7678_v37  ;;  %v7474_v36 = vcombine.low %v1213_v29, %v1217_v2  ;;  %v7481_v37 = vcombine.high %v1220_v27, %v1224_v9 }
 0x422   :  { %2797 = vmatprep.subr.bf16.mxu0 %v7685_v38  ;;  %2879 = vmatprep.subr.bf16.mxu1 %v7687_v33  ;;  %v7483_v38 = vcombine.high %v1221_v28, %v1225_v34  ;;  %v1228_v33 = vld [vmem:[#allocation15 + $0x110] sm:$0xff] }
 0x423   :  { %v7488_v60 = vcombine.low %v1228_v33, %v1232_v31 }
 0x425   :  { %2798 = vmatpush1.bf16.msra.mxu0 %v7684_v48  ;;  %2880 = vmatpush1.bf16.msra.mxu1 %v7686_v51  ;;  %v7489_v48 = vcombine.high %v1228_v33, %v1232_v31 }
 0x426   :  { %2799 = vmatprep.subr.bf16.mxu0 %v7693_v52  ;;  %2881 = vmatprep.subr.bf16.mxu1 %v7695_v53  ;;  %v1236_v52 = vld [vmem:[#allocation15 + $0x150] sm:$0xff] }
 0x427   :  { %v1240_v53 = vld [vmem:[#allocation15 + $0x170] sm:$0xff] }
 0x428   :  { %v7496_v57 = vcombine.low %v1236_v52, %v1240_v53 }
 0x429   :  { %2800 = vmatpush1.bf16.msra.mxu0 %v7692_v3  ;;  %2882 = vmatpush1.bf16.msra.mxu1 %v7694_v4  ;;  %v7497_v3 = vcombine.high %v1236_v52, %v1240_v53  ;;  %v7499_v4 = vcombine.high %v1237_v54, %v1241_v55 }
 0x42a   :  { %2801 = vmatprep.subr.bf16.mxu0 %v7701_v7  ;;  %2883 = vmatprep.subr.bf16.mxu1 %v7703_v8  ;;  %v1244_v7 = vld [vmem:[#allocation15 + $0x190] sm:$0xff] }
 0x42b   :  { %v1248_v8 = vld [vmem:[#allocation15 + $0x1b0] sm:$0xff] }
 0x42c   :  { %v7505_v59 = vcombine.high %v1244_v7, %v1248_v8  ;;  %v7504_v39 = vcombine.low %v1244_v7, %v1248_v8 }
 0x42d   :  { %2802 = vmatpush1.bf16.msra.mxu0 %v7700_v61  ;;  %2884 = vmatpush1.bf16.msra.mxu1 %v7702_v62  ;;  %v7507_v61 = vcombine.high %v1245_v10, %v1249_v12  ;;  %v1252_v62 = vld [vmem:[#allocation15 + $0x1d0] sm:$0xff] }
 0x42e   :  { %2894 = vmatprep.subr.bf16.mxu0 %v7457_v63  ;;  %2976 = vmatprep.subr.bf16.mxu1 %v7459_v13  ;;  %v1256_v63 = vld [vmem:[#allocation15 + $0x1f0] sm:$0xff]  ;;  %v1253_v13 = vld [vmem:[#allocation15 + $0x1d8] sm:$0xff] }
 0x42f   :  { %v7513_v40 = vcombine.high %v1252_v62, %v1256_v63  ;;  %v7515_v42 = vcombine.high %v1253_v13, %v1257_v14  ;;  %v7512_v5 = vcombine.low %v1252_v62, %v1256_v63  ;;  %v7514_v1 = vcombine.low %v1253_v13, %v1257_v14 }
 0x430   :  { %2804 = vmatmul.mubr.bf16.vlgmr.msra.gmra.mrb[8].mxu0 %v9149_v18  ;;  %2886 = vmatmul.mubr.bf16.vlgmr.msra.gmra.mrb[8].mxu1 %v9149_v18 }
 0x431   :  { %2895 = vmatpush1.bf16.msra.mxu0 %v7456_v15  ;;  %2926 = vmatprep.mubr.bf16.mxu0 %v9128_v45  ;;  %v1260_v15 = vld [vmem:[#allocation15 + $0x210] sm:$0xff] }
 0x432   :  { %2977 = vmatpush1.bf16.msra.mxu1 %v7458_v19  ;;  %3008 = vmatprep.mubr.bf16.mxu1 %v9128_v45  ;;  %v1229_v45 = vld [vmem:[#allocation15 + $0x118] sm:$0xff]  ;;  %v1264_v19 = vld [vmem:[#allocation15 + $0x230] sm:$0xff] }
 0x433   :  { %2896 = vmatprep.subr.bf16.mxu0 %v7465_v22  ;;  %2978 = vmatprep.subr.bf16.mxu1 %v7467_v6  ;;  %v7491_v51 = vcombine.high %v1229_v45, %v1233_v43  ;;  %v7490_v0 = vcombine.low %v1229_v45, %v1233_v43  ;;  %v1261_v22 = vld [vmem:[#allocation15 + $0x218] sm:$0xff]  ;;  %v7521_v29 = vcombine.high %v1260_v15, %v1264_v19 }
 0x434   :  { %v1265_v6 = vld [vmem:[#allocation15 + $0x238] sm:$0xff]  ;;  %v7520_v27 = vcombine.low %v1260_v15, %v1264_v19 }
 0x435   :  { %2897 = vmatpush1.bf16.msra.mxu0 %v7464_v23  ;;  %v7523_v2 = vcombine.high %v1261_v22, %v1265_v6  ;;  %v1268_v23 = vld [vmem:[#allocation15 + $0x250] sm:$0xff]  ;;  %v7522_v9 = vcombine.low %v1261_v22, %v1265_v6 }
 0x436   :  { %2979 = vmatpush1.bf16.msra.mxu1 %v7466_v24  ;;  %2898 = vmatprep.subr.bf16.mxu0 %v7473_v25  ;;  %v1272_v24 = vld [vmem:[#allocation15 + $0x270] sm:$0xff]  ;;  %v1269_v25 = vld [vmem:[#allocation15 + $0x258] sm:$0xff] }
 0x437   :  { %2980 = vmatprep.subr.bf16.mxu1 %v7475_v26  ;;  %v1273_v26 = vld [vmem:[#allocation15 + $0x278] sm:$0xff]  ;;  %v7529_v28 = vcombine.high %v1268_v23, %v1272_v24  ;;  %v7528_v33 = vcombine.low %v1268_v23, %v1272_v24 }
 0x438   :  { %v7531_v34 = vcombine.high %v1269_v25, %v1273_v26  ;;  %v7530_v31 = vcombine.low %v1269_v25, %v1273_v26 }
 0x439   :  { %2899 = vmatpush1.bf16.msra.mxu0 %v7472_v35  ;;  %v1276_v35 = vld [vmem:[#allocation15 + $0x290] sm:$0xff] }
 0x43a   :  { %2981 = vmatpush1.bf16.msra.mxu1 %v7474_v36  ;;  %2900 = vmatprep.subr.bf16.mxu0 %v7481_v37  ;;  %v1280_v36 = vld [vmem:[#allocation15 + $0x2b0] sm:$0xff]  ;;  %v1277_v37 = vld [vmem:[#allocation15 + $0x298] sm:$0xff] }
 0x43b   :  { %2982 = vmatprep.subr.bf16.mxu1 %v7483_v38  ;;  %v1281_v38 = vld [vmem:[#allocation15 + $0x2b8] sm:$0xff]  ;;  %v7537_v45 = vcombine.high %v1276_v35, %v1280_v36  ;;  %v7536_v52 = vcombine.low %v1276_v35, %v1280_v36 }
 0x43c   :  { %v7539_v43 = vcombine.high %v1277_v37, %v1281_v38  ;;  %v7538_v53 = vcombine.low %v1277_v37, %v1281_v38 }
 0x43d   :  { %2901 = vmatpush1.bf16.msra.mxu0 %v7480_v44  ;;  %v1284_v44 = vld [vmem:[#allocation15 + $0x2d0] sm:$0xff] }
 0x43e   :  { %2983 = vmatpush1.bf16.msra.mxu1 %v7482_v47  ;;  %2902 = vmatprep.subr.bf16.mxu0 %v7489_v48  ;;  %v1288_v47 = vld [vmem:[#allocation15 + $0x2f0] sm:$0xff]  ;;  %v1285_v48 = vld [vmem:[#allocation15 + $0x2d8] sm:$0xff] }
 0x43f   :  { %2984 = vmatprep.subr.bf16.mxu1 %v7491_v51  ;;  %v1289_v51 = vld [vmem:[#allocation15 + $0x2f8] sm:$0xff]  ;;  %v7545_v54 = vcombine.high %v1284_v44, %v1288_v47  ;;  %v7544_v7 = vcombine.low %v1284_v44, %v1288_v47 }
 0x440   :  { %v7547_v55 = vcombine.high %v1285_v48, %v1289_v51  ;;  %v7546_v8 = vcombine.low %v1285_v48, %v1289_v51  ;;  %v1337_v44 = vld [vmem:[#allocation15 + $0x478] sm:$0xff]  ;;  %v1340_v51 = vld [vmem:[#allocation15 + $0x490] sm:$0xff] }
 0x441   :  { %2903 = vmatpush1.bf16.msra.mxu0 %v7488_v60  ;;  %v1292_v60 = vld [vmem:[#allocation15 + $0x310] sm:$0xff] }
 0x442   :  { %2985 = vmatpush1.bf16.msra.mxu1 %v7490_v0  ;;  %2904 = vmatprep.subr.bf16.mxu0 %v7497_v3  ;;  %v1296_v0 = vld [vmem:[#allocation15 + $0x330] sm:$0xff]  ;;  %v1293_v3 = vld [vmem:[#allocation15 + $0x318] sm:$0xff] }
 0x443   :  { %2986 = vmatprep.subr.bf16.mxu1 %v7499_v4  ;;  %v1297_v4 = vld [vmem:[#allocation15 + $0x338] sm:$0xff]  ;;  %v7553_v10 = vcombine.high %v1292_v60, %v1296_v0  ;;  %v7552_v62 = vcombine.low %v1292_v60, %v1296_v0 }
 0x444   :  { %v7555_v12 = vcombine.high %v1293_v3, %v1297_v4  ;;  %v7554_v63 = vcombine.low %v1293_v3, %v1297_v4 }
 0x445   :  { %2905 = vmatpush1.bf16.msra.mxu0 %v7496_v57  ;;  %v1300_v57 = vld [vmem:[#allocation15 + $0x350] sm:$0xff] }
 0x446   :  { %2987 = vmatpush1.bf16.msra.mxu1 %v7498_v58  ;;  %2906 = vmatprep.subr.bf16.mxu0 %v7505_v59  ;;  %v1304_v58 = vld [vmem:[#allocation15 + $0x370] sm:$0xff]  ;;  %v1301_v59 = vld [vmem:[#allocation15 + $0x358] sm:$0xff] }
 0x447   :  { %2988 = vmatprep.subr.bf16.mxu1 %v7507_v61  ;;  %v1305_v61 = vld [vmem:[#allocation15 + $0x378] sm:$0xff]  ;;  %v7561_v13 = vcombine.high %v1300_v57, %v1304_v58  ;;  %v7560_v15 = vcombine.low %v1300_v57, %v1304_v58 }
 0x448   :  { %v7563_v14 = vcombine.high %v1301_v59, %v1305_v61  ;;  %v7562_v19 = vcombine.low %v1301_v59, %v1305_v61  ;;  %v1356_v61 = vld [vmem:[#allocation15 + $0x510] sm:$0xff] }
 0x449   :  { %2907 = vmatpush1.bf16.msra.mxu0 %v7504_v39  ;;  %v1308_v39 = vld [vmem:[#allocation15 + $0x390] sm:$0xff] }
 0x44a   :  { %2989 = vmatpush1.bf16.msra.mxu1 %v7506_v41  ;;  %2908 = vmatprep.subr.bf16.mxu0 %v7513_v40  ;;  %v1312_v41 = vld [vmem:[#allocation15 + $0x3b0] sm:$0xff]  ;;  %v1309_v40 = vld [vmem:[#allocation15 + $0x398] sm:$0xff] }
 0x44b   :  { %2990 = vmatprep.subr.bf16.mxu1 %v7515_v42  ;;  %v1313_v42 = vld [vmem:[#allocation15 + $0x3b8] sm:$0xff]  ;;  %v7569_v22 = vcombine.high %v1308_v39, %v1312_v41  ;;  %v7568_v23 = vcombine.low %v1308_v39, %v1312_v41 }
 0x44c   :  { %v7571_v6 = vcombine.high %v1309_v40, %v1313_v42  ;;  %v7570_v24 = vcombine.low %v1309_v40, %v1313_v42  ;;  %v1364_v40 = vld [vmem:[#allocation15 + $0x550] sm:$0xff] }
 0x44d   :  { %2909 = vmatpush1.bf16.msra.mxu0 %v7512_v5  ;;  %v1316_v5 = vld [vmem:[#allocation15 + $0x3d0] sm:$0xff] }
 0x44e   :  { %2991 = vmatpush1.bf16.msra.mxu1 %v7514_v1  ;;  %2910 = vmatprep.subr.bf16.mxu0 %v7521_v29  ;;  %v1320_v1 = vld [vmem:[#allocation15 + $0x3f0] sm:$0xff]  ;;  %v1317_v29 = vld [vmem:[#allocation15 + $0x3d8] sm:$0xff] }
 0x44f   :  { %2992 = vmatprep.subr.bf16.mxu1 %v7523_v2  ;;  %v1321_v2 = vld [vmem:[#allocation15 + $0x3f8] sm:$0xff]  ;;  %v7577_v25 = vcombine.high %v1316_v5, %v1320_v1  ;;  %v7576_v35 = vcombine.low %v1316_v5, %v1320_v1  ;;  %v1368_v42 = vld [vmem:[#allocation15 + $0x570] sm:$0xff] }
 0x450   :  { %v7579_v26 = vcombine.high %v1317_v29, %v1321_v2  ;;  %v7578_v36 = vcombine.low %v1317_v29, %v1321_v2  ;;  %v7625_v5 = vcombine.high %v1364_v40, %v1368_v42  ;;  %v1372_v29 = vld [vmem:[#allocation15 + $0x590] sm:$0xff] }
 0x451   :  { %2911 = vmatpush1.bf16.msra.mxu0 %v7520_v27  ;;  %v1324_v27 = vld [vmem:[#allocation15 + $0x410] sm:$0xff] }
 0x452   :  { %2993 = vmatpush1.bf16.msra.mxu1 %v7522_v9  ;;  %2912 = vmatprep.subr.bf16.mxu0 %v7529_v28  ;;  %v1328_v9 = vld [vmem:[#allocation15 + $0x430] sm:$0xff]  ;;  %v1325_v28 = vld [vmem:[#allocation15 + $0x418] sm:$0xff] }
 0x453   :  { %2994 = vmatprep.subr.bf16.mxu1 %v7531_v34  ;;  %v1329_v34 = vld [vmem:[#allocation15 + $0x438] sm:$0xff]  ;;  %v7585_v37 = vcombine.high %v1324_v27, %v1328_v9  ;;  %v1376_v2 = vld [vmem:[#allocation15 + $0x5b0] sm:$0xff] }
 0x454   :  { %v7587_v38 = vcombine.high %v1325_v28, %v1329_v34  ;;  %v7586_v47 = vcombine.low %v1325_v28, %v1329_v34  ;;  %v1380_v28 = vld [vmem:[#allocation15 + $0x5d0] sm:$0xff] }
 0x455   :  { %2913 = vmatpush1.bf16.msra.mxu0 %v7528_v33  ;;  %v1332_v33 = vld [vmem:[#allocation15 + $0x450] sm:$0xff] }
 0x456   :  { %2995 = vmatpush1.bf16.msra.mxu1 %v7530_v31  ;;  %2914 = vmatprep.subr.bf16.mxu0 %v7537_v45  ;;  %v1336_v31 = vld [vmem:[#allocation15 + $0x470] sm:$0xff]  ;;  %v7584_v45 = vcombine.low %v1324_v27, %v1328_v9  ;;  %v7633_v27 = vcombine.high %v1372_v29, %v1376_v2 }
 0x457   :  { %2996 = vmatprep.subr.bf16.mxu1 %v7539_v43  ;;  %v1333_v43 = vld [vmem:[#allocation15 + $0x458] sm:$0xff]  ;;  %v7593_v48 = vcombine.high %v1332_v33, %v1336_v31  ;;  %v7592_v60 = vcombine.low %v1332_v33, %v1336_v31  ;;  %v1384_v34 = vld [vmem:[#allocation15 + $0x5f0] sm:$0xff] }
 0x458   :  { %v7594_v0 = vcombine.low %v1333_v43, %v1337_v44  ;;  %v7641_v33 = vcombine.high %v1380_v28, %v1384_v34 }
 0x459   :  { %2915 = vmatpush1.bf16.msra.mxu0 %v7536_v52  ;;  %v1344_v52 = vld [vmem:[#allocation15 + $0x4b0] sm:$0xff] }
 0x45a   :  { %2997 = vmatpush1.bf16.msra.mxu1 %v7538_v53  ;;  %2916 = vmatprep.subr.bf16.mxu0 %v7545_v54  ;;  %v7595_v53 = vcombine.high %v1333_v43, %v1337_v44  ;;  %v1341_v54 = vld [vmem:[#allocation15 + $0x498] sm:$0xff]  ;;  %v7601_v3 = vcombine.high %v1340_v51, %v1344_v52  ;;  %v7600_v57 = vcombine.low %v1340_v51, %v1344_v52  ;;  %v1392_v43 = vld [vmem:[#allocation15 + $0x630] sm:$0xff] }
 0x45b   :  { %2998 = vmatprep.subr.bf16.mxu1 %v7547_v55  ;;  %v1345_v55 = vld [vmem:[#allocation15 + $0x4b8] sm:$0xff] }
 0x45c   :  { %v7603_v4 = vcombine.high %v1341_v54, %v1345_v55  ;;  %v1389_v44 = vld [vmem:[#allocation15 + $0x618] sm:$0xff] }
 0x45d   :  { %2917 = vmatpush1.bf16.msra.mxu0 %v7544_v7  ;;  %v1348_v7 = vld [vmem:[#allocation15 + $0x4d0] sm:$0xff] }
 0x45e   :  { %2999 = vmatpush1.bf16.msra.mxu1 %v7546_v8  ;;  %2918 = vmatprep.subr.bf16.mxu0 %v7553_v10  ;;  %v1352_v8 = vld [vmem:[#allocation15 + $0x4f0] sm:$0xff]  ;;  %v1349_v10 = vld [vmem:[#allocation15 + $0x4d8] sm:$0xff] }
 0x45f   :  { %3000 = vmatprep.subr.bf16.mxu1 %v7555_v12  ;;  %v1353_v12 = vld [vmem:[#allocation15 + $0x4f8] sm:$0xff]  ;;  %v7609_v58 = vcombine.high %v1348_v7, %v1352_v8 }
 0x460   :  { %v7611_v59 = vcombine.high %v1349_v10, %v1353_v12 }
 0x461   :  { %2919 = vmatpush1.bf16.msra.mxu0 %v7552_v62  ;;  %v1360_v62 = vld [vmem:[#allocation15 + $0x530] sm:$0xff] }
 0x462   :  { %3001 = vmatpush1.bf16.msra.mxu1 %v7554_v63  ;;  %2920 = vmatprep.subr.bf16.mxu0 %v7561_v13  ;;  %v1357_v63 = vld [vmem:[#allocation15 + $0x518] sm:$0xff]  ;;  %v7617_v39 = vcombine.high %v1356_v61, %v1360_v62 }
 0x463   :  { %3002 = vmatprep.subr.bf16.mxu1 %v7563_v14  ;;  %v1361_v13 = vld [vmem:[#allocation15 + $0x538] sm:$0xff]  ;;  %v7610_v14 = vcombine.low %v1349_v10, %v1353_v12  ;;  %v1404_v10 = vld [vmem:[#allocation15 + $0x690] sm:$0xff] }
 0x464   :  { %v7619_v41 = vcombine.high %v1357_v63, %v1361_v13  ;;  %v1408_v12 = vld [vmem:[#allocation15 + $0x6b0] sm:$0xff] }
 0x465   :  { %2921 = vmatpush1.bf16.msra.mxu0 %v7560_v15  ;;  %v1365_v15 = vld [vmem:[#allocation15 + $0x558] sm:$0xff] }
 0x466   :  { %3003 = vmatpush1.bf16.msra.mxu1 %v7562_v19  ;;  %2922 = vmatprep.subr.bf16.mxu0 %v7569_v22  ;;  %v1369_v19 = vld [vmem:[#allocation15 + $0x578] sm:$0xff]  ;;  %v7616_v22 = vcombine.low %v1356_v61, %v1360_v62  ;;  %v7665_v61 = vcombine.high %v1404_v10, %v1408_v12 }
 0x467   :  { %3004 = vmatprep.subr.bf16.mxu1 %v7571_v6  ;;  %v7618_v6 = vcombine.low %v1357_v63, %v1361_v13  ;;  %v7627_v1 = vcombine.high %v1365_v15, %v1369_v19  ;;  %v1412_v63 = vld [vmem:[#allocation15 + $0x6d0] sm:$0xff] }
 0x468   :  { %v1416_v13 = vld [vmem:[#allocation15 + $0x6f0] sm:$0xff] }
 0x469   :  { %2923 = vmatpush1.bf16.msra.mxu0 %v7568_v23  ;;  %v1373_v23 = vld [vmem:[#allocation15 + $0x598] sm:$0xff] }
 0x46a   :  { %3005 = vmatpush1.bf16.msra.mxu1 %v7570_v24  ;;  %2924 = vmatprep.subr.bf16.mxu0 %v7577_v25  ;;  %v1377_v24 = vld [vmem:[#allocation15 + $0x5b8] sm:$0xff]  ;;  %v7624_v25 = vcombine.low %v1364_v40, %v1368_v42  ;;  %v7673_v40 = vcombine.high %v1412_v63, %v1416_v13 }
 0x46b   :  { %3006 = vmatprep.subr.bf16.mxu1 %v7579_v26  ;;  %v7626_v26 = vcombine.low %v1365_v15, %v1369_v19  ;;  %v7635_v9 = vcombine.high %v1373_v23, %v1377_v24  ;;  %v1420_v15 = vld [vmem:[#allocation15 + $0x710] sm:$0xff] }
 0x46c   :  { %v1424_v19 = vld [vmem:[#allocation15 + $0x730] sm:$0xff] }
 0x46d   :  { %2925 = vmatpush1.bf16.msra.mxu0 %v7576_v35  ;;  %v1381_v35 = vld [vmem:[#allocation15 + $0x5d8] sm:$0xff] }
 0x46e   :  { %3007 = vmatpush1.bf16.msra.mxu1 %v7578_v36  ;;  %2935 = vmatprep.subr.bf16.mxu0 %v7585_v37  ;;  %v1385_v36 = vld [vmem:[#allocation15 + $0x5f8] sm:$0xff]  ;;  %v7632_v37 = vcombine.low %v1372_v29, %v1376_v2  ;;  %v7681_v29 = vcombine.high %v1420_v15, %v1424_v19 }
 0x46f   :  { %3017 = vmatprep.subr.bf16.mxu1 %v7587_v38  ;;  %v7634_v38 = vcombine.low %v1373_v23, %v1377_v24  ;;  %v7643_v31 = vcombine.high %v1381_v35, %v1385_v36  ;;  %v7642_v51 = vcombine.low %v1381_v35, %v1385_v36  ;;  %v1428_v23 = vld [vmem:[#allocation15 + $0x750] sm:$0xff] }
 0x470   :  { %2927 = vmatmul.mubr.bf16.vlgmr.msra.gmra.mrb[12].mxu0 %v9130_v46  ;;  %v1432_v24 = vld [vmem:[#allocation15 + $0x770] sm:$0xff] }
 0x471   :  { %3009 = vmatmul.mubr.bf16.vlgmr.msra.gmra.mrb[12].mxu1 %v9130_v46  ;;  %2936 = vmatpush1.bf16.msra.mxu0 %v7584_v45  ;;  %v7602_v46 = vcombine.low %v1341_v54, %v1345_v55  ;;  %v1388_v45 = vld [vmem:[#allocation15 + $0x610] sm:$0xff] }
 0x472   :  { %2967 = vmatprep.mubr.bf16.mxu0 %v9136_v56  ;;  %3018 = vmatpush1.bf16.msra.mxu1 %v7586_v47  ;;  %v1393_v47 = vld [vmem:[#allocation15 + $0x638] sm:$0xff]  ;;  %v7649_v52 = vcombine.high %v1388_v45, %v1392_v43  ;;  %v1396_v54 = vld [vmem:[#allocation15 + $0x650] sm:$0xff] }
 0x473   :  { %3049 = vmatprep.mubr.bf16.mxu1 %v9136_v56  ;;  %2937 = vmatprep.subr.bf16.mxu0 %v7593_v48  ;;  %v7608_v56 = vcombine.low %v1348_v7, %v1352_v8  ;;  %v7640_v48 = vcombine.low %v1380_v28, %v1384_v34  ;;  %v1400_v55 = vld [vmem:[#allocation15 + $0x670] sm:$0xff]  ;;  %v7689_v28 = vcombine.high %v1428_v23, %v1432_v24 }
 0x474   :  { %3019 = vmatprep.subr.bf16.mxu1 %v7595_v53  ;;  %v7651_v53 = vcombine.high %v1389_v44, %v1393_v47  ;;  %v7657_v7 = vcombine.high %v1396_v54, %v1400_v55  ;;  %v1436_v35 = vld [vmem:[#allocation15 + $0x790] sm:$0xff] }
 0x475   :  { %2938 = vmatpush1.bf16.msra.mxu0 %v7592_v60  ;;  %v1397_v60 = vld [vmem:[#allocation15 + $0x658] sm:$0xff]  ;;  %v1440_v36 = vld [vmem:[#allocation15 + $0x7b0] sm:$0xff] }
 0x476   :  { %3020 = vmatpush1.bf16.msra.mxu1 %v7594_v0  ;;  %2939 = vmatprep.subr.bf16.mxu0 %v7601_v3  ;;  %v1401_v0 = vld [vmem:[#allocation15 + $0x678] sm:$0xff]  ;;  %v7648_v3 = vcombine.low %v1388_v45, %v1392_v43  ;;  %v7697_v45 = vcombine.high %v1436_v35, %v1440_v36 }
 0x477   :  { %3021 = vmatprep.subr.bf16.mxu1 %v7603_v4  ;;  %v7650_v4 = vcombine.low %v1389_v44, %v1393_v47  ;;  %v7659_v8 = vcombine.high %v1397_v60, %v1401_v0  ;;  %v1444_v44 = vld [vmem:[#allocation15 + $0x7d0] sm:$0xff] }
 0x478   :  { %v1448_v47 = vld [vmem:[#allocation15 + $0x7f0] sm:$0xff] }
 0x479   :  { %2940 = vmatpush1.bf16.msra.mxu0 %v7600_v57  ;;  %v1405_v57 = vld [vmem:[#allocation15 + $0x698] sm:$0xff] }
 0x47a   :  { %3022 = vmatpush1.bf16.msra.mxu1 %v7602_v46  ;;  %2941 = vmatprep.subr.bf16.mxu0 %v7609_v58  ;;  %v1409_v46 = vld [vmem:[#allocation15 + $0x6b8] sm:$0xff]  ;;  %v7656_v58 = vcombine.low %v1396_v54, %v1400_v55  ;;  %v7705_v54 = vcombine.high %v1444_v44, %v1448_v47 }
 0x47b   :  { %3023 = vmatprep.subr.bf16.mxu1 %v7611_v59  ;;  %v7658_v59 = vcombine.low %v1397_v60, %v1401_v0  ;;  %v7667_v62 = vcombine.high %v1405_v57, %v1409_v46  ;;  %v3534_v60 = vld [vmem:[#allocation18] sm:$0xff] }
 0x47c   :  { %v3538_v0 = vld [vmem:[#allocation18 + $0x20] sm:$0xff] }
 0x47d   :  { %2942 = vmatpush1.bf16.msra.mxu0 %v7608_v56  ;;  %v1413_v56 = vld [vmem:[#allocation15 + $0x6d8] sm:$0xff] }
 0x47e   :  { %3024 = vmatpush1.bf16.msra.mxu1 %v7610_v14  ;;  %2943 = vmatprep.subr.bf16.mxu0 %v7617_v39  ;;  %v1417_v14 = vld [vmem:[#allocation15 + $0x6f8] sm:$0xff]  ;;  %v7664_v39 = vcombine.low %v1404_v10, %v1408_v12  ;;  %v7721_v10 = vcombine.high %v3534_v60, %v3538_v0 }
 0x47f   :  { %3025 = vmatprep.subr.bf16.mxu1 %v7619_v41  ;;  %v7666_v41 = vcombine.low %v1405_v57, %v1409_v46  ;;  %v7675_v42 = vcombine.high %v1413_v56, %v1417_v14  ;;  %v3542_v57 = vld [vmem:[#allocation18 + $0x40] sm:$0xff] }
 0x480   :  { %v3546_v46 = vld [vmem:[#allocation18 + $0x60] sm:$0xff] }
 0x481   :  { %2944 = vmatpush1.bf16.msra.mxu0 %v7616_v22  ;;  %v1421_v22 = vld [vmem:[#allocation15 + $0x718] sm:$0xff] }
 0x482   :  { %3026 = vmatpush1.bf16.msra.mxu1 %v7618_v6  ;;  %2945 = vmatprep.subr.bf16.mxu0 %v7625_v5  ;;  %v1425_v6 = vld [vmem:[#allocation15 + $0x738] sm:$0xff]  ;;  %v7672_v5 = vcombine.low %v1412_v63, %v1416_v13  ;;  %v7729_v63 = vcombine.high %v3542_v57, %v3546_v46 }
 0x483   :  { %3027 = vmatprep.subr.bf16.mxu1 %v7627_v1  ;;  %v7674_v1 = vcombine.low %v1413_v56, %v1417_v14  ;;  %v7683_v2 = vcombine.high %v1421_v22, %v1425_v6  ;;  %v3550_v56 = vld [vmem:[#allocation18 + $0x80] sm:$0xff] }
 0x484   :  { %v3554_v14 = vld [vmem:[#allocation18 + $0xa0] sm:$0xff] }
 0x485   :  { %2946 = vmatpush1.bf16.msra.mxu0 %v7624_v25  ;;  %v1429_v25 = vld [vmem:[#allocation15 + $0x758] sm:$0xff] }
 0x486   :  { %3028 = vmatpush1.bf16.msra.mxu1 %v7626_v26  ;;  %2947 = vmatprep.subr.bf16.mxu0 %v7633_v27  ;;  %v1433_v26 = vld [vmem:[#allocation15 + $0x778] sm:$0xff]  ;;  %v7680_v27 = vcombine.low %v1420_v15, %v1424_v19  ;;  %v7737_v15 = vcombine.high %v3550_v56, %v3554_v14 }
 0x487   :  { %3029 = vmatprep.subr.bf16.mxu1 %v7635_v9  ;;  %v7682_v9 = vcombine.low %v1421_v22, %v1425_v6  ;;  %v7691_v34 = vcombine.high %v1429_v25, %v1433_v26  ;;  %v3558_v22 = vld [vmem:[#allocation18 + $0xc0] sm:$0xff] }
 0x488   :  { %v3562_v6 = vld [vmem:[#allocation18 + $0xe0] sm:$0xff] }
 0x489   :  { %2948 = vmatpush1.bf16.msra.mxu0 %v7632_v37  ;;  %v1437_v37 = vld [vmem:[#allocation15 + $0x798] sm:$0xff] }
 0x48a   :  { %3030 = vmatpush1.bf16.msra.mxu1 %v7634_v38  ;;  %2949 = vmatprep.subr.bf16.mxu0 %v7641_v33  ;;  %v1441_v38 = vld [vmem:[#allocation15 + $0x7b8] sm:$0xff]  ;;  %v7688_v33 = vcombine.low %v1428_v23, %v1432_v24  ;;  %v7745_v23 = vcombine.high %v3558_v22, %v3562_v6  ;;  %v3566_v24 = vld [vmem:[#allocation18 + $0x100] sm:$0xff] }
 0x48b   :  { %3031 = vmatprep.subr.bf16.mxu1 %v7643_v31  ;;  %v7690_v31 = vcombine.low %v1429_v25, %v1433_v26  ;;  %v7699_v43 = vcombine.high %v1437_v37, %v1441_v38  ;;  %v3570_v25 = vld [vmem:[#allocation18 + $0x120] sm:$0xff]  ;;  %v3567_v26 = vld [vmem:[#allocation18 + $0x108] sm:$0xff] }
 0x48d   :  { %2950 = vmatpush1.bf16.msra.mxu0 %v7640_v48  ;;  %v1445_v48 = vld [vmem:[#allocation15 + $0x7d8] sm:$0xff] }
 0x48e   :  { %3032 = vmatpush1.bf16.msra.mxu1 %v7642_v51  ;;  %2951 = vmatprep.subr.bf16.mxu0 %v7649_v52  ;;  %v1449_v51 = vld [vmem:[#allocation15 + $0x7f8] sm:$0xff]  ;;  %v7696_v52 = vcombine.low %v1436_v35, %v1440_v36  ;;  %v3574_v36 = vld [vmem:[#allocation18 + $0x140] sm:$0xff] }
 0x48f   :  { %3033 = vmatprep.subr.bf16.mxu1 %v7651_v53  ;;  %v7698_v53 = vcombine.low %v1437_v37, %v1441_v38  ;;  %v7707_v55 = vcombine.high %v1445_v48, %v1449_v51  ;;  %v3578_v37 = vld [vmem:[#allocation18 + $0x160] sm:$0xff]  ;;  %v3575_v38 = vld [vmem:[#allocation18 + $0x148] sm:$0xff] }
 0x491   :  { %2952 = vmatpush1.bf16.msra.mxu0 %v7648_v3  ;;  %v3535_v3 = vld [vmem:[#allocation18 + $0x8] sm:$0xff] }
 0x492   :  { %3034 = vmatpush1.bf16.msra.mxu1 %v7650_v4  ;;  %2953 = vmatprep.subr.bf16.mxu0 %v7657_v7  ;;  %v3539_v4 = vld [vmem:[#allocation18 + $0x28] sm:$0xff]  ;;  %v7704_v7 = vcombine.low %v1444_v44, %v1448_v47  ;;  %v3582_v47 = vld [vmem:[#allocation18 + $0x180] sm:$0xff] }
 0x493   :  { %3035 = vmatprep.subr.bf16.mxu1 %v7659_v8  ;;  %v7706_v8 = vcombine.low %v1445_v48, %v1449_v51  ;;  %v7723_v12 = vcombine.high %v3535_v3, %v3539_v4  ;;  %v3586_v48 = vld [vmem:[#allocation18 + $0x1a0] sm:$0xff]  ;;  %v3583_v51 = vld [vmem:[#allocation18 + $0x188] sm:$0xff] }
 0x495   :  { %2954 = vmatpush1.bf16.msra.mxu0 %v7656_v58  ;;  %v3543_v58 = vld [vmem:[#allocation18 + $0x48] sm:$0xff] }
 0x496   :  { %3036 = vmatpush1.bf16.msra.mxu1 %v7658_v59  ;;  %2955 = vmatprep.subr.bf16.mxu0 %v7665_v61  ;;  %v3547_v59 = vld [vmem:[#allocation18 + $0x68] sm:$0xff]  ;;  %v7720_v61 = vcombine.low %v3534_v60, %v3538_v0  ;;  %v3590_v0 = vld [vmem:[#allocation18 + $0x1c0] sm:$0xff] }
 0x497   :  { %3037 = vmatprep.subr.bf16.mxu1 %v7667_v62  ;;  %v7722_v62 = vcombine.low %v3535_v3, %v3539_v4  ;;  %v7731_v13 = vcombine.high %v3543_v58, %v3547_v59  ;;  %v3594_v3 = vld [vmem:[#allocation18 + $0x1e0] sm:$0xff]  ;;  %v3591_v4 = vld [vmem:[#allocation18 + $0x1c8] sm:$0xff] }
 0x499   :  { %2956 = vmatpush1.bf16.msra.mxu0 %v7664_v39  ;;  %v3551_v39 = vld [vmem:[#allocation18 + $0x88] sm:$0xff] }
 0x49a   :  { %3038 = vmatpush1.bf16.msra.mxu1 %v7666_v41  ;;  %2957 = vmatprep.subr.bf16.mxu0 %v7673_v40  ;;  %v3555_v41 = vld [vmem:[#allocation18 + $0xa8] sm:$0xff]  ;;  %v7728_v40 = vcombine.low %v3542_v57, %v3546_v46  ;;  %v3598_v46 = vld [vmem:[#allocation18 + $0x200] sm:$0xff] }
 0x49b   :  { %3039 = vmatprep.subr.bf16.mxu1 %v7675_v42  ;;  %v7730_v42 = vcombine.low %v3543_v58, %v3547_v59  ;;  %v7739_v19 = vcombine.high %v3551_v39, %v3555_v41  ;;  %v3602_v58 = vld [vmem:[#allocation18 + $0x220] sm:$0xff]  ;;  %v3599_v59 = vld [vmem:[#allocation18 + $0x208] sm:$0xff] }
 0x49d   :  { %2958 = vmatpush1.bf16.msra.mxu0 %v7672_v5  ;;  %v3559_v5 = vld [vmem:[#allocation18 + $0xc8] sm:$0xff] }
 0x49e   :  { %3040 = vmatpush1.bf16.msra.mxu1 %v7674_v1  ;;  %2959 = vmatprep.subr.bf16.mxu0 %v7681_v29  ;;  %v3563_v1 = vld [vmem:[#allocation18 + $0xe8] sm:$0xff]  ;;  %v7736_v29 = vcombine.low %v3550_v56, %v3554_v14  ;;  %v3606_v14 = vld [vmem:[#allocation18 + $0x240] sm:$0xff] }
 0x49f   :  { %3041 = vmatprep.subr.bf16.mxu1 %v7683_v2  ;;  %v7738_v2 = vcombine.low %v3551_v39, %v3555_v41  ;;  %v3610_v39 = vld [vmem:[#allocation18 + $0x260] sm:$0xff]  ;;  %v3607_v41 = vld [vmem:[#allocation18 + $0x248] sm:$0xff] }
 0x4a1   :  { %2960 = vmatpush1.bf16.msra.mxu0 %v7680_v27  ;;  %v3571_v27 = vld [vmem:[#allocation18 + $0x128] sm:$0xff] }
 0x4a2   :  { %3042 = vmatpush1.bf16.msra.mxu1 %v7682_v9  ;;  %2961 = vmatprep.subr.bf16.mxu0 %v7689_v28  ;;  %v7744_v9 = vcombine.low %v3558_v22, %v3562_v6  ;;  %v7746_v28 = vcombine.low %v3559_v5, %v3563_v1  ;;  %v7755_v35 = vcombine.high %v3567_v26, %v3571_v27  ;;  %v3614_v6 = vld [vmem:[#allocation18 + $0x280] sm:$0xff] }
 0x4a3   :  { %3043 = vmatprep.subr.bf16.mxu1 %v7691_v34  ;;  %v7753_v34 = vcombine.high %v3566_v24, %v3570_v25 }
 0x4a5   :  { %2962 = vmatpush1.bf16.msra.mxu0 %v7688_v33  ;;  %v3579_v33 = vld [vmem:[#allocation18 + $0x168] sm:$0xff] }
 0x4a6   :  { %3044 = vmatpush1.bf16.msra.mxu1 %v7690_v31  ;;  %2963 = vmatprep.subr.bf16.mxu0 %v7697_v45  ;;  %v7752_v31 = vcombine.low %v3566_v24, %v3570_v25  ;;  %v7754_v45 = vcombine.low %v3567_v26, %v3571_v27  ;;  %v7763_v44 = vcombine.high %v3575_v38, %v3579_v33  ;;  %v3622_v24 = vld [vmem:[#allocation18 + $0x2c0] sm:$0xff] }
 0x4a7   :  { %3045 = vmatprep.subr.bf16.mxu1 %v7699_v43  ;;  %v7761_v43 = vcombine.high %v3574_v36, %v3578_v37  ;;  %v3626_v25 = vld [vmem:[#allocation18 + $0x2e0] sm:$0xff] }
 0x4a8   :  { %v9161_v27 = vld [vmem:[#allocation18 + $0x400] sm:$0xff] }
 0x4a9   :  { %2964 = vmatpush1.bf16.msra.mxu0 %v7696_v52  ;;  %v3587_v52 = vld [vmem:[#allocation18 + $0x1a8] sm:$0xff] }
 0x4aa   :  { %3046 = vmatpush1.bf16.msra.mxu1 %v7698_v53  ;;  %2965 = vmatprep.subr.bf16.mxu0 %v7705_v54  ;;  %v7760_v53 = vcombine.low %v3574_v36, %v3578_v37  ;;  %v7762_v54 = vcombine.low %v3575_v38, %v3579_v33  ;;  %v7771_v60 = vcombine.high %v3583_v51, %v3587_v52  ;;  %v9167_v36 = vld [vmem:[#allocation18 + $0x428] sm:$0xff] }
 0x4ab   :  { %3047 = vmatprep.subr.bf16.mxu1 %v7707_v55  ;;  %v7769_v55 = vcombine.high %v3582_v47, %v3586_v48 }
 0x4ad   :  { %2966 = vmatpush1.bf16.msra.mxu0 %v7704_v7  ;;  %v3595_v7 = vld [vmem:[#allocation18 + $0x1e8] sm:$0xff] }
 0x4ae   :  { %3048 = vmatpush1.bf16.msra.mxu1 %v7706_v8  ;;  %6676 = vmatprep.subr.bf16.mxu0 %v7721_v10  ;;  %v7768_v8 = vcombine.low %v3582_v47, %v3586_v48  ;;  %v7770_v10 = vcombine.low %v3583_v51, %v3587_v52  ;;  %v7779_v57 = vcombine.high %v3591_v4, %v3595_v7  ;;  %v3634_v47 = vld [vmem:[#allocation18 + $0x320] sm:$0xff]  ;;  %v3631_v48 = vld [vmem:[#allocation18 + $0x308] sm:$0xff] }
 0x4af   :  { %6840 = vmatprep.subr.bf16.mxu1 %v7723_v12  ;;  %v7777_v12 = vcombine.high %v3590_v0, %v3594_v3  ;;  %v3635_v51 = vld [vmem:[#allocation18 + $0x328] sm:$0xff]  ;;  %v7808_v52 = vcombine.low %v3622_v24, %v3626_v25 }
 0x4b0   :  { %2968 = vmatmul.mubr.bf16.vlgmr.msra.gmra.mrb[12].mxu0 %v9149_v18 }
 0x4b1   :  { %3050 = vmatmul.mubr.bf16.vlgmr.msra.gmra.mrb[12].mxu1 %v9149_v18  ;;  %6677 = vmatpush1.bf16.msra.mxu0 %v7720_v61  ;;  %v7747_v18 = vcombine.high %v3559_v5, %v3563_v1  ;;  %v3603_v61 = vld [vmem:[#allocation18 + $0x228] sm:$0xff]  ;;  %v3618_v5 = vld [vmem:[#allocation18 + $0x2a0] sm:$0xff] }
 0x4b2   :  { %6841 = vmatpush1.bf16.msra.mxu1 %v7722_v62  ;;  %6678 = vmatprep.subr.bf16.mxu0 %v7729_v63  ;;  %v7776_v62 = vcombine.low %v3590_v0, %v3594_v3  ;;  %v7778_v63 = vcombine.low %v3591_v4, %v3595_v7  ;;  %v7787_v56 = vcombine.high %v3599_v59, %v3603_v61  ;;  %v3615_v1 = vld [vmem:[#allocation18 + $0x288] sm:$0xff]  ;;  %v3642_v0 = vld [vmem:[#allocation18 + $0x360] sm:$0xff] }
 0x4b3   :  { %6842 = vmatprep.subr.bf16.mxu1 %v7731_v13  ;;  %v7785_v13 = vcombine.high %v3598_v46, %v3602_v58  ;;  %v7800_v37 = vcombine.low %v3614_v6, %v3618_v5  ;;  %v3639_v3 = vld [vmem:[#allocation18 + $0x348] sm:$0xff] }
 0x4b4   :  { %v3643_v4 = vld [vmem:[#allocation18 + $0x368] sm:$0xff] }
 0x4b5   :  { %6679 = vmatpush1.bf16.msra.mxu0 %v7728_v40  ;;  %v3611_v40 = vld [vmem:[#allocation18 + $0x268] sm:$0xff] }
 0x4b6   :  { %6843 = vmatpush1.bf16.msra.mxu1 %v7730_v42  ;;  %6680 = vmatprep.subr.bf16.mxu0 %v7737_v15  ;;  %v7784_v42 = vcombine.low %v3598_v46, %v3602_v58  ;;  %v7786_v15 = vcombine.low %v3599_v59, %v3603_v61  ;;  %v7795_v22 = vcombine.high %v3607_v41, %v3611_v40  ;;  %v3650_v46 = vld [vmem:[#allocation18 + $0x3a0] sm:$0xff]  ;;  %v3647_v58 = vld [vmem:[#allocation18 + $0x388] sm:$0xff] }
 0x4b7   :  { %6844 = vmatprep.subr.bf16.mxu1 %v7739_v19  ;;  %v7793_v19 = vcombine.high %v3606_v14, %v3610_v39  ;;  %v3651_v59 = vld [vmem:[#allocation18 + $0x3a8] sm:$0xff] }
 0x4b9   :  { %6681 = vmatpush1.bf16.msra.mxu0 %v7736_v29  ;;  %v3619_v29 = vld [vmem:[#allocation18 + $0x2a8] sm:$0xff] }
 0x4ba   :  { %6845 = vmatpush1.bf16.msra.mxu1 %v7738_v2  ;;  %6682 = vmatprep.subr.bf16.mxu0 %v7745_v23  ;;  %v7792_v2 = vcombine.low %v3606_v14, %v3610_v39  ;;  %v7794_v23 = vcombine.low %v3607_v41, %v3611_v40  ;;  %v7803_v26 = vcombine.high %v3615_v1, %v3619_v29  ;;  %v3658_v14 = vld [vmem:[#allocation18 + $0x3e0] sm:$0xff]  ;;  %v3655_v39 = vld [vmem:[#allocation18 + $0x3c8] sm:$0xff] }
 0x4bb   :  { %6846 = vmatprep.subr.bf16.mxu1 %v7747_v18  ;;  %v7801_v18 = vcombine.high %v3614_v6, %v3618_v5  ;;  %v3659_v41 = vld [vmem:[#allocation18 + $0x3e8] sm:$0xff] }
 0x4bc   :  { %v7842_v6 = vcombine.low %v3655_v39, %v3659_v41 }
 0x4bd   :  { %6683 = vmatpush1.bf16.msra.mxu0 %v7744_v9  ;;  %v9163_v9 = vld [vmem:[#allocation18 + $0x420] sm:$0xff] }
 0x4be   :  { %6847 = vmatpush1.bf16.msra.mxu1 %v7746_v28  ;;  %6684 = vmatprep.subr.bf16.mxu0 %v7753_v34  ;;  %v9165_v28 = vld [vmem:[#allocation18 + $0x408] sm:$0xff]  ;;  %v7848_v38 = vcombine.low %v9161_v27, %v9163_v9  ;;  %v7849_v5 = vcombine.high %v9161_v27, %v9163_v9 }
 0x4bf   :  { %6848 = vmatprep.subr.bf16.mxu1 %v7755_v35  ;;  %v3623_v34 = vld [vmem:[#allocation18 + $0x2c8] sm:$0xff]  ;;  %v7850_v33 = vcombine.low %v9165_v28, %v9167_v36 }
 0x4c0   :  { %v3627_v35 = vld [vmem:[#allocation18 + $0x2e8] sm:$0xff] }
 0x4c1   :  { %6685 = vmatpush1.bf16.msra.mxu0 %v7752_v31  ;;  %v7802_v31 = vcombine.low %v3615_v1, %v3619_v29  ;;  %v7851_v1 = vcombine.high %v9165_v28, %v9167_v36 }
 0x4c2   :  { %6849 = vmatpush1.bf16.msra.mxu1 %v7754_v45  ;;  %6686 = vmatprep.subr.bf16.mxu0 %v7761_v43  ;;  %v7809_v45 = vcombine.high %v3622_v24, %v3626_v25  ;;  %v7811_v43 = vcombine.high %v3623_v34, %v3627_v35 }
 0x4c3   :  { %6850 = vmatprep.subr.bf16.mxu1 %v7763_v44  ;;  %v3630_v44 = vld [vmem:[#allocation18 + $0x300] sm:$0xff] }
 0x4c4   :  { %v7816_v7 = vcombine.low %v3630_v44, %v3634_v47 }
 0x4c5   :  { %6687 = vmatpush1.bf16.msra.mxu0 %v7760_v53  ;;  %v7810_v53 = vcombine.low %v3623_v34, %v3627_v35 }
 0x4c6   :  { %6851 = vmatpush1.bf16.msra.mxu1 %v7762_v54  ;;  %6688 = vmatprep.subr.bf16.mxu0 %v7769_v55  ;;  %v7817_v54 = vcombine.high %v3630_v44, %v3634_v47  ;;  %v7819_v55 = vcombine.high %v3631_v48, %v3635_v51 }
 0x4c7   :  { %6852 = vmatprep.subr.bf16.mxu1 %v7771_v60  ;;  %v3638_v60 = vld [vmem:[#allocation18 + $0x340] sm:$0xff] }
 0x4c8   :  { %v7824_v61 = vcombine.low %v3638_v60, %v3642_v0 }
 0x4c9   :  { %6689 = vmatpush1.bf16.msra.mxu0 %v7768_v8  ;;  %v7818_v8 = vcombine.low %v3631_v48, %v3635_v51 }
 0x4ca   :  { %6853 = vmatpush1.bf16.msra.mxu1 %v7770_v10  ;;  %6690 = vmatprep.subr.bf16.mxu0 %v7777_v12  ;;  %v7825_v10 = vcombine.high %v3638_v60, %v3642_v0  ;;  %v7827_v12 = vcombine.high %v3639_v3, %v3643_v4 }
 0x4cb   :  { %6854 = vmatprep.subr.bf16.mxu1 %v7779_v57  ;;  %v3646_v57 = vld [vmem:[#allocation18 + $0x380] sm:$0xff] }
 0x4cc   :  { %v7832_v40 = vcombine.low %v3646_v57, %v3650_v46 }
 0x4cd   :  { %6691 = vmatpush1.bf16.msra.mxu0 %v7776_v62  ;;  %v7826_v62 = vcombine.low %v3639_v3, %v3643_v4 }
 0x4ce   :  { %6855 = vmatpush1.bf16.msra.mxu1 %v7778_v63  ;;  %6692 = vmatprep.subr.bf16.mxu0 %v7785_v13  ;;  %v7833_v63 = vcombine.high %v3646_v57, %v3650_v46  ;;  %v7835_v13 = vcombine.high %v3647_v58, %v3651_v59 }
 0x4cf   :  { %6856 = vmatprep.subr.bf16.mxu1 %v7787_v56  ;;  %v3654_v56 = vld [vmem:[#allocation18 + $0x3c0] sm:$0xff] }
 0x4d1   :  { %6693 = vmatpush1.bf16.msra.mxu0 %v7784_v42  ;;  %v7834_v42 = vcombine.low %v3647_v58, %v3651_v59 }
 0x4d2   :  { %6857 = vmatpush1.bf16.msra.mxu1 %v7786_v15  ;;  %6694 = vmatprep.subr.bf16.mxu0 %v7793_v19  ;;  %v7841_v15 = vcombine.high %v3654_v56, %v3658_v14  ;;  %v7843_v19 = vcombine.high %v3655_v39, %v3659_v41 }
 0x4d3   :  { %6858 = vmatprep.subr.bf16.mxu1 %v7795_v22  ;;  %v7840_v22 = vcombine.low %v3654_v56, %v3658_v14 }
 0x4d5   :  { %6695 = vmatpush1.bf16.msra.mxu0 %v7792_v2 }
 0x4d6   :  { %6859 = vmatpush1.bf16.msra.mxu1 %v7794_v23  ;;  %6696 = vmatprep.subr.bf16.mxu0 %v7801_v18 }
 0x4d7   :  { %6860 = vmatprep.subr.bf16.mxu1 %v7803_v26 }
 0x4d9   :  { %6697 = vmatpush1.bf16.msra.mxu0 %v7800_v37 }
 0x4da   :  { %6861 = vmatpush1.bf16.msra.mxu1 %v7802_v31  ;;  %6698 = vmatprep.subr.bf16.mxu0 %v7809_v45 }
 0x4db   :  { %6862 = vmatprep.subr.bf16.mxu1 %v7811_v43 }
 0x4dd   :  { %6699 = vmatpush1.bf16.msra.mxu0 %v7808_v52 }
 0x4de   :  { %6863 = vmatpush1.bf16.msra.mxu1 %v7810_v53  ;;  %6700 = vmatprep.subr.bf16.mxu0 %v7817_v54 }
 0x4df   :  { %6864 = vmatprep.subr.bf16.mxu1 %v7819_v55 }
 0x4e1   :  { %6701 = vmatpush1.bf16.msra.mxu0 %v7816_v7 }
 0x4e2   :  { %6865 = vmatpush1.bf16.msra.mxu1 %v7818_v8  ;;  %6702 = vmatprep.subr.bf16.mxu0 %v7825_v10 }
 0x4e3   :  { %6866 = vmatprep.subr.bf16.mxu1 %v7827_v12 }
 0x4e5   :  { %6703 = vmatpush1.bf16.msra.mxu0 %v7824_v61 }
 0x4e6   :  { %6867 = vmatpush1.bf16.msra.mxu1 %v7826_v62  ;;  %6704 = vmatprep.subr.bf16.mxu0 %v7833_v63 }
 0x4e7   :  { %6868 = vmatprep.subr.bf16.mxu1 %v7835_v13 }
 0x4e9   :  { %6705 = vmatpush1.bf16.msra.mxu0 %v7832_v40 }
 0x4ea   :  { %6869 = vmatpush1.bf16.msra.mxu1 %v7834_v42  ;;  %6706 = vmatprep.subr.bf16.mxu0 %v7841_v15 }
 0x4eb   :  { %6870 = vmatprep.subr.bf16.mxu1 %v7843_v19 }
 0x4ed   :  { %6707 = vmatpush1.bf16.msra.mxu0 %v7840_v22 }
 0x4ee   :  { %6871 = vmatpush1.bf16.msra.mxu1 %v7842_v6  ;;  %6717 = vmatprep.subr.bf16.mxu0 %v7849_v5 }
 0x4ef   :  { %6881 = vmatprep.subr.bf16.mxu1 %v7851_v1 }
 0x503   :  { %v9177_v29 = vpop.f32.mrb[8].mxu0  ;;  %v9179_v2 = vpop.f32.mrb[8].mxu1 }
 0x504   :  { %v3058_v23 = vrot.slane %v9177_v29, 4  ;;  %v3070_v18 = vrot.slane %v9179_v2, 4  ;;  %v9183_v24 = vpop.f32.mrb[9].mxu0  ;;  %v9185_v25 = vpop.f32.mrb[9].mxu1 }
 0x505   :  { %v3064_v26 = vrot.slane %v9183_v24, 4  ;;  %v3076_v34 = vrot.slane %v9185_v25, 4  ;;  %v2809_v35 = vpop.f32.mrb[10].mxu0  ;;  %v2891_v37 = vpop.f32.mrb[10].mxu1 }
 0x506   :  { %v3059_v31 = vadd.f32 %v3058_v23, %v9177_v29  ;;  %v3071_v45 = vadd.f32 %v3070_v18, %v9179_v2  ;;  %v2810_v43 = vpop.f32.mrb[11].mxu0  ;;  %v2892_v44 = vpop.f32.mrb[11].mxu1 }
 0x507   :  { %v3065_v47 = vadd.f32 %v3064_v26, %v9183_v24  ;;  %v3077_v48 = vadd.f32 %v3076_v34, %v9185_v25 }
 0x508   :  { %v3060_v51 = vrot.slane %v3059_v31, 2  ;;  %v3072_v52 = vrot.slane %v3071_v45, 2 }
 0x509   :  { %v3066_v53 = vrot.slane %v3065_v47, 2  ;;  %v3078_v54 = vrot.slane %v3077_v48, 2 }
 0x50a   :  { %v3061_v55 = vadd.f32 %v3060_v51, %v3059_v31  ;;  %v3073_v60 = vadd.f32 %v3072_v52, %v3071_v45 }
 0x50b   :  { %v3067_v0 = vadd.f32 %v3066_v53, %v3065_v47  ;;  %v3079_v3 = vadd.f32 %v3078_v54, %v3077_v48 }
 0x50c   :  { %v3062_v4 = vrot.slane %v3061_v55, 1  ;;  %v3074_v7 = vrot.slane %v3073_v60, 1 }
 0x50d   :  { %v3068_v8 = vrot.slane %v3067_v0, 1  ;;  %v3080_v10 = vrot.slane %v3079_v3, 1 }
 0x50e   :  { %v3063_v12 = vadd.f32 %v3062_v4, %v3061_v55  ;;  %v3075_v57 = vadd.f32 %v3074_v7, %v3073_v60 }
 0x50f   :  { %v3069_v46 = vadd.f32 %v3068_v8, %v3067_v0  ;;  %v3081_v58 = vadd.f32 %v3080_v10, %v3079_v3 }
 0x510   :  { %v9193_v59 = vmul.f32 0.125, %v3063_v12  ;;  %v9195_v61 = vmul.f32 0.125, %v3075_v57 }
 0x511   :  { %v3107_v62 = vmul.f32 0.125, %v3069_v46  ;;  %v9197_v63 = vmul.f32 0.125, %v3081_v58 }
 0x512   :  { %v3114_v13 = vsub.f32 %v9177_v29, %v9193_v59  ;;  %v3116_v56 = vsub.f32 %v9179_v2, %v9195_v61 }
 0x513   :  { %v3115_v14 = vsub.f32 %v9183_v24, %v3107_v62  ;;  %v3117_v39 = vsub.f32 %v9185_v25, %v9197_v63 }
 0x514   :  { %v3122_v41 = vmul.f32 %v3114_v13, %v3114_v13  ;;  %v3124_v40 = vmul.f32 %v3116_v56, %v3116_v56 }
 0x515   :  { %v3123_v42 = vmul.f32 %v3115_v14, %v3115_v14  ;;  %v3125_v15 = vmul.f32 %v3117_v39, %v3117_v39 }
 0x516   :  { %v3130_v19 = vrot.slane %v3122_v41, 4  ;;  %v3142_v22 = vrot.slane %v3124_v40, 4 }
 0x517   :  { %v3136_v6 = vrot.slane %v3123_v42, 4  ;;  %v3148_v5 = vrot.slane %v3125_v15, 4 }
 0x518   :  { %v3131_v1 = vadd.f32 %v3130_v19, %v3122_v41  ;;  %v3143_v23 = vadd.f32 %v3142_v22, %v3124_v40 }
 0x519   :  { %v3137_v18 = vadd.f32 %v3136_v6, %v3123_v42  ;;  %v3149_v26 = vadd.f32 %v3148_v5, %v3125_v15  ;;  %v3186_v15 = vld [vmem:[#allocation17] sm:$0xff] }
 0x51a   :  { %v3132_v34 = vrot.slane %v3131_v1, 2  ;;  %v3144_v35 = vrot.slane %v3143_v23, 2 }
 0x51b   :  { %v3138_v37 = vrot.slane %v3137_v18, 2  ;;  %v3150_v31 = vrot.slane %v3149_v26, 2 }
 0x51c   :  { %v3133_v45 = vadd.f32 %v3132_v34, %v3131_v1  ;;  %v3145_v43 = vadd.f32 %v3144_v35, %v3143_v23 }
 0x51d   :  { %v3139_v44 = vadd.f32 %v3138_v37, %v3137_v18  ;;  %v3151_v47 = vadd.f32 %v3150_v31, %v3149_v26 }
 0x51e   :  { %v3134_v48 = vrot.slane %v3133_v45, 1  ;;  %v3146_v51 = vrot.slane %v3145_v43, 1 }
 0x51f   :  { %v3140_v52 = vrot.slane %v3139_v44, 1  ;;  %v3152_v53 = vrot.slane %v3151_v47, 1 }
 0x520   :  { %v3135_v54 = vadd.f32 %v3134_v48, %v3133_v45  ;;  %v3147_v55 = vadd.f32 %v3146_v51, %v3145_v43 }
 0x521   :  { %v3141_v60 = vadd.f32 %v3140_v52, %v3139_v44  ;;  %v3153_v0 = vadd.f32 %v3152_v53, %v3151_v47 }
 0x522   :  { %v3178_v3 = vmul.f32 0.125, %v3135_v54  ;;  %v3180_v4 = vmul.f32 0.125, %v3147_v55 }
 0x523   :  { %v3179_v7 = vmul.f32 0.125, %v3141_v60  ;;  %v3181_v8 = vmul.f32 0.125, %v3153_v0 }
 0x524   :  { %v3188_v10 = vadd.f32 0.8, %v3178_v3  ;;  %v3190_v12 = vadd.f32 0.8, %v3180_v4 }
 0x525   :  { %v3189_v57 = vadd.f32 0.8, %v3179_v7  ;;  %v3191_v46 = vadd.f32 0.8, %v3181_v8 }
 0x526   :  { %8485 = vrsqrt.f32 %v3188_v10 }
 0x527   :  { %8487 = vrsqrt.f32 %v3190_v12 }
 0x528   :  { %8489 = vrsqrt.f32 %v3189_v57 }
 0x529   :  { %8491 = vrsqrt.f32 %v3191_v46 }
 0x530   :  { %v8486_v58 = vpop.eup %8485 }
 0x531   :  { %v8488_v13 = vpop.eup %8487 }
 0x532   :  { %v8490_v56 = vpop.eup %8489 }
 0x533   :  { %v8492_v14 = vpop.eup %8491  ;;  %v3212_v39 = vcombine.low %v8486_v58, %v8490_v56  ;;  %v3670_v58 = vld [vmem:[#allocation18 + $0x440] sm:$0xff] }
 0x534   :  { %v3213_v41 = vcombine.low %v8488_v13, %v8492_v14  ;;  %v3674_v14 = vld [vmem:[#allocation18 + $0x460] sm:$0xff] }
 0x535   :  { %v3220_v40 = vrot.slane %v3212_v39, %v9014_v11  ;;  %v3671_v39 = vld [vmem:[#allocation18 + $0x448] sm:$0xff] }
 0x536   :  { %v3227_v42 = vrot.slane %v3213_v41, %v9014_v11  ;;  %v3675_v41 = vld [vmem:[#allocation18 + $0x468] sm:$0xff] }
 0x538   :  { %v3228_v19 = vcombine.low %v3220_v40, %v3227_v42 }
 0x53a   :  { %v3248_v22 = vmul.f32 %v3228_v19, %v3186_v15  ;;  %v3678_v19 = vld [vmem:[#allocation18 + $0x480] sm:$0xff] }
 0x53c   :  { %v3255_v6 = vrot.slane %v3248_v22, %v9018_v16  ;;  %v3259_v5 = vrot.slane %v3248_v22, %v9021_v17  ;;  %v3263_v1 = vrot.slane %v3248_v22, %v9089_v49  ;;  %v3267_v23 = vrot.slane %v3248_v22, %v9092_v50 }
 0x53d   :  { %v7857_v22 = vcombine.high %v3670_v58, %v3674_v14 }
 0x53e   :  { %v3292_v18 = vmul.f32 %v3255_v6, %v9193_v59  ;;  %v3293_v26 = vmul.f32 %v3259_v5, %v3107_v62  ;;  %v3294_v34 = vmul.f32 %v3263_v1, %v9195_v61  ;;  %v3295_v35 = vmul.f32 %v3267_v23, %v9197_v63 }
 0x53f   :  { %v3363_v37 = vrot.slane %v3267_v23, %v9018_v16  ;;  %v3355_v31 = vrot.slane %v3259_v5, %v9018_v16  ;;  %v3351_v45 = vrot.slane %v3255_v6, %v9018_v16  ;;  %v3359_v43 = vrot.slane %v3263_v1, %v9018_v16  ;;  %v3682_v5 = vld [vmem:[#allocation18 + $0x4a0] sm:$0xff]  ;;  %v3679_v1 = vld [vmem:[#allocation18 + $0x488] sm:$0xff] }
 0x540   :  { %v3308_v44 = vcombine.low %v3292_v18, %v3293_v26  ;;  %v3309_v47 = vcombine.low %v3294_v34, %v3295_v35  ;;  %v7859_v6 = vcombine.high %v3671_v39, %v3675_v41  ;;  %v3683_v23 = vld [vmem:[#allocation18 + $0x4a8] sm:$0xff]  ;;  %v7856_v26 = vcombine.low %v3670_v58, %v3674_v14 }
 0x541   :  { %v3383_v48 = vmul.f32 %v3363_v37, %v9185_v25  ;;  %v3381_v51 = vmul.f32 %v3355_v31, %v9183_v24  ;;  %v3380_v59 = vmul.f32 %v3351_v45, %v9177_v29  ;;  %v3382_v61 = vmul.f32 %v3359_v43, %v9179_v2  ;;  %v3686_v31 = vld [vmem:[#allocation18 + $0x4c0] sm:$0xff]  ;;  %v3687_v43 = vld [vmem:[#allocation18 + $0x4c8] sm:$0xff] }
 0x542   :  { %v3316_v62 = vrot.slane %v3308_v44, %v9014_v11  ;;  %v3323_v63 = vrot.slane %v3309_v47, %v9014_v11  ;;  %v7858_v34 = vcombine.low %v3671_v39, %v3675_v41  ;;  %v7865_v35 = vcombine.high %v3678_v19, %v3682_v5  ;;  %v3690_v45 = vld [vmem:[#allocation18 + $0x4e0] sm:$0xff]  ;;  %v3691_v44 = vld [vmem:[#allocation18 + $0x4e8] sm:$0xff] }
 0x543   :  { %v7867_v37 = vcombine.high %v3679_v1, %v3683_v23  ;;  %v7864_v27 = vcombine.low %v3678_v19, %v3682_v5  ;;  %v7866_v9 = vcombine.low %v3679_v1, %v3683_v23  ;;  %v7873_v28 = vcombine.high %v3686_v31, %v3690_v45  ;;  %v3695_v47 = vld [vmem:[#allocation18 + $0x508] sm:$0xff]  ;;  %v3730_v19 = vld [vmem:[#allocation18 + $0x620] sm:$0xff] }
 0x544   :  { %v3324_v52 = vcombine.low %v3316_v62, %v3323_v63  ;;  %v7875_v36 = vcombine.high %v3687_v43, %v3691_v44  ;;  %v3702_v63 = vld [vmem:[#allocation18 + $0x540] sm:$0xff]  ;;  %v3719_v58 = vld [vmem:[#allocation18 + $0x5c8] sm:$0xff] }
 0x546   :  { %v3342_v53 = vrot.slane %v3324_v52, 7  ;;  %v3706_v52 = vld [vmem:[#allocation18 + $0x560] sm:$0xff] }
 0x548   :  { %v3346_v54 = vsub.f32 %v3186_v15, %v3342_v53  ;;  %v3703_v53 = vld [vmem:[#allocation18 + $0x548] sm:$0xff] }
 0x54a   :  { %v3405_v55 = vrot.slane %v3346_v54, %v9113_v20  ;;  %v3397_v60 = vrot.slane %v3346_v54, %v9032_v32  ;;  %v3393_v0 = vrot.slane %v3346_v54, %v9029_v30  ;;  %v3401_v25 = vrot.slane %v3346_v54, %v9116_v21  ;;  %v3707_v54 = vld [vmem:[#allocation18 + $0x568] sm:$0xff] }
 0x54c   :  { %v3445_v24 = vrot.slane %v3405_v55, %v9029_v30  ;;  %v3437_v29 = vrot.slane %v3397_v60, %v9029_v30  ;;  %v3433_v2 = vrot.slane %v3393_v0, %v9029_v30  ;;  %v3441_v3 = vrot.slane %v3401_v25, %v9029_v30 }
 0x54d   :  { %v7889_v0 = vcombine.high %v3702_v63, %v3706_v52  ;;  %v7891_v25 = vcombine.high %v3703_v53, %v3707_v54 }
 0x54e   :  { %v3465_v4 = vadd.f32 %v3445_v24, %v3383_v48  ;;  %v3463_v7 = vadd.f32 %v3437_v29, %v3381_v51  ;;  %v3462_v8 = vadd.f32 %v3433_v2, %v3380_v59  ;;  %v9233_v10 = vadd.f32 %v3441_v3, %v3382_v61  ;;  %v3699_v48 = vld [vmem:[#allocation18 + $0x528] sm:$0xff]  ;;  %v3710_v24 = vld [vmem:[#allocation18 + $0x580] sm:$0xff] }
 0x54f   :  { %v7872_v51 = vcombine.low %v3686_v31, %v3690_v45  ;;  %v7874_v59 = vcombine.low %v3687_v43, %v3691_v44  ;;  %v7883_v62 = vcombine.high %v3695_v47, %v3699_v48  ;;  %v7882_v60 = vcombine.low %v3695_v47, %v3699_v48  ;;  %v3714_v29 = vld [vmem:[#allocation18 + $0x5a0] sm:$0xff]  ;;  %v3711_v2 = vld [vmem:[#allocation18 + $0x588] sm:$0xff] }
 0x550   :  { %vm3471_vm9 = vcmp.gt.f32.partialorder %v3463_v7, 0.0  ;;  %v3479_v12 = vmul.f32 0.2, %v3463_v7  ;;  %vm3470_vm10 = vcmp.gt.f32.partialorder %v3462_v8, 0.0  ;;  %v3478_v57 = vmul.f32 0.2, %v3462_v8 }
 0x551   :  { %vm3473_vm11 = vcmp.gt.f32.partialorder %v3465_v4, 0.0  ;;  %v3481_v46 = vmul.f32 0.2, %v3465_v4  ;;  %v3715_v3 = vld [vmem:[#allocation18 + $0x5a8] sm:$0xff]  ;;  %vm3472_vm12 = vcmp.gt.f32.partialorder %v9233_v10, 0.0 }
 0x552   :  { %v3487_v13 = vsel %vm3471_vm9, %v3463_v7, %v3479_v12  ;;  %v3486_v56 = vsel %vm3470_vm10, %v3462_v8, %v3478_v57  ;;  %v7890_v7 = vcombine.low %v3703_v53, %v3707_v54  ;;  %v7897_v8 = vcombine.high %v3710_v24, %v3714_v29  ;;  %v3718_v57 = vld [vmem:[#allocation18 + $0x5c0] sm:$0xff]  ;;  %v3739_v31 = vld [vmem:[#allocation18 + $0x668] sm:$0xff] }
 0x553   :  { %v9235_v40 = vpack.c.bf16 %v3487_v13, %v3487_v13  ;;  %v9237_v42 = vpack.c.bf16 %v3486_v56, %v3486_v56  ;;  %v3489_v15 = vsel %vm3473_vm11, %v3465_v4, %v3481_v46  ;;  %v7888_v4 = vcombine.low %v3702_v63, %v3706_v52  ;;  %v3722_v46 = vld [vmem:[#allocation18 + $0x5e0] sm:$0xff]  ;;  %v3723_v13 = vld [vmem:[#allocation18 + $0x5e8] sm:$0xff] }
 0x554   :  { %v9243_v18 = vpack.c.bf16 %v3489_v15, %v3489_v15  ;;  %v7899_v12 = vcombine.high %v3711_v2, %v3715_v3  ;;  %v7896_v56 = vcombine.low %v3710_v24, %v3714_v29  ;;  %v7898_v14 = vcombine.low %v3711_v2, %v3715_v3  ;;  %v3726_v15 = vld [vmem:[#allocation18 + $0x600] sm:$0xff]  ;;  %v3755_v63 = vld [vmem:[#allocation18 + $0x6e8] sm:$0xff] }
 0x555   :  { %6708 = vmatprep.mubr.bf16.mxu0 %v9235_v40  ;;  %6872 = vmatprep.mubr.bf16.mxu1 %v9235_v40  ;;  %v7905_v39 = vcombine.high %v3718_v57, %v3722_v46  ;;  %v7907_v41 = vcombine.high %v3719_v58, %v3723_v13  ;;  %v7904_v5 = vcombine.low %v3718_v57, %v3722_v46  ;;  %v3763_v24 = vld [vmem:[#allocation18 + $0x728] sm:$0xff] }
 0x556   :  { %6709 = vmatmul.mubr.bf16.vlgmr.msra.gmra.mrb[16].mxu0 %v9237_v42  ;;  %6873 = vmatmul.mubr.bf16.vlgmr.msra.gmra.mrb[16].mxu1 %v9237_v42  ;;  %v7906_v1 = vcombine.low %v3719_v58, %v3723_v13  ;;  %v7913_v23 = vcombine.high %v3726_v15, %v3730_v19  ;;  %v7912_v45 = vcombine.low %v3726_v15, %v3730_v19  ;;  %v3771_v57 = vld [vmem:[#allocation18 + $0x768] sm:$0xff]  ;;  %v3774_v19 = vld [vmem:[#allocation18 + $0x780] sm:$0xff] }
 0x557   :  { %6718 = vmatpush1.bf16.msra.mxu0 %v7848_v38  ;;  %6882 = vmatpush1.bf16.msra.mxu1 %v7850_v33  ;;  %v3694_v38 = vld [vmem:[#allocation18 + $0x500] sm:$0xff] }
 0x558   :  { %6749 = vmatprep.mubr.bf16.mxu0 %v9243_v18  ;;  %6913 = vmatprep.mubr.bf16.mxu1 %v9243_v18  ;;  %v3698_v33 = vld [vmem:[#allocation18 + $0x520] sm:$0xff] }
 0x559   :  { %6719 = vmatprep.subr.bf16.mxu0 %v7857_v22  ;;  %6883 = vmatprep.subr.bf16.mxu1 %v7859_v6  ;;  %v7881_v61 = vcombine.high %v3694_v38, %v3698_v33  ;;  %v7880_v55 = vcombine.low %v3694_v38, %v3698_v33  ;;  %v3727_v22 = vld [vmem:[#allocation18 + $0x608] sm:$0xff] }
 0x55a   :  { %v3731_v6 = vld [vmem:[#allocation18 + $0x628] sm:$0xff] }
 0x55b   :  { %6720 = vmatpush1.bf16.msra.mxu0 %v7856_v26  ;;  %6884 = vmatpush1.bf16.msra.mxu1 %v7858_v34  ;;  %v7915_v26 = vcombine.high %v3727_v22, %v3731_v6  ;;  %v3734_v34 = vld [vmem:[#allocation18 + $0x640] sm:$0xff]  ;;  %v7914_v43 = vcombine.low %v3727_v22, %v3731_v6  ;;  %v3747_v38 = vld [vmem:[#allocation18 + $0x6a8] sm:$0xff] }
 0x55c   :  { %6721 = vmatprep.subr.bf16.mxu0 %v7865_v35  ;;  %6885 = vmatprep.subr.bf16.mxu1 %v7867_v37  ;;  %v3738_v35 = vld [vmem:[#allocation18 + $0x660] sm:$0xff]  ;;  %v3735_v37 = vld [vmem:[#allocation18 + $0x648] sm:$0xff] }
 0x55d   :  { %v7921_v44 = vcombine.high %v3734_v34, %v3738_v35  ;;  %v7920_v33 = vcombine.low %v3734_v34, %v3738_v35  ;;  %v7922_v47 = vcombine.low %v3735_v37, %v3739_v31  ;;  %v3778_v22 = vld [vmem:[#allocation18 + $0x7a0] sm:$0xff]  ;;  %v3779_v34 = vld [vmem:[#allocation18 + $0x7a8] sm:$0xff] }
 0x55f   :  { %6722 = vmatpush1.bf16.msra.mxu0 %v7864_v27  ;;  %6886 = vmatpush1.bf16.msra.mxu1 %v7866_v9  ;;  %v7923_v27 = vcombine.high %v3735_v37, %v3739_v31  ;;  %v3742_v9 = vld [vmem:[#allocation18 + $0x680] sm:$0xff] }
 0x560   :  { %6723 = vmatprep.subr.bf16.mxu0 %v7873_v28  ;;  %6887 = vmatprep.subr.bf16.mxu1 %v7875_v36  ;;  %v3746_v28 = vld [vmem:[#allocation18 + $0x6a0] sm:$0xff]  ;;  %v3743_v36 = vld [vmem:[#allocation18 + $0x688] sm:$0xff] }
 0x561   :  { %v7929_v48 = vcombine.high %v3742_v9, %v3746_v28  ;;  %v7928_v52 = vcombine.low %v3742_v9, %v3746_v28  ;;  %v7930_v53 = vcombine.low %v3743_v36, %v3747_v38 }
 0x563   :  { %6724 = vmatpush1.bf16.msra.mxu0 %v7872_v51  ;;  %6888 = vmatpush1.bf16.msra.mxu1 %v7874_v59  ;;  %v7931_v51 = vcombine.high %v3743_v36, %v3747_v38  ;;  %v3750_v59 = vld [vmem:[#allocation18 + $0x6c0] sm:$0xff] }
 0x564   :  { %6725 = vmatprep.subr.bf16.mxu0 %v7881_v61  ;;  %6889 = vmatprep.subr.bf16.mxu1 %v7883_v62  ;;  %v3754_v61 = vld [vmem:[#allocation18 + $0x6e0] sm:$0xff]  ;;  %v3751_v62 = vld [vmem:[#allocation18 + $0x6c8] sm:$0xff] }
 0x565   :  { %v7937_v54 = vcombine.high %v3750_v59, %v3754_v61  ;;  %v7936_v29 = vcombine.low %v3750_v59, %v3754_v61  ;;  %v7938_v2 = vcombine.low %v3751_v62, %v3755_v63  ;;  %v3786_v61 = vld [vmem:[#allocation18 + $0x7e0] sm:$0xff] }
 0x567   :  { %6726 = vmatpush1.bf16.msra.mxu0 %v7880_v55  ;;  %6890 = vmatpush1.bf16.msra.mxu1 %v7882_v60  ;;  %v7939_v55 = vcombine.high %v3751_v62, %v3755_v63  ;;  %v3758_v60 = vld [vmem:[#allocation18 + $0x700] sm:$0xff]  ;;  %v3783_v62 = vld [vmem:[#allocation18 + $0x7c8] sm:$0xff] }
 0x568   :  { %6727 = vmatprep.subr.bf16.mxu0 %v7889_v0  ;;  %6891 = vmatprep.subr.bf16.mxu1 %v7891_v25  ;;  %v3762_v0 = vld [vmem:[#allocation18 + $0x720] sm:$0xff]  ;;  %v3759_v25 = vld [vmem:[#allocation18 + $0x708] sm:$0xff] }
 0x569   :  { %v7945_v3 = vcombine.high %v3758_v60, %v3762_v0  ;;  %v7944_v58 = vcombine.low %v3758_v60, %v3762_v0  ;;  %v7946_v13 = vcombine.low %v3759_v25, %v3763_v24  ;;  %v3787_v63 = vld [vmem:[#allocation18 + $0x7e8] sm:$0xff] }
 0x56b   :  { %6728 = vmatpush1.bf16.msra.mxu0 %v7888_v4  ;;  %6892 = vmatpush1.bf16.msra.mxu1 %v7890_v7  ;;  %v7947_v4 = vcombine.high %v3759_v25, %v3763_v24  ;;  %v3766_v7 = vld [vmem:[#allocation18 + $0x740] sm:$0xff] }
 0x56c   :  { %6729 = vmatprep.subr.bf16.mxu0 %v7897_v8  ;;  %6893 = vmatprep.subr.bf16.mxu1 %v7899_v12  ;;  %v3770_v8 = vld [vmem:[#allocation18 + $0x760] sm:$0xff]  ;;  %v3767_v12 = vld [vmem:[#allocation18 + $0x748] sm:$0xff] }
 0x56d   :  { %v7955_v15 = vcombine.high %v3767_v12, %v3771_v57  ;;  %v7954_v28 = vcombine.low %v3767_v12, %v3771_v57  ;;  %v3480_v12 = vmul.f32 0.2, %v9233_v10  ;;  %v3791_v57 = vld [vmem:[#allocation18 + $0x808] sm:$0xff] }
 0x56f   :  { %6730 = vmatpush1.bf16.msra.mxu0 %v7896_v56  ;;  %6894 = vmatpush1.bf16.msra.mxu1 %v7898_v14 }
 0x570   :  { %6731 = vmatprep.subr.bf16.mxu0 %v7905_v39  ;;  %6895 = vmatprep.subr.bf16.mxu1 %v7907_v41  ;;  %v7953_v41 = vcombine.high %v3766_v7, %v3770_v8 }
 0x573   :  { %6732 = vmatpush1.bf16.msra.mxu0 %v7904_v5  ;;  %6896 = vmatpush1.bf16.msra.mxu1 %v7906_v1 }
 0x574   :  { %6733 = vmatprep.subr.bf16.mxu0 %v7913_v23  ;;  %6897 = vmatprep.subr.bf16.mxu1 %v7915_v26  ;;  %v3775_v26 = vld [vmem:[#allocation18 + $0x788] sm:$0xff] }
 0x575   :  { %v7962_v0 = vcombine.low %v3775_v26, %v3779_v34 }
 0x577   :  { %6734 = vmatpush1.bf16.msra.mxu0 %v7912_v45  ;;  %6898 = vmatpush1.bf16.msra.mxu1 %v7914_v43  ;;  %v7952_v43 = vcombine.low %v3766_v7, %v3770_v8 }
 0x578   :  { %6735 = vmatprep.subr.bf16.mxu0 %v7921_v44  ;;  %6899 = vmatprep.subr.bf16.mxu1 %v7923_v27 }
 0x57b   :  { %6736 = vmatpush1.bf16.msra.mxu0 %v7920_v33  ;;  %6900 = vmatpush1.bf16.msra.mxu1 %v7922_v47  ;;  %v7961_v33 = vcombine.high %v3774_v19, %v3778_v22  ;;  %v7963_v47 = vcombine.high %v3775_v26, %v3779_v34 }
 0x57c   :  { %6737 = vmatprep.subr.bf16.mxu0 %v7929_v48  ;;  %6901 = vmatprep.subr.bf16.mxu1 %v7931_v51  ;;  %v3782_v48 = vld [vmem:[#allocation18 + $0x7c0] sm:$0xff] }
 0x57f   :  { %6738 = vmatpush1.bf16.msra.mxu0 %v7928_v52  ;;  %6902 = vmatpush1.bf16.msra.mxu1 %v7930_v53 }
 0x580   :  { %6739 = vmatprep.subr.bf16.mxu0 %v7937_v54  ;;  %6903 = vmatprep.subr.bf16.mxu1 %v7939_v55  ;;  %v7960_v54 = vcombine.low %v3774_v19, %v3778_v22  ;;  %v7970_v22 = vcombine.low %v3783_v62, %v3787_v63 }
 0x583   :  { %6740 = vmatpush1.bf16.msra.mxu0 %v7936_v29  ;;  %6904 = vmatpush1.bf16.msra.mxu1 %v7938_v2  ;;  %v9253_v46 = vpop.f32.mrb[12].mxu0  ;;  %v7969_v29 = vcombine.high %v3782_v48, %v3786_v61  ;;  %v7971_v2 = vcombine.high %v3783_v62, %v3787_v63 }
 0x584   :  { %v3082_v56 = vrot.slane %v9253_v46, 4  ;;  %v9256_v14 = vpop.f32.mrb[12].mxu1  ;;  %6741 = vmatprep.subr.bf16.mxu0 %v7945_v3  ;;  %6905 = vmatprep.subr.bf16.mxu1 %v7947_v4  ;;  %v9258_v39 = vpop.f32.mrb[13].mxu0  ;;  %v3790_v3 = vld [vmem:[#allocation18 + $0x800] sm:$0xff] }
 0x585   :  { %v3094_v6 = vrot.slane %v9256_v14, 4  ;;  %v3088_v5 = vrot.slane %v9258_v39, 4  ;;  %v9262_v1 = vpop.f32.mrb[13].mxu1  ;;  %v2973_v23 = vpop.f32.mrb[14].mxu0  ;;  %v3794_v4 = vld [vmem:[#allocation18 + $0x820] sm:$0xff] }
 0x586   :  { %v3083_v35 = vadd.f32 %v3082_v56, %v9253_v46  ;;  %v3100_v37 = vrot.slane %v9262_v1, 4  ;;  %v3055_v31 = vpop.f32.mrb[14].mxu1  ;;  %v2974_v45 = vpop.f32.mrb[15].mxu0  ;;  %v7977_v34 = vcombine.high %v3790_v3, %v3794_v4 }
 0x587   :  { %v3095_v44 = vadd.f32 %v3094_v6, %v9256_v14  ;;  %v3089_v27 = vadd.f32 %v3088_v5, %v9258_v39  ;;  %6742 = vmatpush1.bf16.msra.mxu0 %v7944_v58  ;;  %6906 = vmatpush1.bf16.msra.mxu1 %v7946_v13  ;;  %v3056_v9 = vpop.f32.mrb[15].mxu1  ;;  %v3795_v58 = vld [vmem:[#allocation18 + $0x828] sm:$0xff]  ;;  %v3798_v6 = vld [vmem:[#allocation18 + $0x840] sm:$0xff] }
 0x588   :  { %v3084_v36 = vrot.slane %v3083_v35, 2  ;;  %v3101_v38 = vadd.f32 %v3100_v37, %v9262_v1  ;;  %6743 = vmatprep.subr.bf16.mxu0 %v7953_v41  ;;  %6907 = vmatprep.subr.bf16.mxu1 %v7955_v15  ;;  %v7968_v41 = vcombine.low %v3782_v48, %v3786_v61  ;;  %v3802_v5 = vld [vmem:[#allocation18 + $0x860] sm:$0xff]  ;;  %v3799_v37 = vld [vmem:[#allocation18 + $0x848] sm:$0xff] }
 0x589   :  { %v3096_v51 = vrot.slane %v3095_v44, 2  ;;  %v3090_v59 = vrot.slane %v3089_v27, 2  ;;  %v3803_v31 = vld [vmem:[#allocation18 + $0x868] sm:$0xff]  ;;  %v3806_v61 = vld [vmem:[#allocation18 + $0x880] sm:$0xff] }
 0x58a   :  { %v3085_v52 = vadd.f32 %v3084_v36, %v3083_v35  ;;  %v3102_v53 = vrot.slane %v3101_v38, 2  ;;  %v7979_v35 = vcombine.high %v3791_v57, %v3795_v58  ;;  %v7978_v36 = vcombine.low %v3791_v57, %v3795_v58  ;;  %v3818_v58 = vld [vmem:[#allocation18 + $0x8e0] sm:$0xff] }
 0x58b   :  { %v3097_v55 = vadd.f32 %v3096_v51, %v3095_v44  ;;  %v3091_v60 = vadd.f32 %v3090_v59, %v3089_v27  ;;  %6744 = vmatpush1.bf16.msra.mxu0 %v7952_v43  ;;  %6908 = vmatpush1.bf16.msra.mxu1 %v7954_v28  ;;  %v3488_v44 = vsel %vm3472_vm12, %v9233_v10, %v3480_v12 }
 0x58c   :  { %v3086_v25 = vrot.slane %v3085_v52, 1  ;;  %v3103_v24 = vadd.f32 %v3102_v53, %v3101_v38  ;;  %6745 = vmatprep.subr.bf16.mxu0 %v7961_v33  ;;  %6909 = vmatprep.subr.bf16.mxu1 %v7963_v47  ;;  %v7976_v27 = vcombine.low %v3790_v3, %v3794_v4  ;;  %v7985_v38 = vcombine.high %v3798_v6, %v3802_v5  ;;  %v3807_v53 = vld [vmem:[#allocation18 + $0x888] sm:$0xff] }
 0x58d   :  { %v3098_v7 = vrot.slane %v3097_v55, 1  ;;  %v3092_v8 = vrot.slane %v3091_v60, 1  ;;  %v7987_v48 = vcombine.high %v3799_v37, %v3803_v31  ;;  %v9290_v59 = vpack.c.bf16 %v3488_v44, %v3488_v44 }
 0x58e   :  { %v3087_v13 = vadd.f32 %v3086_v25, %v3085_v52  ;;  %v3104_v56 = vrot.slane %v3103_v24, 1  ;;  %v3810_v52 = vld [vmem:[#allocation18 + $0x8a0] sm:$0xff] }
 0x58f   :  { %v3099_v15 = vadd.f32 %v3098_v7, %v3097_v55  ;;  %v3093_v19 = vadd.f32 %v3092_v8, %v3091_v60  ;;  %6746 = vmatpush1.bf16.msra.mxu0 %v7960_v54  ;;  %6910 = vmatpush1.bf16.msra.mxu1 %v7962_v0  ;;  %v3811_v54 = vld [vmem:[#allocation18 + $0x8a8] sm:$0xff]  ;;  %v7993_v4 = vcombine.high %v3806_v61, %v3810_v52  ;;  %v3814_v8 = vld [vmem:[#allocation18 + $0x8c0] sm:$0xff] }
 0x590   :  { %v9271_v23 = vmul.f32 0.125, %v3087_v13  ;;  %v3105_v26 = vadd.f32 %v3104_v56, %v3103_v24  ;;  %6747 = vmatprep.subr.bf16.mxu0 %v7969_v29  ;;  %6911 = vmatprep.subr.bf16.mxu1 %v7971_v2  ;;  %v7984_v24 = vcombine.low %v3798_v6, %v3802_v5  ;;  %v7986_v29 = vcombine.low %v3799_v37, %v3803_v31  ;;  %v3815_v13 = vld [vmem:[#allocation18 + $0x8c8] sm:$0xff]  ;;  %v3822_v31 = vld [vmem:[#allocation18 + $0x900] sm:$0xff] }
 0x591   :  { %v9273_v45 = vmul.f32 0.125, %v3099_v15  ;;  %v9275_v43 = vmul.f32 0.125, %v3093_v19  ;;  %v7995_v7 = vcombine.high %v3807_v53, %v3811_v54  ;;  %v3819_v56 = vld [vmem:[#allocation18 + $0x8e8] sm:$0xff]  ;;  %v7992_v6 = vcombine.low %v3806_v61, %v3810_v52 }
 0x592   :  { %v3118_v9 = vsub.f32 %v9253_v46, %v9271_v23  ;;  %v9282_v28 = vmul.f32 0.125, %v3105_v26  ;;  %v7994_v5 = vcombine.low %v3807_v53, %v3811_v54  ;;  %v8003_v37 = vcombine.high %v3815_v13, %v3819_v56  ;;  %v3830_v54 = vld [vmem:[#allocation18 + $0x940] sm:$0xff] }
 0x593   :  { %v3120_v33 = vsub.f32 %v9256_v14, %v9273_v45  ;;  %v3119_v47 = vsub.f32 %v9258_v39, %v9275_v43  ;;  %6748 = vmatpush1.bf16.msra.mxu0 %v7968_v41  ;;  %6912 = vmatpush1.bf16.msra.mxu1 %v7970_v22  ;;  %v8002_v61 = vcombine.low %v3815_v13, %v3819_v56  ;;  %v3838_v56 = vld [vmem:[#allocation18 + $0x980] sm:$0xff] }
 0x594   :  { %v3126_v51 = vmul.f32 %v3118_v9, %v3118_v9  ;;  %v3121_v10 = vsub.f32 %v9262_v1, %v9282_v28  ;;  %6758 = vmatprep.subr.bf16.mxu0 %v7977_v34  ;;  %6922 = vmatprep.subr.bf16.mxu1 %v7979_v35  ;;  %v8001_v35 = vcombine.high %v3814_v8, %v3818_v58  ;;  %v3826_v9 = vld [vmem:[#allocation18 + $0x920] sm:$0xff] }
 0x595   :  { %v3128_v62 = vmul.f32 %v3120_v33, %v3120_v33  ;;  %v3127_v63 = vmul.f32 %v3119_v47, %v3119_v47  ;;  %v8009_v52 = vcombine.high %v3822_v31, %v3826_v9 }
 0x596   :  { %v3154_v55 = vrot.slane %v3126_v51, 4  ;;  %v3129_v60 = vmul.f32 %v3121_v10, %v3121_v10  ;;  %6750 = vmatmul.mubr.bf16.vlgmr.msra.gmra.mrb[16].mxu0 %v9290_v59  ;;  %6914 = vmatmul.mubr.bf16.vlgmr.msra.gmra.mrb[16].mxu1 %v9290_v59  ;;  %v8000_v10 = vcombine.low %v3814_v8, %v3818_v58 }
 0x597   :  { %v3166_v0 = vrot.slane %v3128_v62, 4  ;;  %v3160_v25 = vrot.slane %v3127_v63, 4  ;;  %6759 = vmatpush1.bf16.msra.mxu0 %v7976_v27  ;;  %6923 = vmatpush1.bf16.msra.mxu1 %v7978_v36  ;;  %v3823_v36 = vld [vmem:[#allocation18 + $0x908] sm:$0xff] }
 0x598   :  { %v3155_v2 = vadd.f32 %v3154_v55, %v3126_v51  ;;  %v3172_v3 = vrot.slane %v3129_v60, 4  ;;  %6760 = vmatprep.subr.bf16.mxu0 %v7985_v38  ;;  %6924 = vmatprep.subr.bf16.mxu1 %v7987_v48  ;;  %v3827_v38 = vld [vmem:[#allocation18 + $0x928] sm:$0xff] }
 0x599   :  { %v3167_v12 = vadd.f32 %v3166_v0, %v3128_v62  ;;  %v3161_v57 = vadd.f32 %v3160_v25, %v3127_v63  ;;  %v8011_v53 = vcombine.high %v3823_v36, %v3827_v38  ;;  %v3834_v0 = vld [vmem:[#allocation18 + $0x960] sm:$0xff]  ;;  %v3831_v25 = vld [vmem:[#allocation18 + $0x948] sm:$0xff]  ;;  %v8010_v8 = vcombine.low %v3823_v36, %v3827_v38 }
 0x59a   :  { %v3156_v41 = vrot.slane %v3155_v2, 2  ;;  %v3173_v15 = vadd.f32 %v3172_v3, %v3129_v60  ;;  %v8017_v58 = vcombine.high %v3830_v54, %v3834_v0 }
 0x59b   :  { %v3168_v19 = vrot.slane %v3167_v12, 2  ;;  %v3162_v22 = vrot.slane %v3161_v57, 2  ;;  %6761 = vmatpush1.bf16.msra.mxu0 %v7984_v24  ;;  %6925 = vmatpush1.bf16.msra.mxu1 %v7986_v29  ;;  %v3835_v24 = vld [vmem:[#allocation18 + $0x968] sm:$0xff] }
 0x59c   :  { %v3157_v26 = vadd.f32 %v3156_v41, %v3155_v2  ;;  %v3174_v34 = vrot.slane %v3173_v15, 2  ;;  %6762 = vmatprep.subr.bf16.mxu0 %v7993_v4  ;;  %6926 = vmatprep.subr.bf16.mxu1 %v7995_v7  ;;  %v8008_v7 = vcombine.low %v3822_v31, %v3826_v9  ;;  %v8019_v13 = vcombine.high %v3831_v25, %v3835_v24  ;;  %v3842_v41 = vld [vmem:[#allocation18 + $0x9a0] sm:$0xff]  ;;  %v3851_v9 = vld [vmem:[#allocation18 + $0x9e8] sm:$0xff] }
 0x59d   :  { %v3169_v44 = vadd.f32 %v3168_v19, %v3167_v12  ;;  %v3163_v27 = vadd.f32 %v3162_v22, %v3161_v57  ;;  %v3839_v22 = vld [vmem:[#allocation18 + $0x988] sm:$0xff]  ;;  %v3846_v31 = vld [vmem:[#allocation18 + $0x9c0] sm:$0xff]  ;;  %v8024_v36 = vcombine.low %v3838_v56, %v3842_v41 }
 0x59e   :  { %v3158_v33 = vrot.slane %v3157_v26, 1  ;;  %v3175_v47 = vadd.f32 %v3174_v34, %v3173_v15  ;;  %v8018_v34 = vcombine.low %v3831_v25, %v3835_v24  ;;  %v3863_v25 = vld [vmem:[#allocation18 + $0xa48] sm:$0xff] }
 0x59f   :  { %v3170_v48 = vrot.slane %v3169_v44, 1  ;;  %v3164_v51 = vrot.slane %v3163_v27, 1  ;;  %6763 = vmatpush1.bf16.msra.mxu0 %v7992_v6  ;;  %6927 = vmatpush1.bf16.msra.mxu1 %v7994_v5  ;;  %v3843_v6 = vld [vmem:[#allocation18 + $0x9a8] sm:$0xff] }
 0x5a0   :  { %v3159_v62 = vadd.f32 %v3158_v33, %v3157_v26  ;;  %v3176_v63 = vrot.slane %v3175_v47, 1  ;;  %6764 = vmatprep.subr.bf16.mxu0 %v8001_v35  ;;  %6928 = vmatprep.subr.bf16.mxu1 %v8003_v37  ;;  %v8016_v26 = vcombine.low %v3830_v54, %v3834_v0  ;;  %v8025_v35 = vcombine.high %v3838_v56, %v3842_v41  ;;  %v3866_v0 = vld [vmem:[#allocation18 + $0xa60] sm:$0xff]  ;;  %v3867_v24 = vld [vmem:[#allocation18 + $0xa68] sm:$0xff] }
 0x5a1   :  { %v3171_v55 = vadd.f32 %v3170_v48, %v3169_v44  ;;  %v3165_v60 = vadd.f32 %v3164_v51, %v3163_v27  ;;  %v8027_v37 = vcombine.high %v3839_v22, %v3843_v6  ;;  %v3850_v44 = vld [vmem:[#allocation18 + $0x9e0] sm:$0xff]  ;;  %v3847_v27 = vld [vmem:[#allocation18 + $0x9c8] sm:$0xff]  ;;  %v8026_v38 = vcombine.low %v3839_v22, %v3843_v6  ;;  %v9296_v22 = vld [vmem:[#allocation17 + $0x8] sm:$0xff] }
 0x5a2   :  { %v3182_v29 = vmul.f32 0.125, %v3159_v62  ;;  %v3177_v2 = vadd.f32 %v3176_v63, %v3175_v47  ;;  %v8033_v33 = vcombine.high %v3846_v31, %v3850_v44  ;;  %v8035_v47 = vcombine.high %v3847_v27, %v3851_v9  ;;  %v3854_v48 = vld [vmem:[#allocation18 + $0xa00] sm:$0xff] }
 0x5a3   :  { %v3184_v3 = vmul.f32 0.125, %v3171_v55  ;;  %v3183_v4 = vmul.f32 0.125, %v3165_v60  ;;  %6765 = vmatpush1.bf16.msra.mxu0 %v8000_v10  ;;  %6929 = vmatpush1.bf16.msra.mxu1 %v8002_v61  ;;  %v3858_v51 = vld [vmem:[#allocation18 + $0xa20] sm:$0xff]  ;;  %v3855_v10 = vld [vmem:[#allocation18 + $0xa08] sm:$0xff]  ;;  %v8032_v62 = vcombine.low %v3846_v31, %v3850_v44  ;;  %v8034_v63 = vcombine.low %v3847_v27, %v3851_v9 }
 0x5a4   :  { %v3192_v12 = vadd.f32 0.8, %v3182_v29  ;;  %v3185_v57 = vmul.f32 0.125, %v3177_v2  ;;  %6766 = vmatprep.subr.bf16.mxu0 %v8009_v52  ;;  %6930 = vmatprep.subr.bf16.mxu1 %v8011_v53  ;;  %v3859_v61 = vld [vmem:[#allocation18 + $0xa28] sm:$0xff]  ;;  %v8041_v53 = vcombine.high %v3854_v48, %v3858_v51  ;;  %v3862_v55 = vld [vmem:[#allocation18 + $0xa40] sm:$0xff] }
 0x5a5   :  { %v3194_v15 = vadd.f32 0.8, %v3184_v3  ;;  %v3193_v19 = vadd.f32 0.8, %v3183_v4  ;;  %v8043_v54 = vcombine.high %v3855_v10, %v3859_v61  ;;  %v8040_v4 = vcombine.low %v3854_v48, %v3858_v51  ;;  %v3874_v56 = vld [vmem:[#allocation18 + $0xaa0] sm:$0xff]  ;;  %v3879_v31 = vld [vmem:[#allocation18 + $0xac8] sm:$0xff] }
 0x5a6   :  { %8493 = vrsqrt.f32 %v3192_v12  ;;  %v3195_v5 = vadd.f32 0.8, %v3185_v57  ;;  %v8049_v12 = vcombine.high %v3862_v55, %v3866_v0  ;;  %v8051_v57 = vcombine.high %v3863_v25, %v3867_v24  ;;  %v3883_v44 = vld [vmem:[#allocation18 + $0xae8] sm:$0xff]  ;;  %v3886_v9 = vld [vmem:[#allocation18 + $0xb00] sm:$0xff] }
 0x5a7   :  { %8495 = vrsqrt.f32 %v3194_v15  ;;  %6767 = vmatpush1.bf16.msra.mxu0 %v8008_v7  ;;  %6931 = vmatpush1.bf16.msra.mxu1 %v8010_v8  ;;  %v8042_v7 = vcombine.low %v3855_v10, %v3859_v61  ;;  %v3871_v15 = vld [vmem:[#allocation18 + $0xa88] sm:$0xff]  ;;  %v8048_v6 = vcombine.low %v3862_v55, %v3866_v0  ;;  %v8067_v61 = vcombine.high %v3879_v31, %v3883_v44 }
 0x5a8   :  { %8497 = vrsqrt.f32 %v3193_v19  ;;  %6768 = vmatprep.subr.bf16.mxu0 %v8017_v58  ;;  %6932 = vmatprep.subr.bf16.mxu1 %v8019_v13  ;;  %v3870_v13 = vld [vmem:[#allocation18 + $0xa80] sm:$0xff]  ;;  %v3875_v19 = vld [vmem:[#allocation18 + $0xaa8] sm:$0xff]  ;;  %v8066_v55 = vcombine.low %v3879_v31, %v3883_v44 }
 0x5a9   :  { %8499 = vrsqrt.f32 %v3195_v5  ;;  %v8050_v5 = vcombine.low %v3863_v25, %v3867_v24  ;;  %v8059_v27 = vcombine.high %v3871_v15, %v3875_v19  ;;  %v3891_v48 = vld [vmem:[#allocation18 + $0xb28] sm:$0xff]  ;;  %v8058_v51 = vcombine.low %v3871_v15, %v3875_v19 }
 0x5aa   :  { %v3907_v31 = vld [vmem:[#allocation18 + $0xba8] sm:$0xff] }
 0x5ab   :  { %6769 = vmatpush1.bf16.msra.mxu0 %v8016_v26  ;;  %6933 = vmatpush1.bf16.msra.mxu1 %v8018_v34  ;;  %v3878_v26 = vld [vmem:[#allocation18 + $0xac0] sm:$0xff] }
 0x5ac   :  { %6770 = vmatprep.subr.bf16.mxu0 %v8025_v35  ;;  %6934 = vmatprep.subr.bf16.mxu1 %v8027_v37  ;;  %v8057_v35 = vcombine.high %v3870_v13, %v3874_v56  ;;  %v3882_v37 = vld [vmem:[#allocation18 + $0xae0] sm:$0xff] }
 0x5ad   :  { %v8065_v10 = vcombine.high %v3878_v26, %v3882_v37 }
 0x5af   :  { %6771 = vmatpush1.bf16.msra.mxu0 %v8024_v36  ;;  %6935 = vmatpush1.bf16.msra.mxu1 %v8026_v38  ;;  %v8056_v38 = vcombine.low %v3870_v13, %v3874_v56 }
 0x5b0   :  { %v8494_v52 = vpop.eup %8493  ;;  %6772 = vmatprep.subr.bf16.mxu0 %v8033_v33  ;;  %6936 = vmatprep.subr.bf16.mxu1 %v8035_v47  ;;  %v3890_v33 = vld [vmem:[#allocation18 + $0xb20] sm:$0xff]  ;;  %v3887_v47 = vld [vmem:[#allocation18 + $0xb08] sm:$0xff] }
 0x5b1   :  { %v8496_v60 = vpop.eup %8495  ;;  %v8075_v0 = vcombine.high %v3887_v47, %v3891_v48 }
 0x5b2   :  { %v8498_v29 = vpop.eup %8497 }
 0x5b3   :  { %v8500_v2 = vpop.eup %8499  ;;  %v3229_v3 = vcombine.low %v8494_v52, %v8498_v29  ;;  %6773 = vmatpush1.bf16.msra.mxu0 %v8032_v62  ;;  %6937 = vmatpush1.bf16.msra.mxu1 %v8034_v63 }
 0x5b4   :  { %v3230_v8 = vcombine.low %v8496_v60, %v8500_v2  ;;  %6774 = vmatprep.subr.bf16.mxu0 %v8041_v53  ;;  %6938 = vmatprep.subr.bf16.mxu1 %v8043_v54  ;;  %v8064_v54 = vcombine.low %v3878_v26, %v3882_v37  ;;  %v8073_v60 = vcombine.high %v3886_v9, %v3890_v33  ;;  %v3906_v37 = vld [vmem:[#allocation18 + $0xba0] sm:$0xff] }
 0x5b5   :  { %v3237_v58 = vrot.slane %v3229_v3, %v9014_v11 }
 0x5b6   :  { %v3244_v41 = vrot.slane %v3230_v8, %v9014_v11 }
 0x5b7   :  { %6775 = vmatpush1.bf16.msra.mxu0 %v8040_v4  ;;  %6939 = vmatpush1.bf16.msra.mxu1 %v8042_v7 }
 0x5b8   :  { %v3245_v34 = vcombine.low %v3237_v58, %v3244_v41  ;;  %6776 = vmatprep.subr.bf16.mxu0 %v8049_v12  ;;  %6940 = vmatprep.subr.bf16.mxu1 %v8051_v57  ;;  %v3894_v57 = vld [vmem:[#allocation18 + $0xb40] sm:$0xff]  ;;  %v3895_v58 = vld [vmem:[#allocation18 + $0xb48] sm:$0xff] }
 0x5ba   :  { %v3249_v36 = vmul.f32 %v3245_v34, %v9296_v22 }
 0x5bb   :  { %6777 = vmatpush1.bf16.msra.mxu0 %v8048_v6  ;;  %6941 = vmatpush1.bf16.msra.mxu1 %v8050_v5  ;;  %v8072_v6 = vcombine.low %v3886_v9, %v3890_v33  ;;  %v8074_v5 = vcombine.low %v3887_v47, %v3891_v48  ;;  %v3911_v33 = vld [vmem:[#allocation18 + $0xbc8] sm:$0xff] }
 0x5bc   :  { %v3271_v62 = vrot.slane %v3249_v36, %v9018_v16  ;;  %v3275_v63 = vrot.slane %v3249_v36, %v9021_v17  ;;  %v3279_v52 = vrot.slane %v3249_v36, %v9089_v49  ;;  %v3283_v53 = vrot.slane %v3249_v36, %v9092_v50  ;;  %6778 = vmatprep.subr.bf16.mxu0 %v8057_v35  ;;  %v3902_v35 = vld [vmem:[#allocation18 + $0xb80] sm:$0xff]  ;;  %v3915_v47 = vld [vmem:[#allocation18 + $0xbe8] sm:$0xff] }
 0x5bd   :  { %6942 = vmatprep.subr.bf16.mxu1 %v8059_v27  ;;  %v3910_v27 = vld [vmem:[#allocation18 + $0xbc0] sm:$0xff]  ;;  %v8089_v9 = vcombine.high %v3902_v35, %v3906_v37  ;;  %v8088_v48 = vcombine.low %v3902_v35, %v3906_v37 }
 0x5be   :  { %v3296_v25 = vmul.f32 %v3271_v62, %v9271_v23  ;;  %v3297_v24 = vmul.f32 %v3275_v63, %v9275_v43  ;;  %v3298_v29 = vmul.f32 %v3279_v52, %v9273_v45  ;;  %v3299_v2 = vmul.f32 %v3283_v53, %v9282_v28  ;;  %v3898_v45 = vld [vmem:[#allocation18 + $0xb60] sm:$0xff]  ;;  %v3899_v28 = vld [vmem:[#allocation18 + $0xb68] sm:$0xff] }
 0x5bf   :  { %v3379_v3 = vrot.slane %v3283_v53, %v9018_v16  ;;  %6779 = vmatpush1.bf16.msra.mxu0 %v8056_v38  ;;  %6943 = vmatpush1.bf16.msra.mxu1 %v8058_v51  ;;  %v3371_v4 = vrot.slane %v3275_v63, %v9018_v16  ;;  %v3367_v7 = vrot.slane %v3271_v62, %v9018_v16  ;;  %v3914_v38 = vld [vmem:[#allocation18 + $0xbe0] sm:$0xff] }
 0x5c0   :  { %v3325_v8 = vcombine.low %v3296_v25, %v3297_v24  ;;  %v3326_v12 = vcombine.low %v3298_v29, %v3299_v2  ;;  %6780 = vmatprep.subr.bf16.mxu0 %v8065_v10  ;;  %6944 = vmatprep.subr.bf16.mxu1 %v8067_v61  ;;  %v3375_v23 = vrot.slane %v3279_v52, %v9018_v16  ;;  %v3918_v53 = vld [vmem:[#allocation18 + $0xc00] sm:$0xff]  ;;  %v3923_v25 = vld [vmem:[#allocation18 + $0xc28] sm:$0xff] }
 0x5c1   :  { %v3387_v43 = vmul.f32 %v3379_v3, %v9262_v1  ;;  %v3385_v13 = vmul.f32 %v3371_v4, %v9258_v39  ;;  %v3384_v56 = vmul.f32 %v3367_v7, %v9253_v46  ;;  %v8081_v1 = vcombine.high %v3894_v57, %v3898_v45  ;;  %v3903_v39 = vld [vmem:[#allocation18 + $0xb88] sm:$0xff]  ;;  %v3934_v35 = vld [vmem:[#allocation18 + $0xc80] sm:$0xff] }
 0x5c2   :  { %v3333_v41 = vrot.slane %v3325_v8, %v9014_v11  ;;  %v3340_v15 = vrot.slane %v3326_v12, %v9014_v11  ;;  %v3386_v19 = vmul.f32 %v3375_v23, %v9256_v14  ;;  %v8083_v34 = vcombine.high %v3895_v58, %v3899_v28 }
 0x5c3   :  { %6781 = vmatpush1.bf16.msra.mxu0 %v8064_v54  ;;  %6945 = vmatpush1.bf16.msra.mxu1 %v8066_v55  ;;  %v8080_v44 = vcombine.low %v3894_v57, %v3898_v45  ;;  %v8082_v11 = vcombine.low %v3895_v58, %v3899_v28  ;;  %v8091_v36 = vcombine.high %v3903_v39, %v3907_v31 }
 0x5c4   :  { %v3341_v26 = vcombine.low %v3333_v41, %v3340_v15  ;;  %6782 = vmatprep.subr.bf16.mxu0 %v8073_v60  ;;  %6946 = vmatprep.subr.bf16.mxu1 %v8075_v0  ;;  %v8090_v63 = vcombine.low %v3903_v39, %v3907_v31  ;;  %v8099_v52 = vcombine.high %v3911_v33, %v3915_v47  ;;  %v3922_v60 = vld [vmem:[#allocation18 + $0xc20] sm:$0xff]  ;;  %v3919_v0 = vld [vmem:[#allocation18 + $0xc08] sm:$0xff] }
 0x5c5   :  { %v8096_v29 = vcombine.low %v3910_v27, %v3914_v38  ;;  %v8098_v4 = vcombine.low %v3911_v33, %v3915_v47  ;;  %v8105_v12 = vcombine.high %v3918_v53, %v3922_v60  ;;  %v8107_v57 = vcombine.high %v3919_v0, %v3923_v25  ;;  %v3926_v41 = vld [vmem:[#allocation18 + $0xc40] sm:$0xff]  ;;  %v3943_v47 = vld [vmem:[#allocation18 + $0xcc8] sm:$0xff] }
 0x5c6   :  { %v3343_v46 = vrot.slane %v3341_v26, 7  ;;  %v3931_v26 = vld [vmem:[#allocation18 + $0xc68] sm:$0xff]  ;;  %v3938_v31 = vld [vmem:[#allocation18 + $0xca0] sm:$0xff] }
 0x5c7   :  { %6783 = vmatpush1.bf16.msra.mxu0 %v8072_v6  ;;  %6947 = vmatpush1.bf16.msra.mxu1 %v8074_v5  ;;  %v8106_v6 = vcombine.low %v3919_v0, %v3923_v25  ;;  %v3927_v5 = vld [vmem:[#allocation18 + $0xc48] sm:$0xff]  ;;  %v3946_v33 = vld [vmem:[#allocation18 + $0xce0] sm:$0xff] }
 0x5c8   :  { %v3347_v14 = vsub.f32 %v9296_v22, %v3343_v46  ;;  %6784 = vmatprep.subr.bf16.mxu0 %v8081_v1  ;;  %6948 = vmatprep.subr.bf16.mxu1 %v8083_v34  ;;  %v8097_v22 = vcombine.high %v3910_v27, %v3914_v38  ;;  %v8115_v39 = vcombine.high %v3927_v5, %v3931_v26  ;;  %v3935_v46 = vld [vmem:[#allocation18 + $0xc88] sm:$0xff]  ;;  %v3942_v38 = vld [vmem:[#allocation18 + $0xcc0] sm:$0xff] }
 0x5c9   :  { %v3958_v25 = vld [vmem:[#allocation18 + $0xd40] sm:$0xff] }
 0x5ca   :  { %v3421_v51 = vrot.slane %v3347_v14, %v9113_v20  ;;  %v3413_v10 = vrot.slane %v3347_v14, %v9032_v32  ;;  %v3409_v61 = vrot.slane %v3347_v14, %v9029_v30  ;;  %v3417_v62 = vrot.slane %v3347_v14, %v9116_v21 }
 0x5cb   :  { %6785 = vmatpush1.bf16.msra.mxu0 %v8080_v44  ;;  %6949 = vmatpush1.bf16.msra.mxu1 %v8082_v11  ;;  %v3939_v44 = vld [vmem:[#allocation18 + $0xca8] sm:$0xff]  ;;  %v8114_v14 = vcombine.low %v3927_v5, %v3931_v26 }
 0x5cc   :  { %v3461_v54 = vrot.slane %v3421_v51, %v9029_v30  ;;  %6786 = vmatprep.subr.bf16.mxu0 %v8089_v9  ;;  %6950 = vmatprep.subr.bf16.mxu1 %v8091_v36  ;;  %v3453_v55 = vrot.slane %v3413_v10, %v9029_v30  ;;  %v3449_v24 = vrot.slane %v3409_v61, %v9029_v30  ;;  %v3979_v5 = vld [vmem:[#allocation18 + $0xde8] sm:$0xff] }
 0x5cd   :  { %v3457_v2 = vrot.slane %v3417_v62, %v9029_v30  ;;  %v8121_v9 = vcombine.high %v3934_v35, %v3938_v31  ;;  %v8123_v36 = vcombine.high %v3935_v46, %v3939_v44  ;;  %v8120_v51 = vcombine.low %v3934_v35, %v3938_v31  ;;  %v3986_v31 = vld [vmem:[#allocation18 + $0xe20] sm:$0xff] }
 0x5ce   :  { %v3469_v3 = vadd.f32 %v3461_v54, %v3387_v43  ;;  %v3467_v7 = vadd.f32 %v3453_v55, %v3385_v13  ;;  %v3466_v8 = vadd.f32 %v3449_v24, %v3384_v56  ;;  %v8104_v43 = vcombine.low %v3918_v53, %v3922_v60  ;;  %v3930_v56 = vld [vmem:[#allocation18 + $0xc60] sm:$0xff]  ;;  %v3955_v53 = vld [vmem:[#allocation18 + $0xd28] sm:$0xff] }
 0x5cf   :  { %6787 = vmatpush1.bf16.msra.mxu0 %v8088_v48  ;;  %6951 = vmatpush1.bf16.msra.mxu1 %v8090_v63  ;;  %v9326_v23 = vadd.f32 %v3457_v2, %v3386_v19  ;;  %v8113_v37 = vcombine.high %v3926_v41, %v3930_v56  ;;  %v8112_v27 = vcombine.low %v3926_v41, %v3930_v56  ;;  %v3947_v48 = vld [vmem:[#allocation18 + $0xce8] sm:$0xff]  ;;  %v3950_v63 = vld [vmem:[#allocation18 + $0xd00] sm:$0xff] }
 0x5d0   :  { %6788 = vmatprep.subr.bf16.mxu0 %v8097_v22  ;;  %6952 = vmatprep.subr.bf16.mxu1 %v8099_v52  ;;  %vm3475_vm13 = vcmp.gt.f32.partialorder %v3467_v7, 0.0  ;;  %v3483_v45 = vmul.f32 0.2, %v3467_v7  ;;  %vm3474_vm14 = vcmp.gt.f32.partialorder %v3466_v8, 0.0  ;;  %v3482_v58 = vmul.f32 0.2, %v3466_v8 }
 0x5d1   :  { %vm3477_vm15 = vcmp.gt.f32.partialorder %v3469_v3, 0.0  ;;  %v3485_v28 = vmul.f32 0.2, %v3469_v3  ;;  %v8122_v10 = vcombine.low %v3935_v46, %v3939_v44  ;;  %v8129_v61 = vcombine.high %v3942_v38, %v3946_v33  ;;  %v3954_v22 = vld [vmem:[#allocation18 + $0xd20] sm:$0xff]  ;;  %v3951_v52 = vld [vmem:[#allocation18 + $0xd08] sm:$0xff] }
 0x5d2   :  { %v3491_v15 = vsel %vm3475_vm13, %v3467_v7, %v3483_v45  ;;  %v3490_v13 = vsel %vm3474_vm14, %v3466_v8, %v3482_v58  ;;  %v8131_v62 = vcombine.high %v3943_v47, %v3947_v48  ;;  %v8128_v54 = vcombine.low %v3942_v38, %v3946_v33  ;;  %v3962_v24 = vld [vmem:[#allocation18 + $0xd60] sm:$0xff]  ;;  %v3963_v2 = vld [vmem:[#allocation18 + $0xd68] sm:$0xff] }
 0x5d3   :  { %6789 = vmatpush1.bf16.msra.mxu0 %v8096_v29  ;;  %6953 = vmatpush1.bf16.msra.mxu1 %v8098_v4  ;;  %v9328_v19 = vpack.c.bf16 %v3491_v15, %v3491_v15  ;;  %v9330_v1 = vpack.c.bf16 %v3490_v13, %v3490_v13  ;;  %v3493_v34 = vsel %vm3477_vm15, %v3469_v3, %v3485_v28  ;;  %v3959_v29 = vld [vmem:[#allocation18 + $0xd48] sm:$0xff]  ;;  %v3978_v13 = vld [vmem:[#allocation18 + $0xde0] sm:$0xff]  ;;  %vm3476_vm0 = vcmp.gt.f32.partialorder %v9326_v23, 0.0 }
 0x5d4   :  { %6799 = vmatprep.subr.bf16.mxu0 %v8105_v12  ;;  %6963 = vmatprep.subr.bf16.mxu1 %v8107_v57  ;;  %v9336_v11 = vpack.c.bf16 %v3493_v34, %v3493_v34  ;;  %v8130_v55 = vcombine.low %v3943_v47, %v3947_v48  ;;  %v8137_v60 = vcombine.high %v3950_v63, %v3954_v22  ;;  %v3966_v12 = vld [vmem:[#allocation18 + $0xd80] sm:$0xff]  ;;  %v3967_v45 = vld [vmem:[#allocation18 + $0xd88] sm:$0xff] }
 0x5d5   :  { %6790 = vmatprep.mubr.bf16.mxu0 %v9328_v19  ;;  %6954 = vmatprep.mubr.bf16.mxu1 %v9328_v19  ;;  %v8139_v0 = vcombine.high %v3951_v52, %v3955_v53  ;;  %v8136_v3 = vcombine.low %v3950_v63, %v3954_v22  ;;  %v8138_v4 = vcombine.low %v3951_v52, %v3955_v53  ;;  %v3970_v57 = vld [vmem:[#allocation18 + $0xda0] sm:$0xff]  ;;  %v3971_v58 = vld [vmem:[#allocation18 + $0xda8] sm:$0xff] }
 0x5d6   :  { %6791 = vmatmul.mubr.bf16.vlgmr.msra.gmra.mrb[16].mxu0 %v9330_v1  ;;  %6955 = vmatmul.mubr.bf16.vlgmr.msra.gmra.mrb[16].mxu1 %v9330_v1  ;;  %v8145_v7 = vcombine.high %v3958_v25, %v3962_v24  ;;  %v8147_v8 = vcombine.high %v3959_v29, %v3963_v2  ;;  %v8144_v28 = vcombine.low %v3958_v25, %v3962_v24  ;;  %v3975_v56 = vld [vmem:[#allocation18 + $0xdc8] sm:$0xff]  ;;  %v3990_v38 = vld [vmem:[#allocation18 + $0xe40] sm:$0xff] }
 0x5d7   :  { %6800 = vmatpush1.bf16.msra.mxu0 %v8104_v43  ;;  %6964 = vmatpush1.bf16.msra.mxu1 %v8106_v6  ;;  %v8146_v41 = vcombine.low %v3959_v29, %v3963_v2  ;;  %v8153_v15 = vcombine.high %v3966_v12, %v3970_v57  ;;  %v8155_v43 = vcombine.high %v3967_v45, %v3971_v58  ;;  %v3974_v6 = vld [vmem:[#allocation18 + $0xdc0] sm:$0xff]  ;;  %v3983_v46 = vld [vmem:[#allocation18 + $0xe08] sm:$0xff] }
 0x5d8   :  { %6831 = vmatprep.mubr.bf16.mxu0 %v9336_v11  ;;  %6995 = vmatprep.mubr.bf16.mxu1 %v9336_v11  ;;  %v8152_v26 = vcombine.low %v3966_v12, %v3970_v57  ;;  %v8154_v34 = vcombine.low %v3967_v45, %v3971_v58  ;;  %v8161_v35 = vcombine.high %v3974_v6, %v3978_v13  ;;  %v3987_v44 = vld [vmem:[#allocation18 + $0xe28] sm:$0xff]  ;;  %v3994_v33 = vld [vmem:[#allocation18 + $0xe60] sm:$0xff] }
 0x5d9   :  { %6801 = vmatprep.subr.bf16.mxu0 %v8113_v37  ;;  %6965 = vmatprep.subr.bf16.mxu1 %v8115_v39  ;;  %v8163_v37 = vcombine.high %v3975_v56, %v3979_v5  ;;  %v3982_v39 = vld [vmem:[#allocation18 + $0xe00] sm:$0xff]  ;;  %v3991_v47 = vld [vmem:[#allocation18 + $0xe48] sm:$0xff] }
 0x5da   :  { %v3995_v48 = vld [vmem:[#allocation18 + $0xe68] sm:$0xff]  ;;  %v3998_v63 = vld [vmem:[#allocation18 + $0xe80] sm:$0xff] }
 0x5db   :  { %6802 = vmatpush1.bf16.msra.mxu0 %v8112_v27  ;;  %6966 = vmatpush1.bf16.msra.mxu1 %v8114_v14  ;;  %v8160_v27 = vcombine.low %v3974_v6, %v3978_v13  ;;  %v8162_v14 = vcombine.low %v3975_v56, %v3979_v5  ;;  %v4002_v22 = vld [vmem:[#allocation18 + $0xea0] sm:$0xff]  ;;  %v3999_v52 = vld [vmem:[#allocation18 + $0xe88] sm:$0xff] }
 0x5dc   :  { %6803 = vmatprep.subr.bf16.mxu0 %v8121_v9  ;;  %6967 = vmatprep.subr.bf16.mxu1 %v8123_v36  ;;  %v8169_v9 = vcombine.high %v3982_v39, %v3986_v31  ;;  %v8171_v36 = vcombine.high %v3983_v46, %v3987_v44  ;;  %v4003_v53 = vld [vmem:[#allocation18 + $0xea8] sm:$0xff]  ;;  %v4006_v25 = vld [vmem:[#allocation18 + $0xec0] sm:$0xff] }
 0x5dd   :  { %v4010_v24 = vld [vmem:[#allocation18 + $0xee0] sm:$0xff]  ;;  %v4007_v29 = vld [vmem:[#allocation18 + $0xec8] sm:$0xff] }
 0x5de   :  { %v4011_v2 = vld [vmem:[#allocation18 + $0xee8] sm:$0xff]  ;;  %v4014_v12 = vld [vmem:[#allocation18 + $0xf00] sm:$0xff] }
 0x5df   :  { %6804 = vmatpush1.bf16.msra.mxu0 %v8120_v51  ;;  %6968 = vmatpush1.bf16.msra.mxu1 %v8122_v10  ;;  %v8168_v51 = vcombine.low %v3982_v39, %v3986_v31  ;;  %v8170_v10 = vcombine.low %v3983_v46, %v3987_v44  ;;  %v4018_v57 = vld [vmem:[#allocation18 + $0xf20] sm:$0xff]  ;;  %v4015_v45 = vld [vmem:[#allocation18 + $0xf08] sm:$0xff] }
 0x5e0   :  { %6805 = vmatprep.subr.bf16.mxu0 %v8129_v61  ;;  %6969 = vmatprep.subr.bf16.mxu1 %v8131_v62  ;;  %v8177_v61 = vcombine.high %v3990_v38, %v3994_v33  ;;  %v8179_v62 = vcombine.high %v3991_v47, %v3995_v48  ;;  %v4019_v58 = vld [vmem:[#allocation18 + $0xf28] sm:$0xff]  ;;  %v4022_v6 = vld [vmem:[#allocation18 + $0xf40] sm:$0xff] }
 0x5e1   :  { %v4026_v13 = vld [vmem:[#allocation18 + $0xf60] sm:$0xff]  ;;  %v4023_v56 = vld [vmem:[#allocation18 + $0xf48] sm:$0xff] }
 0x5e2   :  { %v4027_v5 = vld [vmem:[#allocation18 + $0xf68] sm:$0xff]  ;;  %v4030_v39 = vld [vmem:[#allocation18 + $0xf80] sm:$0xff] }
 0x5e3   :  { %6806 = vmatpush1.bf16.msra.mxu0 %v8128_v54  ;;  %6970 = vmatpush1.bf16.msra.mxu1 %v8130_v55  ;;  %v8176_v54 = vcombine.low %v3990_v38, %v3994_v33  ;;  %v8178_v55 = vcombine.low %v3991_v47, %v3995_v48  ;;  %v4034_v31 = vld [vmem:[#allocation18 + $0xfa0] sm:$0xff]  ;;  %v4031_v46 = vld [vmem:[#allocation18 + $0xf88] sm:$0xff] }
 0x5e4   :  { %6807 = vmatprep.subr.bf16.mxu0 %v8137_v60  ;;  %6971 = vmatprep.subr.bf16.mxu1 %v8139_v0  ;;  %v8185_v60 = vcombine.high %v3998_v63, %v4002_v22  ;;  %v8187_v0 = vcombine.high %v3999_v52, %v4003_v53  ;;  %v4035_v44 = vld [vmem:[#allocation18 + $0xfa8] sm:$0xff]  ;;  %v4038_v38 = vld [vmem:[#allocation18 + $0xfc0] sm:$0xff] }
 0x5e5   :  { %v4042_v33 = vld [vmem:[#allocation18 + $0xfe0] sm:$0xff]  ;;  %v4039_v47 = vld [vmem:[#allocation18 + $0xfc8] sm:$0xff] }
 0x5e6   :  { %v4043_v48 = vld [vmem:[#allocation18 + $0xfe8] sm:$0xff] }
 0x5e7   :  { %6808 = vmatpush1.bf16.msra.mxu0 %v8136_v3  ;;  %6972 = vmatpush1.bf16.msra.mxu1 %v8138_v4  ;;  %v8184_v3 = vcombine.low %v3998_v63, %v4002_v22  ;;  %v8186_v4 = vcombine.low %v3999_v52, %v4003_v53  ;;  %v3536_v63 = vld [vmem:[#allocation18 + $0x10] sm:$0xff]  ;;  %v3484_v22 = vmul.f32 0.2, %v9326_v23  ;;  %v3537_v53 = vld [vmem:[#allocation18 + $0x18] sm:$0xff] }
 0x5e8   :  { %6809 = vmatprep.subr.bf16.mxu0 %v8145_v7  ;;  %6973 = vmatprep.subr.bf16.mxu1 %v8147_v8  ;;  %v8193_v7 = vcombine.high %v4006_v25, %v4010_v24  ;;  %v8195_v8 = vcombine.high %v4007_v29, %v4011_v2  ;;  %v3540_v52 = vld [vmem:[#allocation18 + $0x30] sm:$0xff] }
 0x5eb   :  { %6810 = vmatpush1.bf16.msra.mxu0 %v8144_v28  ;;  %6974 = vmatpush1.bf16.msra.mxu1 %v8146_v41  ;;  %v8192_v28 = vcombine.low %v4006_v25, %v4010_v24  ;;  %v8194_v41 = vcombine.low %v4007_v29, %v4011_v2  ;;  %v3492_v24 = vsel %vm3476_vm0, %v9326_v23, %v3484_v22  ;;  %v3544_v29 = vld [vmem:[#allocation18 + $0x50] sm:$0xff]  ;;  %v3553_v23 = vld [vmem:[#allocation18 + $0x98] sm:$0xff] }
 0x5ec   :  { %6811 = vmatprep.subr.bf16.mxu0 %v8153_v15  ;;  %6975 = vmatprep.subr.bf16.mxu1 %v8155_v43  ;;  %v8201_v15 = vcombine.high %v4014_v12, %v4018_v57  ;;  %v8203_v43 = vcombine.high %v4015_v45, %v4019_v58  ;;  %v3548_v2 = vld [vmem:[#allocation18 + $0x70] sm:$0xff] }
 0x5ed   :  { %v3584_v22 = vld [vmem:[#allocation18 + $0x190] sm:$0xff] }
 0x5ef   :  { %6812 = vmatpush1.bf16.msra.mxu0 %v8152_v26  ;;  %6976 = vmatpush1.bf16.msra.mxu1 %v8154_v34  ;;  %v8200_v26 = vcombine.low %v4014_v12, %v4018_v57  ;;  %v8202_v34 = vcombine.low %v4015_v45, %v4019_v58  ;;  %v7733_v57 = vcombine.high %v3544_v29, %v3548_v2  ;;  %v3552_v58 = vld [vmem:[#allocation18 + $0x90] sm:$0xff] }
 0x5f0   :  { %6813 = vmatprep.subr.bf16.mxu0 %v8161_v35  ;;  %6977 = vmatprep.subr.bf16.mxu1 %v8163_v37  ;;  %v8209_v35 = vcombine.high %v4022_v6, %v4026_v13  ;;  %v8211_v37 = vcombine.high %v4023_v56, %v4027_v5 }
 0x5f3   :  { %6814 = vmatpush1.bf16.msra.mxu0 %v8160_v27  ;;  %6978 = vmatpush1.bf16.msra.mxu1 %v8162_v14  ;;  %v8208_v27 = vcombine.low %v4022_v6, %v4026_v13  ;;  %v8210_v14 = vcombine.low %v4023_v56, %v4027_v5  ;;  %v3560_v56 = vld [vmem:[#allocation18 + $0xd0] sm:$0xff] }
 0x5f4   :  { %6815 = vmatprep.subr.bf16.mxu0 %v8169_v9  ;;  %6979 = vmatprep.subr.bf16.mxu1 %v8171_v36  ;;  %v8217_v9 = vcombine.high %v4030_v39, %v4034_v31  ;;  %v8219_v36 = vcombine.high %v4031_v46, %v4035_v44  ;;  %v3564_v5 = vld [vmem:[#allocation18 + $0xf0] sm:$0xff] }
 0x5f7   :  { %6816 = vmatpush1.bf16.msra.mxu0 %v8168_v51  ;;  %6980 = vmatpush1.bf16.msra.mxu1 %v8170_v10  ;;  %v8216_v51 = vcombine.low %v4030_v39, %v4034_v31  ;;  %v8218_v10 = vcombine.low %v4031_v46, %v4035_v44  ;;  %v7749_v39 = vcombine.high %v3560_v56, %v3564_v5  ;;  %v3568_v46 = vld [vmem:[#allocation18 + $0x110] sm:$0xff] }
 0x5f8   :  { %6817 = vmatprep.subr.bf16.mxu0 %v8177_v61  ;;  %6981 = vmatprep.subr.bf16.mxu1 %v8179_v62  ;;  %v8225_v61 = vcombine.high %v4038_v38, %v4042_v33  ;;  %v8227_v62 = vcombine.high %v4039_v47, %v4043_v48  ;;  %v3572_v44 = vld [vmem:[#allocation18 + $0x130] sm:$0xff] }
 0x5fb   :  { %6818 = vmatpush1.bf16.msra.mxu0 %v8176_v54  ;;  %6982 = vmatpush1.bf16.msra.mxu1 %v8178_v55  ;;  %v3541_v54 = vld [vmem:[#allocation18 + $0x38] sm:$0xff]  ;;  %v8224_v55 = vcombine.low %v4038_v38, %v4042_v33  ;;  %v3576_v33 = vld [vmem:[#allocation18 + $0x150] sm:$0xff] }
 0x5fc   :  { %6819 = vmatprep.subr.bf16.mxu0 %v8185_v60  ;;  %6983 = vmatprep.subr.bf16.mxu1 %v8187_v0  ;;  %v8226_v60 = vcombine.low %v4039_v47, %v4043_v48  ;;  %v7725_v0 = vcombine.high %v3536_v63, %v3540_v52  ;;  %v7727_v25 = vcombine.high %v3537_v53, %v3541_v54  ;;  %v3580_v47 = vld [vmem:[#allocation18 + $0x170] sm:$0xff]  ;;  %v3577_v48 = vld [vmem:[#allocation18 + $0x158] sm:$0xff] }
 0x5fd   :  { %v7726_v12 = vcombine.low %v3537_v53, %v3541_v54  ;;  %v3585_v53 = vld [vmem:[#allocation18 + $0x198] sm:$0xff] }
 0x5fe   :  { %v3589_v54 = vld [vmem:[#allocation18 + $0x1b8] sm:$0xff] }
 0x5ff   :  { %6820 = vmatpush1.bf16.msra.mxu0 %v8184_v3  ;;  %6984 = vmatpush1.bf16.msra.mxu1 %v8186_v4  ;;  %v3545_v3 = vld [vmem:[#allocation18 + $0x58] sm:$0xff] }
 0x600   :  { %6821 = vmatprep.subr.bf16.mxu0 %v8193_v7  ;;  %6985 = vmatprep.subr.bf16.mxu1 %v8195_v8  ;;  %v3549_v4 = vld [vmem:[#allocation18 + $0x78] sm:$0xff]  ;;  %v7724_v7 = vcombine.low %v3536_v63, %v3540_v52  ;;  %v9343_v8 = vpack.c.bf16 %v3492_v24, %v3492_v24  ;;  %v3588_v52 = vld [vmem:[#allocation18 + $0x1b0] sm:$0xff] }
 0x601   :  { %v7735_v45 = vcombine.high %v3545_v3, %v3549_v4  ;;  %v3592_v24 = vld [vmem:[#allocation18 + $0x1d0] sm:$0xff] }
 0x603   :  { %6822 = vmatpush1.bf16.msra.mxu0 %v8192_v28  ;;  %6986 = vmatpush1.bf16.msra.mxu1 %v8194_v41  ;;  %v3556_v28 = vld [vmem:[#allocation18 + $0xb0] sm:$0xff]  ;;  %v3557_v41 = vld [vmem:[#allocation18 + $0xb8] sm:$0xff] }
 0x604   :  { %6823 = vmatprep.subr.bf16.mxu0 %v8201_v15  ;;  %6987 = vmatprep.subr.bf16.mxu1 %v8203_v43  ;;  %v7732_v15 = vcombine.low %v3544_v29, %v3548_v2  ;;  %v7734_v43 = vcombine.low %v3545_v3, %v3549_v4  ;;  %v7741_v6 = vcombine.high %v3552_v58, %v3556_v28  ;;  %v3596_v29 = vld [vmem:[#allocation18 + $0x1f0] sm:$0xff]  ;;  %v3593_v2 = vld [vmem:[#allocation18 + $0x1d8] sm:$0xff] }
 0x605   :  { %v7743_v13 = vcombine.high %v3553_v23, %v3557_v41  ;;  %v3597_v3 = vld [vmem:[#allocation18 + $0x1f8] sm:$0xff]  ;;  %v7772_v4 = vcombine.low %v3584_v22, %v3588_v52 }
 0x607   :  { %6824 = vmatpush1.bf16.msra.mxu0 %v8200_v26  ;;  %6988 = vmatpush1.bf16.msra.mxu1 %v8202_v34  ;;  %v3561_v26 = vld [vmem:[#allocation18 + $0xd8] sm:$0xff] }
 0x608   :  { %6825 = vmatprep.subr.bf16.mxu0 %v8209_v35  ;;  %6989 = vmatprep.subr.bf16.mxu1 %v8211_v37  ;;  %v3565_v34 = vld [vmem:[#allocation18 + $0xf8] sm:$0xff]  ;;  %v7740_v35 = vcombine.low %v3552_v58, %v3556_v28  ;;  %v7742_v37 = vcombine.low %v3553_v23, %v3557_v41  ;;  %v3604_v58 = vld [vmem:[#allocation18 + $0x230] sm:$0xff]  ;;  %v7780_v41 = vcombine.low %v3592_v24, %v3596_v29 }
 0x609   :  { %v7751_v31 = vcombine.high %v3561_v26, %v3565_v34  ;;  %v3601_v28 = vld [vmem:[#allocation18 + $0x218] sm:$0xff] }
 0x60a   :  { %v3605_v23 = vld [vmem:[#allocation18 + $0x238] sm:$0xff] }
 0x60b   :  { %6826 = vmatpush1.bf16.msra.mxu0 %v8208_v27  ;;  %6990 = vmatpush1.bf16.msra.mxu1 %v8210_v14  ;;  %v3573_v27 = vld [vmem:[#allocation18 + $0x138] sm:$0xff]  ;;  %v7748_v14 = vcombine.low %v3560_v56, %v3564_v5  ;;  %v3612_v56 = vld [vmem:[#allocation18 + $0x270] sm:$0xff] }
 0x60c   :  { %6827 = vmatprep.subr.bf16.mxu0 %v8217_v9  ;;  %6991 = vmatprep.subr.bf16.mxu1 %v8219_v36  ;;  %v7750_v9 = vcombine.low %v3561_v26, %v3565_v34  ;;  %v7757_v36 = vcombine.high %v3568_v46, %v3572_v44  ;;  %v3609_v5 = vld [vmem:[#allocation18 + $0x258] sm:$0xff] }
 0x60d   :  { %v3613_v26 = vld [vmem:[#allocation18 + $0x278] sm:$0xff] }
 0x60f   :  { %6828 = vmatpush1.bf16.msra.mxu0 %v8216_v51  ;;  %6992 = vmatpush1.bf16.msra.mxu1 %v8218_v10  ;;  %v3581_v51 = vld [vmem:[#allocation18 + $0x178] sm:$0xff]  ;;  %v7756_v10 = vcombine.low %v3568_v46, %v3572_v44  ;;  %v3620_v46 = vld [vmem:[#allocation18 + $0x2b0] sm:$0xff] }
 0x610   :  { %6829 = vmatprep.subr.bf16.mxu0 %v8225_v61  ;;  %6993 = vmatprep.subr.bf16.mxu1 %v8227_v62  ;;  %v7765_v62 = vcombine.high %v3576_v33, %v3580_v47  ;;  %v7767_v63 = vcombine.high %v3577_v48, %v3581_v51  ;;  %v3617_v44 = vld [vmem:[#allocation18 + $0x298] sm:$0xff] }
 0x613   :  { %6830 = vmatpush1.bf16.msra.mxu0 %v8224_v55  ;;  %6994 = vmatpush1.bf16.msra.mxu1 %v8226_v60  ;;  %v7764_v55 = vcombine.low %v3576_v33, %v3580_v47  ;;  %v7766_v60 = vcombine.low %v3577_v48, %v3581_v51  ;;  %v3628_v33 = vld [vmem:[#allocation18 + $0x2f0] sm:$0xff]  ;;  %v3625_v47 = vld [vmem:[#allocation18 + $0x2d8] sm:$0xff] }
 0x614   :  { %7004 = vmatprep.subr.bf16.mxu0 %v7725_v0  ;;  %7168 = vmatprep.subr.bf16.mxu1 %v7727_v25  ;;  %v7773_v0 = vcombine.high %v3584_v22, %v3588_v52  ;;  %v7775_v25 = vcombine.high %v3585_v53, %v3589_v54  ;;  %v3629_v48 = vld [vmem:[#allocation18 + $0x2f8] sm:$0xff]  ;;  %v3636_v22 = vld [vmem:[#allocation18 + $0x330] sm:$0xff] }
 0x615   :  { %v3633_v52 = vld [vmem:[#allocation18 + $0x318] sm:$0xff] }
 0x616   :  { %6832 = vmatmul.mubr.bf16.vlgmr.msra.gmra.mrb[16].mxu0 %v9343_v8  ;;  %6996 = vmatmul.mubr.bf16.vlgmr.msra.gmra.mrb[16].mxu1 %v9343_v8 }
 0x617   :  { %7005 = vmatpush1.bf16.msra.mxu0 %v7724_v7  ;;  %7036 = vmatprep.mubr.bf16.mxu0 %v9235_v40  ;;  %v7774_v7 = vcombine.low %v3585_v53, %v3589_v54  ;;  %v3637_v53 = vld [vmem:[#allocation18 + $0x338] sm:$0xff] }
 0x618   :  { %7169 = vmatpush1.bf16.msra.mxu1 %v7726_v12  ;;  %7200 = vmatprep.mubr.bf16.mxu1 %v9235_v40  ;;  %v3569_v40 = vld [vmem:[#allocation18 + $0x118] sm:$0xff]  ;;  %v7781_v12 = vcombine.high %v3592_v24, %v3596_v29  ;;  %v3644_v24 = vld [vmem:[#allocation18 + $0x370] sm:$0xff] }
 0x619   :  { %7006 = vmatprep.subr.bf16.mxu0 %v7733_v57  ;;  %7170 = vmatprep.subr.bf16.mxu1 %v7735_v45  ;;  %v7759_v38 = vcombine.high %v3569_v40, %v3573_v27  ;;  %v7758_v61 = vcombine.low %v3569_v40, %v3573_v27  ;;  %v7783_v57 = vcombine.high %v3593_v2, %v3597_v3  ;;  %v3600_v45 = vld [vmem:[#allocation18 + $0x210] sm:$0xff]  ;;  %v3621_v40 = vld [vmem:[#allocation18 + $0x2b8] sm:$0xff] }
 0x61a   :  { %v7788_v34 = vcombine.low %v3600_v45, %v3604_v58  ;;  %v3641_v29 = vld [vmem:[#allocation18 + $0x358] sm:$0xff] }
 0x61b   :  { %7007 = vmatpush1.bf16.msra.mxu0 %v7732_v15  ;;  %v7782_v15 = vcombine.low %v3593_v2, %v3597_v3  ;;  %v3645_v2 = vld [vmem:[#allocation18 + $0x378] sm:$0xff] }
 0x61c   :  { %7171 = vmatpush1.bf16.msra.mxu1 %v7734_v43  ;;  %7008 = vmatprep.subr.bf16.mxu0 %v7741_v6  ;;  %v7789_v43 = vcombine.high %v3600_v45, %v3604_v58  ;;  %v7791_v6 = vcombine.high %v3601_v28, %v3605_v23  ;;  %v3652_v45 = vld [vmem:[#allocation18 + $0x3b0] sm:$0xff]  ;;  %v3649_v58 = vld [vmem:[#allocation18 + $0x398] sm:$0xff] }
 0x61d   :  { %7172 = vmatprep.subr.bf16.mxu1 %v7743_v13  ;;  %v3608_v13 = vld [vmem:[#allocation18 + $0x250] sm:$0xff] }
 0x61e   :  { %v7796_v27 = vcombine.low %v3608_v13, %v3612_v56 }
 0x61f   :  { %7009 = vmatpush1.bf16.msra.mxu0 %v7740_v35  ;;  %v7790_v35 = vcombine.low %v3601_v28, %v3605_v23  ;;  %v3653_v28 = vld [vmem:[#allocation18 + $0x3b8] sm:$0xff] }
 0x620   :  { %7173 = vmatpush1.bf16.msra.mxu1 %v7742_v37  ;;  %7010 = vmatprep.subr.bf16.mxu0 %v7749_v39  ;;  %v7797_v37 = vcombine.high %v3608_v13, %v3612_v56  ;;  %v7799_v39 = vcombine.high %v3609_v5, %v3613_v26  ;;  %v3660_v13 = vld [vmem:[#allocation18 + $0x3f0] sm:$0xff]  ;;  %v3657_v56 = vld [vmem:[#allocation18 + $0x3d8] sm:$0xff] }
 0x621   :  { %7174 = vmatprep.subr.bf16.mxu1 %v7751_v31  ;;  %v3616_v31 = vld [vmem:[#allocation18 + $0x290] sm:$0xff] }
 0x622   :  { %v7804_v51 = vcombine.low %v3616_v31, %v3620_v46 }
 0x623   :  { %7011 = vmatpush1.bf16.msra.mxu0 %v7748_v14  ;;  %v7798_v14 = vcombine.low %v3609_v5, %v3613_v26  ;;  %v3661_v5 = vld [vmem:[#allocation18 + $0x3f8] sm:$0xff] }
 0x624   :  { %7175 = vmatpush1.bf16.msra.mxu1 %v7750_v9  ;;  %7012 = vmatprep.subr.bf16.mxu0 %v7757_v36  ;;  %v7805_v9 = vcombine.high %v3616_v31, %v3620_v46  ;;  %v7807_v36 = vcombine.high %v3617_v44, %v3621_v40  ;;  %v3668_v31 = vld [vmem:[#allocation18 + $0x430] sm:$0xff]  ;;  %v3665_v46 = vld [vmem:[#allocation18 + $0x418] sm:$0xff] }
 0x625   :  { %7176 = vmatprep.subr.bf16.mxu1 %v7759_v38  ;;  %v3624_v38 = vld [vmem:[#allocation18 + $0x2d0] sm:$0xff] }
 0x626   :  { %v7812_v54 = vcombine.low %v3624_v38, %v3628_v33 }
 0x627   :  { %7013 = vmatpush1.bf16.msra.mxu0 %v7756_v10  ;;  %v7806_v10 = vcombine.low %v3617_v44, %v3621_v40  ;;  %v3669_v44 = vld [vmem:[#allocation18 + $0x438] sm:$0xff] }
 0x628   :  { %7177 = vmatpush1.bf16.msra.mxu1 %v7758_v61  ;;  %7014 = vmatprep.subr.bf16.mxu0 %v7765_v62  ;;  %v7813_v61 = vcombine.high %v3624_v38, %v3628_v33  ;;  %v7815_v62 = vcombine.high %v3625_v47, %v3629_v48  ;;  %v3676_v38 = vld [vmem:[#allocation18 + $0x470] sm:$0xff] }
 0x629   :  { %7178 = vmatprep.subr.bf16.mxu1 %v7767_v63  ;;  %v3632_v63 = vld [vmem:[#allocation18 + $0x310] sm:$0xff] }
 0x62a   :  { %v7820_v3 = vcombine.low %v3632_v63, %v3636_v22 }
 0x62b   :  { %7015 = vmatpush1.bf16.msra.mxu0 %v7764_v55  ;;  %v7814_v55 = vcombine.low %v3625_v47, %v3629_v48  ;;  %v3673_v47 = vld [vmem:[#allocation18 + $0x458] sm:$0xff] }
 0x62c   :  { %7179 = vmatpush1.bf16.msra.mxu1 %v7766_v60  ;;  %7016 = vmatprep.subr.bf16.mxu0 %v7773_v0  ;;  %v7821_v60 = vcombine.high %v3632_v63, %v3636_v22  ;;  %v7823_v0 = vcombine.high %v3633_v52, %v3637_v53  ;;  %v3677_v48 = vld [vmem:[#allocation18 + $0x478] sm:$0xff] }
 0x62d   :  { %7180 = vmatprep.subr.bf16.mxu1 %v7775_v25  ;;  %v3640_v25 = vld [vmem:[#allocation18 + $0x350] sm:$0xff]  ;;  %v7863_v63 = vcombine.high %v3673_v47, %v3677_v48  ;;  %v3681_v22 = vld [vmem:[#allocation18 + $0x498] sm:$0xff] }
 0x62e   :  { %v7828_v23 = vcombine.low %v3640_v25, %v3644_v24 }
 0x62f   :  { %7017 = vmatpush1.bf16.msra.mxu0 %v7772_v4  ;;  %v7822_v4 = vcombine.low %v3633_v52, %v3637_v53  ;;  %v3685_v52 = vld [vmem:[#allocation18 + $0x4b8] sm:$0xff] }
 0x630   :  { %7181 = vmatpush1.bf16.msra.mxu1 %v7774_v7  ;;  %7018 = vmatprep.subr.bf16.mxu0 %v7781_v12  ;;  %v7829_v7 = vcombine.high %v3640_v25, %v3644_v24  ;;  %v7831_v12 = vcombine.high %v3641_v29, %v3645_v2  ;;  %v3692_v25 = vld [vmem:[#allocation18 + $0x4f0] sm:$0xff]  ;;  %v3689_v24 = vld [vmem:[#allocation18 + $0x4d8] sm:$0xff] }
 0x631   :  { %7182 = vmatprep.subr.bf16.mxu1 %v7783_v57  ;;  %v3648_v57 = vld [vmem:[#allocation18 + $0x390] sm:$0xff] }
 0x632   :  { %v7836_v26 = vcombine.low %v3648_v57, %v3652_v45 }
 0x633   :  { %7019 = vmatpush1.bf16.msra.mxu0 %v7780_v41  ;;  %v7830_v41 = vcombine.low %v3641_v29, %v3645_v2  ;;  %v3693_v29 = vld [vmem:[#allocation18 + $0x4f8] sm:$0xff] }
 0x634   :  { %7183 = vmatpush1.bf16.msra.mxu1 %v7782_v15  ;;  %7020 = vmatprep.subr.bf16.mxu0 %v7789_v43  ;;  %v7837_v15 = vcombine.high %v3648_v57, %v3652_v45  ;;  %v7839_v43 = vcombine.high %v3649_v58, %v3653_v28  ;;  %v3697_v57 = vld [vmem:[#allocation18 + $0x518] sm:$0xff] }
 0x635   :  { %7184 = vmatprep.subr.bf16.mxu1 %v7791_v6  ;;  %v3656_v6 = vld [vmem:[#allocation18 + $0x3d0] sm:$0xff]  ;;  %v3701_v45 = vld [vmem:[#allocation18 + $0x538] sm:$0xff] }
 0x636   :  { %v7844_v40 = vcombine.low %v3656_v6, %v3660_v13 }
 0x637   :  { %7021 = vmatpush1.bf16.msra.mxu0 %v7788_v34  ;;  %v7838_v34 = vcombine.low %v3649_v58, %v3653_v28  ;;  %v7878_v58 = vcombine.low %v3689_v24, %v3693_v29 }
 0x638   :  { %7185 = vmatpush1.bf16.msra.mxu1 %v7790_v35  ;;  %7022 = vmatprep.subr.bf16.mxu0 %v7797_v37  ;;  %v7845_v35 = vcombine.high %v3656_v6, %v3660_v13  ;;  %v7847_v37 = vcombine.high %v3657_v56, %v3661_v5  ;;  %v3709_v6 = vld [vmem:[#allocation18 + $0x578] sm:$0xff] }
 0x639   :  { %7186 = vmatprep.subr.bf16.mxu1 %v7799_v39  ;;  %v3664_v39 = vld [vmem:[#allocation18 + $0x410] sm:$0xff] }
 0x63a   :  { %v7852_v33 = vcombine.low %v3664_v39, %v3668_v31 }
 0x63b   :  { %7023 = vmatpush1.bf16.msra.mxu0 %v7796_v27  ;;  %v7846_v27 = vcombine.low %v3657_v56, %v3661_v5  ;;  %v7886_v56 = vcombine.low %v3697_v57, %v3701_v45 }
 0x63c   :  { %7187 = vmatpush1.bf16.msra.mxu1 %v7798_v14  ;;  %7024 = vmatprep.subr.bf16.mxu0 %v7805_v9  ;;  %v7853_v14 = vcombine.high %v3664_v39, %v3668_v31  ;;  %v7855_v9 = vcombine.high %v3665_v46, %v3669_v44  ;;  %v3717_v39 = vld [vmem:[#allocation18 + $0x5b8] sm:$0xff] }
 0x63d   :  { %7188 = vmatprep.subr.bf16.mxu1 %v7807_v36  ;;  %v3672_v36 = vld [vmem:[#allocation18 + $0x450] sm:$0xff] }
 0x63e   :  { %v7860_v53 = vcombine.low %v3672_v36, %v3676_v38 }
 0x63f   :  { %7025 = vmatpush1.bf16.msra.mxu0 %v7804_v51  ;;  %v7854_v51 = vcombine.low %v3665_v46, %v3669_v44 }
 0x640   :  { %7189 = vmatpush1.bf16.msra.mxu1 %v7806_v10  ;;  %7026 = vmatprep.subr.bf16.mxu0 %v7813_v61  ;;  %v7861_v10 = vcombine.high %v3672_v36, %v3676_v38  ;;  %v3680_v61 = vld [vmem:[#allocation18 + $0x490] sm:$0xff]  ;;  %v3725_v36 = vld [vmem:[#allocation18 + $0x5f8] sm:$0xff] }
 0x641   :  { %7190 = vmatprep.subr.bf16.mxu1 %v7815_v62  ;;  %v3684_v62 = vld [vmem:[#allocation18 + $0x4b0] sm:$0xff] }
 0x642   :  { %v7868_v2 = vcombine.low %v3680_v61, %v3684_v62 }
 0x643   :  { %7027 = vmatpush1.bf16.msra.mxu0 %v7812_v54  ;;  %v7862_v54 = vcombine.low %v3673_v47, %v3677_v48 }
 0x644   :  { %7191 = vmatpush1.bf16.msra.mxu1 %v7814_v55  ;;  %7028 = vmatprep.subr.bf16.mxu0 %v7821_v60  ;;  %v7869_v55 = vcombine.high %v3680_v61, %v3684_v62  ;;  %v7871_v60 = vcombine.high %v3681_v22, %v3685_v52  ;;  %v3729_v61 = vld [vmem:[#allocation18 + $0x618] sm:$0xff] }
 0x645   :  { %7192 = vmatprep.subr.bf16.mxu1 %v7823_v0  ;;  %v3688_v0 = vld [vmem:[#allocation18 + $0x4d0] sm:$0xff]  ;;  %v3733_v62 = vld [vmem:[#allocation18 + $0x638] sm:$0xff] }
 0x647   :  { %7029 = vmatpush1.bf16.msra.mxu0 %v7820_v3  ;;  %v7877_v3 = vcombine.high %v3688_v0, %v3692_v25 }
 0x648   :  { %7193 = vmatpush1.bf16.msra.mxu1 %v7822_v4  ;;  %7030 = vmatprep.subr.bf16.mxu0 %v7829_v7  ;;  %v7879_v4 = vcombine.high %v3689_v24, %v3693_v29  ;;  %v3696_v7 = vld [vmem:[#allocation18 + $0x510] sm:$0xff]  ;;  %v7918_v24 = vcombine.low %v3729_v61, %v3733_v62 }
 0x649   :  { %7194 = vmatprep.subr.bf16.mxu1 %v7831_v12  ;;  %v3700_v12 = vld [vmem:[#allocation18 + $0x530] sm:$0xff] }
 0x64a   :  { %v7885_v28 = vcombine.high %v3696_v7, %v3700_v12  ;;  %v7884_v13 = vcombine.low %v3696_v7, %v3700_v12  ;;  %v3749_v7 = vld [vmem:[#allocation18 + $0x6b8] sm:$0xff] }
 0x64b   :  { %7031 = vmatpush1.bf16.msra.mxu0 %v7828_v23  ;;  %v7887_v23 = vcombine.high %v3697_v57, %v3701_v45 }
 0x64c   :  { %7195 = vmatpush1.bf16.msra.mxu1 %v7830_v41  ;;  %7032 = vmatprep.subr.bf16.mxu0 %v7837_v15  ;;  %v3704_v41 = vld [vmem:[#allocation18 + $0x550] sm:$0xff] }
 0x64d   :  { %7196 = vmatprep.subr.bf16.mxu1 %v7839_v43  ;;  %v3708_v15 = vld [vmem:[#allocation18 + $0x570] sm:$0xff]  ;;  %v3705_v43 = vld [vmem:[#allocation18 + $0x558] sm:$0xff] }
 0x64e   :  { %v7893_v5 = vcombine.high %v3704_v41, %v3708_v15  ;;  %v7892_v31 = vcombine.low %v3704_v41, %v3708_v15  ;;  %v7894_v46 = vcombine.low %v3705_v43, %v3709_v6  ;;  %v3757_v41 = vld [vmem:[#allocation18 + $0x6f8] sm:$0xff] }
 0x64f   :  { %7033 = vmatpush1.bf16.msra.mxu0 %v7836_v26  ;;  %v7895_v26 = vcombine.high %v3705_v43, %v3709_v6 }
 0x650   :  { %7197 = vmatpush1.bf16.msra.mxu1 %v7838_v34  ;;  %7034 = vmatprep.subr.bf16.mxu0 %v7845_v35  ;;  %v3712_v34 = vld [vmem:[#allocation18 + $0x590] sm:$0xff] }
 0x651   :  { %7198 = vmatprep.subr.bf16.mxu1 %v7847_v37  ;;  %v3716_v35 = vld [vmem:[#allocation18 + $0x5b0] sm:$0xff]  ;;  %v3713_v37 = vld [vmem:[#allocation18 + $0x598] sm:$0xff] }
 0x652   :  { %v7901_v44 = vcombine.high %v3712_v34, %v3716_v35  ;;  %v7900_v38 = vcombine.low %v3712_v34, %v3716_v35  ;;  %v3765_v34 = vld [vmem:[#allocation18 + $0x738] sm:$0xff] }
 0x653   :  { %7035 = vmatpush1.bf16.msra.mxu0 %v7844_v40  ;;  %v7903_v40 = vcombine.high %v3713_v37, %v3717_v39 }
 0x654   :  { %7199 = vmatpush1.bf16.msra.mxu1 %v7846_v27  ;;  %7045 = vmatprep.subr.bf16.mxu0 %v7853_v14  ;;  %v3720_v27 = vld [vmem:[#allocation18 + $0x5d0] sm:$0xff] }
 0x655   :  { %7209 = vmatprep.subr.bf16.mxu1 %v7855_v9  ;;  %v3724_v14 = vld [vmem:[#allocation18 + $0x5f0] sm:$0xff]  ;;  %v3721_v9 = vld [vmem:[#allocation18 + $0x5d8] sm:$0xff] }
 0x656   :  { %7037 = vmatmul.mubr.bf16.vlgmr.msra.gmra.mrb[20].mxu0 %v9237_v42  ;;  %v7909_v47 = vcombine.high %v3720_v27, %v3724_v14  ;;  %v7911_v48 = vcombine.high %v3721_v9, %v3725_v36 }
 0x657   :  { %7201 = vmatmul.mubr.bf16.vlgmr.msra.gmra.mrb[20].mxu1 %v9237_v42  ;;  %7046 = vmatpush1.bf16.msra.mxu0 %v7852_v33  ;;  %v7870_v42 = vcombine.low %v3681_v22, %v3685_v52  ;;  %v7902_v33 = vcombine.low %v3713_v37, %v3717_v39  ;;  %v7910_v22 = vcombine.low %v3721_v9, %v3725_v36 }
 0x658   :  { %7077 = vmatprep.mubr.bf16.mxu0 %v9243_v18  ;;  %7210 = vmatpush1.bf16.msra.mxu1 %v7854_v51  ;;  %v3728_v51 = vld [vmem:[#allocation18 + $0x610] sm:$0xff] }
 0x659   :  { %7241 = vmatprep.mubr.bf16.mxu1 %v9243_v18  ;;  %7047 = vmatprep.subr.bf16.mxu0 %v7861_v10  ;;  %v7876_v18 = vcombine.low %v3688_v0, %v3692_v25  ;;  %v3732_v10 = vld [vmem:[#allocation18 + $0x630] sm:$0xff]  ;;  %v3741_v0 = vld [vmem:[#allocation18 + $0x678] sm:$0xff] }
 0x65a   :  { %7211 = vmatprep.subr.bf16.mxu1 %v7863_v63  ;;  %v7908_v63 = vcombine.low %v3720_v27, %v3724_v14  ;;  %v7917_v52 = vcombine.high %v3728_v51, %v3732_v10  ;;  %v7916_v25 = vcombine.low %v3728_v51, %v3732_v10  ;;  %v3773_v27 = vld [vmem:[#allocation18 + $0x778] sm:$0xff] }
 0x65b   :  { %7048 = vmatpush1.bf16.msra.mxu0 %v7860_v53  ;;  %v7919_v53 = vcombine.high %v3729_v61, %v3733_v62  ;;  %v3781_v51 = vld [vmem:[#allocation18 + $0x7b8] sm:$0xff] }
 0x65c   :  { %7212 = vmatpush1.bf16.msra.mxu1 %v7862_v54  ;;  %7049 = vmatprep.subr.bf16.mxu0 %v7869_v55  ;;  %v3736_v54 = vld [vmem:[#allocation18 + $0x650] sm:$0xff] }
 0x65d   :  { %7213 = vmatprep.subr.bf16.mxu1 %v7871_v60  ;;  %v3740_v55 = vld [vmem:[#allocation18 + $0x670] sm:$0xff]  ;;  %v3737_v60 = vld [vmem:[#allocation18 + $0x658] sm:$0xff] }
 0x65e   :  { %v7925_v29 = vcombine.high %v3736_v54, %v3740_v55  ;;  %v7924_v12 = vcombine.low %v3736_v54, %v3740_v55  ;;  %v7926_v57 = vcombine.low %v3737_v60, %v3741_v0  ;;  %v3789_v54 = vld [vmem:[#allocation18 + $0x7f8] sm:$0xff] }
 0x65f   :  { %7050 = vmatpush1.bf16.msra.mxu0 %v7868_v2  ;;  %v7927_v2 = vcombine.high %v3737_v60, %v3741_v0 }
 0x660   :  { %7214 = vmatpush1.bf16.msra.mxu1 %v7870_v42  ;;  %7051 = vmatprep.subr.bf16.mxu0 %v7877_v3  ;;  %v3744_v42 = vld [vmem:[#allocation18 + $0x690] sm:$0xff] }
 0x661   :  { %7215 = vmatprep.subr.bf16.mxu1 %v7879_v4  ;;  %v3748_v3 = vld [vmem:[#allocation18 + $0x6b0] sm:$0xff]  ;;  %v3745_v4 = vld [vmem:[#allocation18 + $0x698] sm:$0xff] }
 0x662   :  { %v7933_v45 = vcombine.high %v3744_v42, %v3748_v3  ;;  %v7932_v15 = vcombine.low %v3744_v42, %v3748_v3  ;;  %v7934_v43 = vcombine.low %v3745_v4, %v3749_v7  ;;  %v3797_v42 = vld [vmem:[#allocation18 + $0x838] sm:$0xff] }
 0x663   :  { %7052 = vmatpush1.bf16.msra.mxu0 %v7876_v18  ;;  %v7935_v18 = vcombine.high %v3745_v4, %v3749_v7 }
 0x664   :  { %7216 = vmatpush1.bf16.msra.mxu1 %v7878_v58  ;;  %7053 = vmatprep.subr.bf16.mxu0 %v7885_v28  ;;  %v3752_v58 = vld [vmem:[#allocation18 + $0x6d0] sm:$0xff] }
 0x665   :  { %7217 = vmatprep.subr.bf16.mxu1 %v7887_v23  ;;  %v3756_v28 = vld [vmem:[#allocation18 + $0x6f0] sm:$0xff]  ;;  %v3753_v23 = vld [vmem:[#allocation18 + $0x6d8] sm:$0xff] }
 0x666   :  { %v7941_v6 = vcombine.high %v3752_v58, %v3756_v28  ;;  %v7940_v35 = vcombine.low %v3752_v58, %v3756_v28  ;;  %v7942_v37 = vcombine.low %v3753_v23, %v3757_v41  ;;  %v3801_v58 = vld [vmem:[#allocation18 + $0x858] sm:$0xff] }
 0x667   :  { %7054 = vmatpush1.bf16.msra.mxu0 %v7884_v13  ;;  %v7943_v13 = vcombine.high %v3753_v23, %v3757_v41  ;;  %v3805_v28 = vld [vmem:[#allocation18 + $0x878] sm:$0xff] }
 0x668   :  { %7218 = vmatpush1.bf16.msra.mxu1 %v7886_v56  ;;  %7055 = vmatprep.subr.bf16.mxu0 %v7893_v5  ;;  %v3760_v56 = vld [vmem:[#allocation18 + $0x710] sm:$0xff] }
 0x669   :  { %7219 = vmatprep.subr.bf16.mxu1 %v7895_v26  ;;  %v3764_v5 = vld [vmem:[#allocation18 + $0x730] sm:$0xff]  ;;  %v3761_v26 = vld [vmem:[#allocation18 + $0x718] sm:$0xff] }
 0x66a   :  { %v7949_v39 = vcombine.high %v3760_v56, %v3764_v5  ;;  %v7948_v14 = vcombine.low %v3760_v56, %v3764_v5  ;;  %v7950_v9 = vcombine.low %v3761_v26, %v3765_v34  ;;  %v3813_v56 = vld [vmem:[#allocation18 + $0x8b8] sm:$0xff] }
 0x66b   :  { %7056 = vmatpush1.bf16.msra.mxu0 %v7892_v31  ;;  %v7951_v31 = vcombine.high %v3761_v26, %v3765_v34  ;;  %v7990_v26 = vcombine.low %v3801_v58, %v3805_v28 }
 0x66c   :  { %7220 = vmatpush1.bf16.msra.mxu1 %v7894_v46  ;;  %7057 = vmatprep.subr.bf16.mxu0 %v7901_v44  ;;  %v3768_v46 = vld [vmem:[#allocation18 + $0x750] sm:$0xff] }
 0x66d   :  { %7221 = vmatprep.subr.bf16.mxu1 %v7903_v40  ;;  %v3772_v44 = vld [vmem:[#allocation18 + $0x770] sm:$0xff]  ;;  %v3769_v40 = vld [vmem:[#allocation18 + $0x758] sm:$0xff] }
 0x66e   :  { %v7957_v36 = vcombine.high %v3768_v46, %v3772_v44  ;;  %v7956_v10 = vcombine.low %v3768_v46, %v3772_v44  ;;  %v7958_v61 = vcombine.low %v3769_v40, %v3773_v27  ;;  %v3821_v46 = vld [vmem:[#allocation18 + $0x8f8] sm:$0xff] }
 0x66f   :  { %7058 = vmatpush1.bf16.msra.mxu0 %v7900_v38  ;;  %v7959_v38 = vcombine.high %v3769_v40, %v3773_v27 }
 0x670   :  { %7222 = vmatpush1.bf16.msra.mxu1 %v7902_v33  ;;  %7059 = vmatprep.subr.bf16.mxu0 %v7909_v47  ;;  %v3776_v33 = vld [vmem:[#allocation18 + $0x790] sm:$0xff] }
 0x671   :  { %7223 = vmatprep.subr.bf16.mxu1 %v7911_v48  ;;  %v3780_v47 = vld [vmem:[#allocation18 + $0x7b0] sm:$0xff]  ;;  %v3777_v48 = vld [vmem:[#allocation18 + $0x798] sm:$0xff] }
 0x672   :  { %v7965_v62 = vcombine.high %v3776_v33, %v3780_v47  ;;  %v7964_v55 = vcombine.low %v3776_v33, %v3780_v47  ;;  %v7966_v60 = vcombine.low %v3777_v48, %v3781_v51 }
 0x673   :  { %7060 = vmatpush1.bf16.msra.mxu0 %v7908_v63  ;;  %v7967_v63 = vcombine.high %v3777_v48, %v3781_v51  ;;  %v3832_v51 = vld [vmem:[#allocation18 + $0x950] sm:$0xff] }
 0x674   :  { %7224 = vmatpush1.bf16.msra.mxu1 %v7910_v22  ;;  %7061 = vmatprep.subr.bf16.mxu0 %v7917_v52  ;;  %v3784_v22 = vld [vmem:[#allocation18 + $0x7d0] sm:$0xff] }
 0x675   :  { %7225 = vmatprep.subr.bf16.mxu1 %v7919_v53  ;;  %v3788_v52 = vld [vmem:[#allocation18 + $0x7f0] sm:$0xff]  ;;  %v3785_v53 = vld [vmem:[#allocation18 + $0x7d8] sm:$0xff] }
 0x676   :  { %v7973_v0 = vcombine.high %v3784_v22, %v3788_v52  ;;  %v7972_v3 = vcombine.low %v3784_v22, %v3788_v52  ;;  %v7974_v4 = vcombine.low %v3785_v53, %v3789_v54 }
 0x677   :  { %7062 = vmatpush1.bf16.msra.mxu0 %v7916_v25  ;;  %v7975_v25 = vcombine.high %v3785_v53, %v3789_v54  ;;  %v3840_v54 = vld [vmem:[#allocation18 + $0x990] sm:$0xff] }
 0x678   :  { %7226 = vmatpush1.bf16.msra.mxu1 %v7918_v24  ;;  %7063 = vmatprep.subr.bf16.mxu0 %v7925_v29  ;;  %v3792_v24 = vld [vmem:[#allocation18 + $0x810] sm:$0xff] }
 0x679   :  { %7227 = vmatprep.subr.bf16.mxu1 %v7927_v2  ;;  %v3796_v29 = vld [vmem:[#allocation18 + $0x830] sm:$0xff]  ;;  %v3793_v2 = vld [vmem:[#allocation18 + $0x818] sm:$0xff] }
 0x67a   :  { %v7981_v7 = vcombine.high %v3792_v24, %v3796_v29  ;;  %v7982_v23 = vcombine.low %v3793_v2, %v3797_v42 }
 0x67b   :  { %7064 = vmatpush1.bf16.msra.mxu0 %v7924_v12  ;;  %v7983_v12 = vcombine.high %v3793_v2, %v3797_v42  ;;  %v3848_v42 = vld [vmem:[#allocation18 + $0x9d0] sm:$0xff] }
 0x67c   :  { %7228 = vmatpush1.bf16.msra.mxu1 %v7926_v57  ;;  %7065 = vmatprep.subr.bf16.mxu0 %v7933_v45  ;;  %v3800_v57 = vld [vmem:[#allocation18 + $0x850] sm:$0xff] }
 0x67d   :  { %7229 = vmatprep.subr.bf16.mxu1 %v7935_v18  ;;  %v3804_v45 = vld [vmem:[#allocation18 + $0x870] sm:$0xff]  ;;  %v7980_v18 = vcombine.low %v3792_v24, %v3796_v29 }
 0x67e   :  { %v7989_v41 = vcombine.high %v3800_v57, %v3804_v45  ;;  %v7988_v5 = vcombine.low %v3800_v57, %v3804_v45 }
 0x67f   :  { %7066 = vmatpush1.bf16.msra.mxu0 %v7932_v15  ;;  %v3808_v15 = vld [vmem:[#allocation18 + $0x890] sm:$0xff] }
 0x680   :  { %7230 = vmatpush1.bf16.msra.mxu1 %v7934_v43  ;;  %7067 = vmatprep.subr.bf16.mxu0 %v7941_v6  ;;  %v3812_v43 = vld [vmem:[#allocation18 + $0x8b0] sm:$0xff]  ;;  %v7991_v6 = vcombine.high %v3801_v58, %v3805_v28 }
 0x681   :  { %7231 = vmatprep.subr.bf16.mxu1 %v7943_v13  ;;  %v3809_v13 = vld [vmem:[#allocation18 + $0x898] sm:$0xff]  ;;  %v7997_v34 = vcombine.high %v3808_v15, %v3812_v43  ;;  %v7996_v44 = vcombine.low %v3808_v15, %v3812_v43  ;;  %v3856_v58 = vld [vmem:[#allocation18 + $0xa10] sm:$0xff] }
 0x682   :  { %v3860_v28 = vld [vmem:[#allocation18 + $0xa30] sm:$0xff] }
 0x683   :  { %7068 = vmatpush1.bf16.msra.mxu0 %v7940_v35  ;;  %v7999_v35 = vcombine.high %v3809_v13, %v3813_v56 }
 0x684   :  { %7232 = vmatpush1.bf16.msra.mxu1 %v7942_v37  ;;  %7069 = vmatprep.subr.bf16.mxu0 %v7949_v39  ;;  %v3816_v37 = vld [vmem:[#allocation18 + $0x8d0] sm:$0xff] }
 0x685   :  { %7233 = vmatprep.subr.bf16.mxu1 %v7951_v31  ;;  %v3820_v39 = vld [vmem:[#allocation18 + $0x8f0] sm:$0xff]  ;;  %v3817_v31 = vld [vmem:[#allocation18 + $0x8d8] sm:$0xff] }
 0x686   :  { %v8005_v40 = vcombine.high %v3816_v37, %v3820_v39  ;;  %v8007_v27 = vcombine.high %v3817_v31, %v3821_v46  ;;  %v8006_v33 = vcombine.low %v3817_v31, %v3821_v46  ;;  %v3872_v46 = vld [vmem:[#allocation18 + $0xa90] sm:$0xff] }
 0x687   :  { %7070 = vmatpush1.bf16.msra.mxu0 %v7948_v14  ;;  %v3824_v14 = vld [vmem:[#allocation18 + $0x910] sm:$0xff] }
 0x688   :  { %7234 = vmatpush1.bf16.msra.mxu1 %v7950_v9  ;;  %7071 = vmatprep.subr.bf16.mxu0 %v7957_v36  ;;  %v3828_v9 = vld [vmem:[#allocation18 + $0x930] sm:$0xff]  ;;  %v3825_v36 = vld [vmem:[#allocation18 + $0x918] sm:$0xff] }
 0x689   :  { %7235 = vmatprep.subr.bf16.mxu1 %v7959_v38  ;;  %v3829_v38 = vld [vmem:[#allocation18 + $0x938] sm:$0xff]  ;;  %v8013_v47 = vcombine.high %v3824_v14, %v3828_v9 }
 0x68a   :  { %v8015_v48 = vcombine.high %v3825_v36, %v3829_v38  ;;  %v8014_v22 = vcombine.low %v3825_v36, %v3829_v38  ;;  %v3880_v38 = vld [vmem:[#allocation18 + $0xad0] sm:$0xff] }
 0x68b   :  { %7072 = vmatpush1.bf16.msra.mxu0 %v7956_v10  ;;  %v3836_v10 = vld [vmem:[#allocation18 + $0x970] sm:$0xff] }
 0x68c   :  { %7236 = vmatpush1.bf16.msra.mxu1 %v7958_v61  ;;  %7073 = vmatprep.subr.bf16.mxu0 %v7965_v62  ;;  %v3833_v61 = vld [vmem:[#allocation18 + $0x958] sm:$0xff]  ;;  %v8021_v52 = vcombine.high %v3832_v51, %v3836_v10 }
 0x68d   :  { %7237 = vmatprep.subr.bf16.mxu1 %v7967_v63  ;;  %v3837_v62 = vld [vmem:[#allocation18 + $0x978] sm:$0xff]  ;;  %v8012_v63 = vcombine.low %v3824_v14, %v3828_v9 }
 0x68e   :  { %v8023_v53 = vcombine.high %v3833_v61, %v3837_v62  ;;  %v8022_v24 = vcombine.low %v3833_v61, %v3837_v62  ;;  %v3888_v62 = vld [vmem:[#allocation18 + $0xb10] sm:$0xff] }
 0x68f   :  { %7074 = vmatpush1.bf16.msra.mxu0 %v7964_v55  ;;  %v3844_v55 = vld [vmem:[#allocation18 + $0x9b0] sm:$0xff] }
 0x690   :  { %7238 = vmatpush1.bf16.msra.mxu1 %v7966_v60  ;;  %7075 = vmatprep.subr.bf16.mxu0 %v7973_v0  ;;  %v3841_v60 = vld [vmem:[#allocation18 + $0x998] sm:$0xff]  ;;  %v8029_v29 = vcombine.high %v3840_v54, %v3844_v55 }
 0x691   :  { %7239 = vmatprep.subr.bf16.mxu1 %v7975_v25  ;;  %v3845_v0 = vld [vmem:[#allocation18 + $0x9b8] sm:$0xff]  ;;  %v8020_v25 = vcombine.low %v3832_v51, %v3836_v10 }
 0x692   :  { %v8031_v2 = vcombine.high %v3841_v60, %v3845_v0  ;;  %v8030_v57 = vcombine.low %v3841_v60, %v3845_v0  ;;  %v3896_v0 = vld [vmem:[#allocation18 + $0xb50] sm:$0xff] }
 0x693   :  { %7076 = vmatpush1.bf16.msra.mxu0 %v7972_v3  ;;  %v3852_v3 = vld [vmem:[#allocation18 + $0x9f0] sm:$0xff] }
 0x694   :  { %7240 = vmatpush1.bf16.msra.mxu1 %v7974_v4  ;;  %7086 = vmatprep.subr.bf16.mxu0 %v7981_v7  ;;  %v3849_v4 = vld [vmem:[#allocation18 + $0x9d8] sm:$0xff]  ;;  %v8037_v45 = vcombine.high %v3848_v42, %v3852_v3  ;;  %v8036_v15 = vcombine.low %v3848_v42, %v3852_v3 }
 0x695   :  { %7250 = vmatprep.subr.bf16.mxu1 %v7983_v12  ;;  %v3853_v7 = vld [vmem:[#allocation18 + $0x9f8] sm:$0xff]  ;;  %v8028_v12 = vcombine.low %v3840_v54, %v3844_v55 }
 0x696   :  { %7078 = vmatmul.mubr.bf16.vlgmr.msra.gmra.mrb[20].mxu0 %v9290_v59  ;;  %v8038_v43 = vcombine.low %v3849_v4, %v3853_v7 }
 0x697   :  { %7242 = vmatmul.mubr.bf16.vlgmr.msra.gmra.mrb[20].mxu1 %v9290_v59  ;;  %7087 = vmatpush1.bf16.msra.mxu0 %v7980_v18  ;;  %v7998_v59 = vcombine.low %v3809_v13, %v3813_v56  ;;  %v8039_v18 = vcombine.high %v3849_v4, %v3853_v7  ;;  %v3864_v56 = vld [vmem:[#allocation18 + $0xa50] sm:$0xff] }
 0x698   :  { %7118 = vmatprep.mubr.bf16.mxu0 %v9328_v19  ;;  %7251 = vmatpush1.bf16.msra.mxu1 %v7982_v23  ;;  %v3857_v23 = vld [vmem:[#allocation18 + $0xa18] sm:$0xff]  ;;  %v3904_v7 = vld [vmem:[#allocation18 + $0xb90] sm:$0xff] }
 0x699   :  { %7282 = vmatprep.mubr.bf16.mxu1 %v9328_v19  ;;  %7088 = vmatprep.subr.bf16.mxu0 %v7989_v41  ;;  %v8004_v19 = vcombine.low %v3816_v37, %v3820_v39  ;;  %v3861_v41 = vld [vmem:[#allocation18 + $0xa38] sm:$0xff] }
 0x69a   :  { %7252 = vmatprep.subr.bf16.mxu1 %v7991_v6  ;;  %v8045_v6 = vcombine.high %v3856_v58, %v3860_v28  ;;  %v8047_v13 = vcombine.high %v3857_v23, %v3861_v41  ;;  %v8046_v37 = vcombine.low %v3857_v23, %v3861_v41  ;;  %v3912_v41 = vld [vmem:[#allocation18 + $0xbd0] sm:$0xff] }
 0x69b   :  { %7089 = vmatpush1.bf16.msra.mxu0 %v7988_v5  ;;  %v3868_v5 = vld [vmem:[#allocation18 + $0xa70] sm:$0xff] }
 0x69c   :  { %7253 = vmatpush1.bf16.msra.mxu1 %v7990_v26  ;;  %7090 = vmatprep.subr.bf16.mxu0 %v7997_v34  ;;  %v3865_v26 = vld [vmem:[#allocation18 + $0xa58] sm:$0xff]  ;;  %v8053_v39 = vcombine.high %v3864_v56, %v3868_v5 }
 0x69d   :  { %7254 = vmatprep.subr.bf16.mxu1 %v7999_v35  ;;  %v3869_v34 = vld [vmem:[#allocation18 + $0xa78] sm:$0xff]  ;;  %v8044_v35 = vcombine.low %v3856_v58, %v3860_v28 }
 0x69e   :  { %v8055_v31 = vcombine.high %v3865_v26, %v3869_v34  ;;  %v8054_v14 = vcombine.low %v3865_v26, %v3869_v34  ;;  %v3920_v34 = vld [vmem:[#allocation18 + $0xc10] sm:$0xff] }
 0x69f   :  { %7091 = vmatpush1.bf16.msra.mxu0 %v7996_v44  ;;  %v3876_v44 = vld [vmem:[#allocation18 + $0xab0] sm:$0xff] }
 0x6a0   :  { %7255 = vmatpush1.bf16.msra.mxu1 %v7998_v59  ;;  %7092 = vmatprep.subr.bf16.mxu0 %v8005_v40  ;;  %v3873_v59 = vld [vmem:[#allocation18 + $0xa98] sm:$0xff]  ;;  %v8061_v9 = vcombine.high %v3872_v46, %v3876_v44 }
 0x6a1   :  { %7256 = vmatprep.subr.bf16.mxu1 %v8007_v27  ;;  %v3877_v40 = vld [vmem:[#allocation18 + $0xab8] sm:$0xff]  ;;  %v8052_v27 = vcombine.low %v3864_v56, %v3868_v5 }
 0x6a2   :  { %v8063_v36 = vcombine.high %v3873_v59, %v3877_v40  ;;  %v8062_v51 = vcombine.low %v3873_v59, %v3877_v40  ;;  %v3928_v40 = vld [vmem:[#allocation18 + $0xc50] sm:$0xff] }
 0x6a3   :  { %7093 = vmatpush1.bf16.msra.mxu0 %v8004_v19  ;;  %v3884_v19 = vld [vmem:[#allocation18 + $0xaf0] sm:$0xff] }
 0x6a4   :  { %7257 = vmatpush1.bf16.msra.mxu1 %v8006_v33  ;;  %7094 = vmatprep.subr.bf16.mxu0 %v8013_v47  ;;  %v3881_v33 = vld [vmem:[#allocation18 + $0xad8] sm:$0xff]  ;;  %v8069_v10 = vcombine.high %v3880_v38, %v3884_v19 }
 0x6a5   :  { %7258 = vmatprep.subr.bf16.mxu1 %v8015_v48  ;;  %v3885_v47 = vld [vmem:[#allocation18 + $0xaf8] sm:$0xff]  ;;  %v8060_v48 = vcombine.low %v3872_v46, %v3876_v44 }
 0x6a6   :  { %v8071_v61 = vcombine.high %v3881_v33, %v3885_v47  ;;  %v8070_v54 = vcombine.low %v3881_v33, %v3885_v47  ;;  %v3936_v33 = vld [vmem:[#allocation18 + $0xc90] sm:$0xff] }
 0x6a7   :  { %7095 = vmatpush1.bf16.msra.mxu0 %v8012_v63  ;;  %v3892_v63 = vld [vmem:[#allocation18 + $0xb30] sm:$0xff] }
 0x6a8   :  { %7259 = vmatpush1.bf16.msra.mxu1 %v8014_v22  ;;  %7096 = vmatprep.subr.bf16.mxu0 %v8021_v52  ;;  %v3889_v22 = vld [vmem:[#allocation18 + $0xb18] sm:$0xff]  ;;  %v8077_v55 = vcombine.high %v3888_v62, %v3892_v63  ;;  %v3940_v47 = vld [vmem:[#allocation18 + $0xcb0] sm:$0xff] }
 0x6a9   :  { %7260 = vmatprep.subr.bf16.mxu1 %v8023_v53  ;;  %v3893_v52 = vld [vmem:[#allocation18 + $0xb38] sm:$0xff]  ;;  %v8068_v53 = vcombine.low %v3880_v38, %v3884_v19 }
 0x6aa   :  { %v8079_v60 = vcombine.high %v3889_v22, %v3893_v52  ;;  %v8078_v42 = vcombine.low %v3889_v22, %v3893_v52  ;;  %v3944_v52 = vld [vmem:[#allocation18 + $0xcd0] sm:$0xff] }
 0x6ab   :  { %7097 = vmatpush1.bf16.msra.mxu0 %v8020_v25  ;;  %v3900_v25 = vld [vmem:[#allocation18 + $0xb70] sm:$0xff] }
 0x6ac   :  { %7261 = vmatpush1.bf16.msra.mxu1 %v8022_v24  ;;  %7098 = vmatprep.subr.bf16.mxu0 %v8029_v29  ;;  %v3897_v24 = vld [vmem:[#allocation18 + $0xb58] sm:$0xff]  ;;  %v8085_v3 = vcombine.high %v3896_v0, %v3900_v25 }
 0x6ad   :  { %7262 = vmatprep.subr.bf16.mxu1 %v8031_v2  ;;  %v3901_v29 = vld [vmem:[#allocation18 + $0xb78] sm:$0xff]  ;;  %v8076_v2 = vcombine.low %v3888_v62, %v3892_v63  ;;  %v8125_v63 = vcombine.high %v3936_v33, %v3940_v47 }
 0x6ae   :  { %v8087_v4 = vcombine.high %v3897_v24, %v3901_v29  ;;  %v8086_v58 = vcombine.low %v3897_v24, %v3901_v29  ;;  %v3952_v24 = vld [vmem:[#allocation18 + $0xd10] sm:$0xff] }
 0x6af   :  { %7099 = vmatpush1.bf16.msra.mxu0 %v8028_v12  ;;  %v3908_v12 = vld [vmem:[#allocation18 + $0xbb0] sm:$0xff] }
 0x6b0   :  { %7263 = vmatpush1.bf16.msra.mxu1 %v8030_v57  ;;  %7100 = vmatprep.subr.bf16.mxu0 %v8037_v45  ;;  %v3905_v57 = vld [vmem:[#allocation18 + $0xb98] sm:$0xff]  ;;  %v8093_v28 = vcombine.high %v3904_v7, %v3908_v12  ;;  %v3956_v29 = vld [vmem:[#allocation18 + $0xd30] sm:$0xff] }
 0x6b1   :  { %7264 = vmatprep.subr.bf16.mxu1 %v8039_v18  ;;  %v3909_v45 = vld [vmem:[#allocation18 + $0xbb8] sm:$0xff]  ;;  %v8084_v18 = vcombine.low %v3896_v0, %v3900_v25 }
 0x6b2   :  { %v8095_v23 = vcombine.high %v3905_v57, %v3909_v45  ;;  %v8094_v56 = vcombine.low %v3905_v57, %v3909_v45  ;;  %v3964_v57 = vld [vmem:[#allocation18 + $0xd70] sm:$0xff]  ;;  %v3961_v45 = vld [vmem:[#allocation18 + $0xd58] sm:$0xff] }
 0x6b3   :  { %7101 = vmatpush1.bf16.msra.mxu0 %v8036_v15  ;;  %v3916_v15 = vld [vmem:[#allocation18 + $0xbf0] sm:$0xff] }
 0x6b4   :  { %7265 = vmatpush1.bf16.msra.mxu1 %v8038_v43  ;;  %7102 = vmatprep.subr.bf16.mxu0 %v8045_v6  ;;  %v3913_v43 = vld [vmem:[#allocation18 + $0xbd8] sm:$0xff]  ;;  %v8101_v5 = vcombine.high %v3912_v41, %v3916_v15 }
 0x6b5   :  { %7266 = vmatprep.subr.bf16.mxu1 %v8047_v13  ;;  %v3917_v6 = vld [vmem:[#allocation18 + $0xbf8] sm:$0xff]  ;;  %v8092_v13 = vcombine.low %v3904_v7, %v3908_v12  ;;  %v3960_v12 = vld [vmem:[#allocation18 + $0xd50] sm:$0xff] }
 0x6b6   :  { %v8103_v26 = vcombine.high %v3913_v43, %v3917_v6  ;;  %v8102_v46 = vcombine.low %v3913_v43, %v3917_v6  ;;  %v3968_v43 = vld [vmem:[#allocation18 + $0xd90] sm:$0xff] }
 0x6b7   :  { %7103 = vmatpush1.bf16.msra.mxu0 %v8044_v35  ;;  %v3924_v35 = vld [vmem:[#allocation18 + $0xc30] sm:$0xff] }
 0x6b8   :  { %7267 = vmatpush1.bf16.msra.mxu1 %v8046_v37  ;;  %7104 = vmatprep.subr.bf16.mxu0 %v8053_v39  ;;  %v3921_v37 = vld [vmem:[#allocation18 + $0xc18] sm:$0xff]  ;;  %v8109_v44 = vcombine.high %v3920_v34, %v3924_v35  ;;  %v3972_v6 = vld [vmem:[#allocation18 + $0xdb0] sm:$0xff] }
 0x6b9   :  { %7268 = vmatprep.subr.bf16.mxu1 %v8055_v31  ;;  %v3925_v39 = vld [vmem:[#allocation18 + $0xc38] sm:$0xff]  ;;  %v8100_v31 = vcombine.low %v3912_v41, %v3916_v15  ;;  %v8149_v41 = vcombine.high %v3960_v12, %v3964_v57 }
 0x6ba   :  { %v8111_v59 = vcombine.high %v3921_v37, %v3925_v39  ;;  %v8110_v38 = vcombine.low %v3921_v37, %v3925_v39  ;;  %v8148_v37 = vcombine.low %v3960_v12, %v3964_v57  ;;  %v4001_v57 = vld [vmem:[#allocation18 + $0xe98] sm:$0xff] }
 0x6bb   :  { %7105 = vmatpush1.bf16.msra.mxu0 %v8052_v27  ;;  %v3932_v27 = vld [vmem:[#allocation18 + $0xc70] sm:$0xff] }
 0x6bc   :  { %7269 = vmatpush1.bf16.msra.mxu1 %v8054_v14  ;;  %7106 = vmatprep.subr.bf16.mxu0 %v8061_v9  ;;  %v8108_v14 = vcombine.low %v3920_v34, %v3924_v35  ;;  %v3929_v9 = vld [vmem:[#allocation18 + $0xc58] sm:$0xff]  ;;  %v8117_v19 = vcombine.high %v3928_v40, %v3932_v27 }
 0x6bd   :  { %7270 = vmatprep.subr.bf16.mxu1 %v8063_v36  ;;  %v3933_v36 = vld [vmem:[#allocation18 + $0xc78] sm:$0xff] }
 0x6be   :  { %v8118_v62 = vcombine.low %v3929_v9, %v3933_v36 }
 0x6bf   :  { %7107 = vmatpush1.bf16.msra.mxu0 %v8060_v48  ;;  %v8119_v48 = vcombine.high %v3929_v9, %v3933_v36  ;;  %v3977_v36 = vld [vmem:[#allocation18 + $0xdd8] sm:$0xff] }
 0x6c0   :  { %7271 = vmatpush1.bf16.msra.mxu1 %v8062_v51  ;;  %7108 = vmatprep.subr.bf16.mxu0 %v8069_v10  ;;  %v3937_v51 = vld [vmem:[#allocation18 + $0xc98] sm:$0xff] }
 0x6c1   :  { %7272 = vmatprep.subr.bf16.mxu1 %v8071_v61  ;;  %v3941_v10 = vld [vmem:[#allocation18 + $0xcb8] sm:$0xff]  ;;  %v8116_v61 = vcombine.low %v3928_v40, %v3932_v27 }
 0x6c2   :  { %v8127_v22 = vcombine.high %v3937_v51, %v3941_v10 }
 0x6c3   :  { %7109 = vmatpush1.bf16.msra.mxu0 %v8068_v53  ;;  %v3948_v53 = vld [vmem:[#allocation18 + $0xcf0] sm:$0xff] }
 0x6c4   :  { %7273 = vmatpush1.bf16.msra.mxu1 %v8070_v54  ;;  %7110 = vmatprep.subr.bf16.mxu0 %v8077_v55  ;;  %v3945_v54 = vld [vmem:[#allocation18 + $0xcd8] sm:$0xff]  ;;  %v8133_v0 = vcombine.high %v3944_v52, %v3948_v53 }
 0x6c5   :  { %7274 = vmatprep.subr.bf16.mxu1 %v8079_v60  ;;  %v3949_v55 = vld [vmem:[#allocation18 + $0xcf8] sm:$0xff]  ;;  %v8124_v60 = vcombine.low %v3936_v33, %v3940_v47  ;;  %v8156_v47 = vcombine.low %v3968_v43, %v3972_v6 }
 0x6c6   :  { %v8135_v25 = vcombine.high %v3945_v54, %v3949_v55 }
 0x6c7   :  { %7111 = vmatpush1.bf16.msra.mxu0 %v8076_v2  ;;  %v3953_v2 = vld [vmem:[#allocation18 + $0xd18] sm:$0xff] }
 0x6c8   :  { %7275 = vmatpush1.bf16.msra.mxu1 %v8078_v42  ;;  %7112 = vmatprep.subr.bf16.mxu0 %v8085_v3  ;;  %v3957_v42 = vld [vmem:[#allocation18 + $0xd38] sm:$0xff]  ;;  %v8134_v3 = vcombine.low %v3945_v54, %v3949_v55 }
 0x6c9   :  { %7276 = vmatprep.subr.bf16.mxu1 %v8087_v4  ;;  %v8141_v4 = vcombine.high %v3952_v24, %v3956_v29  ;;  %v8143_v7 = vcombine.high %v3953_v2, %v3957_v42 }
 0x6cb   :  { %7113 = vmatpush1.bf16.msra.mxu0 %v8084_v18  ;;  %v3965_v18 = vld [vmem:[#allocation18 + $0xd78] sm:$0xff] }
 0x6cc   :  { %7277 = vmatpush1.bf16.msra.mxu1 %v8086_v58  ;;  %7114 = vmatprep.subr.bf16.mxu0 %v8093_v28  ;;  %v8140_v58 = vcombine.low %v3952_v24, %v3956_v29  ;;  %v9361_v28 = vld [vmem:[#allocation20] sm:$0xff]  ;;  %v8151_v15 = vcombine.high %v3961_v45, %v3965_v18  ;;  %v8150_v39 = vcombine.low %v3961_v45, %v3965_v18  ;;  %v3993_v24 = vld [vmem:[#allocation18 + $0xe58] sm:$0xff] }
 0x6cd   :  { %7278 = vmatprep.subr.bf16.mxu1 %v8095_v23  ;;  %v8142_v23 = vcombine.low %v3953_v2, %v3957_v42  ;;  %v4055_v34 = vrot.slane %v9361_v28, %v9029_v30  ;;  %v4063_v35 = vrot.slane %v9361_v28, %v9032_v32  ;;  %v3981_v30 = vld [vmem:[#allocation18 + $0xdf8] sm:$0xff] }
 0x6ce   :  { %v8166_v55 = vcombine.low %v3977_v36, %v3981_v30  ;;  %v3997_v29 = vld [vmem:[#allocation18 + $0xe78] sm:$0xff] }
 0x6cf   :  { %7115 = vmatpush1.bf16.msra.mxu0 %v8092_v13  ;;  %v4051_v13 = vrot.slane %v9361_v28, %v9018_v16  ;;  %v4005_v45 = vld [vmem:[#allocation18 + $0xeb8] sm:$0xff] }
 0x6d0   :  { %7279 = vmatpush1.bf16.msra.mxu1 %v8094_v56  ;;  %7116 = vmatprep.subr.bf16.mxu0 %v8101_v5  ;;  %v4059_v56 = vrot.slane %v9361_v28, %v9021_v17  ;;  %v3969_v5 = vld [vmem:[#allocation18 + $0xd98] sm:$0xff]  ;;  %v3980_v17 = vld [vmem:[#allocation18 + $0xdf0] sm:$0xff] }
 0x6d1   :  { %7280 = vmatprep.subr.bf16.mxu1 %v8103_v26  ;;  %v3973_v26 = vld [vmem:[#allocation18 + $0xdb8] sm:$0xff] }
 0x6d2   :  { %v8159_v16 = vcombine.high %v3969_v5, %v3973_v26 }
 0x6d3   :  { %7117 = vmatpush1.bf16.msra.mxu0 %v8100_v31  ;;  %v8157_v31 = vcombine.high %v3968_v43, %v3972_v6  ;;  %v8191_v6 = vcombine.high %v4001_v57, %v4005_v45 }
 0x6d4   :  { %7281 = vmatpush1.bf16.msra.mxu1 %v8102_v46  ;;  %7127 = vmatprep.subr.bf16.mxu0 %v8109_v44 }
 0x6d5   :  { %7291 = vmatprep.subr.bf16.mxu1 %v8111_v59  ;;  %v3976_v59 = vld [vmem:[#allocation18 + $0xdd0] sm:$0xff] }
 0x6d6   :  { %7119 = vmatmul.mubr.bf16.vlgmr.msra.gmra.mrb[20].mxu0 %v9330_v1  ;;  %v8164_v54 = vcombine.low %v3976_v59, %v3980_v17 }
 0x6d7   :  { %7283 = vmatmul.mubr.bf16.vlgmr.msra.gmra.mrb[20].mxu1 %v9330_v1  ;;  %7128 = vmatpush1.bf16.msra.mxu0 %v8108_v14  ;;  %v8126_v1 = vcombine.low %v3937_v51, %v3941_v10  ;;  %v8158_v10 = vcombine.low %v3969_v5, %v3973_v26  ;;  %v4009_v5 = vld [vmem:[#allocation18 + $0xed8] sm:$0xff] }
 0x6d8   :  { %7159 = vmatprep.mubr.bf16.mxu0 %v9336_v11  ;;  %7292 = vmatpush1.bf16.msra.mxu1 %v8110_v38  ;;  %v4013_v26 = vld [vmem:[#allocation18 + $0xef8] sm:$0xff] }
 0x6d9   :  { %7323 = vmatprep.mubr.bf16.mxu1 %v9336_v11  ;;  %7129 = vmatprep.subr.bf16.mxu0 %v8117_v19  ;;  %v8132_v11 = vcombine.low %v3944_v52, %v3948_v53  ;;  %v3985_v52 = vld [vmem:[#allocation18 + $0xe18] sm:$0xff] }
 0x6da   :  { %7293 = vmatprep.subr.bf16.mxu1 %v8119_v48  ;;  %v3989_v53 = vld [vmem:[#allocation18 + $0xe38] sm:$0xff] }
 0x6db   :  { %7130 = vmatpush1.bf16.msra.mxu0 %v8116_v61  ;;  %v8165_v61 = vcombine.high %v3976_v59, %v3980_v17  ;;  %v8174_v42 = vcombine.low %v3985_v52, %v3989_v53  ;;  %v8198_v17 = vcombine.low %v4009_v5, %v4013_v26 }
 0x6dc   :  { %7294 = vmatpush1.bf16.msra.mxu1 %v8118_v62  ;;  %7131 = vmatprep.subr.bf16.mxu0 %v8125_v63  ;;  %v8167_v62 = vcombine.high %v3977_v36, %v3981_v30  ;;  %v3984_v63 = vld [vmem:[#allocation18 + $0xe10] sm:$0xff]  ;;  %v4025_v36 = vld [vmem:[#allocation18 + $0xf58] sm:$0xff] }
 0x6dd   :  { %7295 = vmatprep.subr.bf16.mxu1 %v8127_v22  ;;  %v3988_v22 = vld [vmem:[#allocation18 + $0xe30] sm:$0xff]  ;;  %v4029_v30 = vld [vmem:[#allocation18 + $0xf78] sm:$0xff] }
 0x6de   :  { %v8172_v2 = vcombine.low %v3984_v63, %v3988_v22 }
 0x6df   :  { %7132 = vmatpush1.bf16.msra.mxu0 %v8124_v60  ;;  %v8173_v60 = vcombine.high %v3984_v63, %v3988_v22 }
 0x6e0   :  { %7296 = vmatpush1.bf16.msra.mxu1 %v8126_v1  ;;  %7133 = vmatprep.subr.bf16.mxu0 %v8133_v0  ;;  %v8175_v1 = vcombine.high %v3985_v52, %v3989_v53  ;;  %v3992_v0 = vld [vmem:[#allocation18 + $0xe50] sm:$0xff] }
 0x6e1   :  { %7297 = vmatprep.subr.bf16.mxu1 %v8135_v25  ;;  %v3996_v25 = vld [vmem:[#allocation18 + $0xe70] sm:$0xff] }
 0x6e2   :  { %v4040_v52 = vld [vmem:[#allocation18 + $0xfd0] sm:$0xff] }
 0x6e3   :  { %7134 = vmatpush1.bf16.msra.mxu0 %v8132_v11  ;;  %v8181_v11 = vcombine.high %v3992_v0, %v3996_v25  ;;  %v4044_v53 = vld [vmem:[#allocation18 + $0xff0] sm:$0xff] }
 0x6e4   :  { %7298 = vmatpush1.bf16.msra.mxu1 %v8134_v3  ;;  %7135 = vmatprep.subr.bf16.mxu0 %v8141_v4  ;;  %v8183_v3 = vcombine.high %v3993_v24, %v3997_v29  ;;  %v4000_v4 = vld [vmem:[#allocation18 + $0xe90] sm:$0xff] }
 0x6e5   :  { %7299 = vmatprep.subr.bf16.mxu1 %v8143_v7  ;;  %v4004_v7 = vld [vmem:[#allocation18 + $0xeb0] sm:$0xff] }
 0x6e7   :  { %7136 = vmatpush1.bf16.msra.mxu0 %v8140_v58  ;;  %v8180_v58 = vcombine.low %v3992_v0, %v3996_v25  ;;  %v8229_v0 = vcombine.high %v4040_v52, %v4044_v53 }
 0x6e8   :  { %7300 = vmatpush1.bf16.msra.mxu1 %v8142_v23  ;;  %7137 = vmatprep.subr.bf16.mxu0 %v8149_v41  ;;  %v8182_v41 = vcombine.low %v3993_v24, %v3997_v29  ;;  %v8228_v24 = vcombine.low %v4040_v52, %v4044_v53 }
 0x6e9   :  { %v6833_v46 = vpop.f32.mrb[16].mxu0  ;;  %v6997_v44 = vpop.f32.mrb[16].mxu1  ;;  %7301 = vmatprep.subr.bf16.mxu1 %v8151_v15  ;;  %v8189_v15 = vcombine.high %v4000_v4, %v4004_v7 }
 0x6ea   :  { %v8255_v40 = vadd.f32 %v6833_v46, %v4051_v13  ;;  %v8257_v27 = vadd.f32 %v6997_v44, %v4059_v56  ;;  %v6835_v14 = vpop.f32.mrb[17].mxu0  ;;  %v6999_v9 = vpop.f32.mrb[17].mxu1  ;;  %v4008_v13 = vld [vmem:[#allocation18 + $0xed0] sm:$0xff]  ;;  %v4017_v44 = vld [vmem:[#allocation18 + $0xf18] sm:$0xff] }
 0x6eb   :  { %v8256_v38 = vadd.f32 %v6835_v14, %v4055_v34  ;;  %v8258_v19 = vadd.f32 %v6999_v9, %v4063_v35  ;;  %v6837_v32 = vpop.f32.mrb[18].mxu0  ;;  %v7001_v33 = vpop.f32.mrb[18].mxu1  ;;  %7138 = vmatpush1.bf16.msra.mxu0 %v8148_v37  ;;  %v4012_v56 = vld [vmem:[#allocation18 + $0xef0] sm:$0xff]  ;;  %v8188_v34 = vcombine.low %v4000_v4, %v4004_v7  ;;  %v8190_v35 = vcombine.low %v4001_v57, %v4005_v45 }
 0x6ec   :  { %8501 = vtanh.f32 %v8255_v40  ;;  %7302 = vmatpush1.bf16.msra.mxu1 %v8150_v39  ;;  %v6838_v48 = vpop.f32.mrb[19].mxu0  ;;  %v7002_v51 = vpop.f32.mrb[19].mxu1  ;;  %7139 = vmatprep.subr.bf16.mxu0 %v8157_v31  ;;  %v8197_v37 = vcombine.high %v4008_v13, %v4012_v56  ;;  %v8199_v39 = vcombine.high %v4009_v5, %v4013_v26  ;;  %v4016_v31 = vld [vmem:[#allocation18 + $0xf10] sm:$0xff]  ;;  %v8196_v59 = vcombine.low %v4008_v13, %v4012_v56 }
 0x6ed   :  { %8503 = vtanh.f32 %v8257_v27  ;;  %7303 = vmatprep.subr.bf16.mxu1 %v8159_v16  ;;  %v4020_v46 = vld [vmem:[#allocation18 + $0xf30] sm:$0xff]  ;;  %v4021_v16 = vld [vmem:[#allocation18 + $0xf38] sm:$0xff]  ;;  %v8215_v33 = vcombine.high %v4025_v36, %v4029_v30 }
 0x6ee   :  { %8505 = vtanh.f32 %v8256_v38  ;;  %v8205_v40 = vcombine.high %v4016_v31, %v4020_v46  ;;  %v8207_v27 = vcombine.high %v4017_v44, %v4021_v16  ;;  %v4024_v14 = vld [vmem:[#allocation18 + $0xf50] sm:$0xff]  ;;  %v8204_v38 = vcombine.low %v4016_v31, %v4020_v46  ;;  %v4033_v51 = vld [vmem:[#allocation18 + $0xf98] sm:$0xff] }
 0x6ef   :  { %8507 = vtanh.f32 %v8258_v19  ;;  %7140 = vmatpush1.bf16.msra.mxu0 %v8156_v47  ;;  %v4028_v9 = vld [vmem:[#allocation18 + $0xf70] sm:$0xff]  ;;  %v8206_v19 = vcombine.low %v4017_v44, %v4021_v16 }
 0x6f0   :  { %7304 = vmatpush1.bf16.msra.mxu1 %v8158_v10  ;;  %7141 = vmatprep.subr.bf16.mxu0 %v8165_v61  ;;  %v8213_v32 = vcombine.high %v4024_v14, %v4028_v9  ;;  %v4032_v47 = vld [vmem:[#allocation18 + $0xf90] sm:$0xff]  ;;  %v4037_v10 = vld [vmem:[#allocation18 + $0xfb8] sm:$0xff]  ;;  %v8212_v61 = vcombine.low %v4024_v14, %v4028_v9 }
 0x6f1   :  { %7305 = vmatprep.subr.bf16.mxu1 %v8167_v62  ;;  %v4036_v48 = vld [vmem:[#allocation18 + $0xfb0] sm:$0xff]  ;;  %v8214_v62 = vcombine.low %v4025_v36, %v4029_v30  ;;  %v8223_v22 = vcombine.high %v4033_v51, %v4037_v10 }
 0x6f2   :  { %v8221_v63 = vcombine.high %v4032_v47, %v4036_v48 }
 0x6f3   :  { %7142 = vmatpush1.bf16.msra.mxu0 %v8164_v54  ;;  %v4041_v54 = vld [vmem:[#allocation18 + $0xfd8] sm:$0xff] }
 0x6f4   :  { %7306 = vmatpush1.bf16.msra.mxu1 %v8166_v55  ;;  %7143 = vmatprep.subr.bf16.mxu0 %v8173_v60  ;;  %v4045_v55 = vld [vmem:[#allocation18 + $0xff8] sm:$0xff]  ;;  %v8220_v60 = vcombine.low %v4032_v47, %v4036_v48 }
 0x6f5   :  { %7307 = vmatprep.subr.bf16.mxu1 %v8175_v1  ;;  %v8222_v1 = vcombine.low %v4033_v51, %v4037_v10  ;;  %v8231_v25 = vcombine.high %v4041_v54, %v4045_v55  ;;  %v8230_v29 = vcombine.low %v4041_v54, %v4045_v55 }
 0x6f6   :  { %v8502_v12 = vpop.eup %8501 }
 0x6f7   :  { %v8504_v18 = vpop.eup %8503  ;;  %7340 = vst [vmem:[#allocation21] sm:$0xff] %v8502_v12  ;;  %7144 = vmatpush1.bf16.msra.mxu0 %v8172_v2  ;;  %v4067_v2 = vrot.slane %v9361_v28, %v9089_v49 }
 0x6f8   :  { %v8506_v23 = vpop.eup %8505  ;;  %7342 = vst [vmem:[#allocation21 + $0x10] sm:$0xff] %v8504_v18  ;;  %7308 = vmatpush1.bf16.msra.mxu1 %v8174_v42  ;;  %7145 = vmatprep.subr.bf16.mxu0 %v8181_v11  ;;  %v4075_v42 = vrot.slane %v9361_v28, %v9092_v50  ;;  %v4071_v11 = vrot.slane %v9361_v28, %v9116_v21 }
 0x6f9   :  { %v8508_v43 = vpop.eup %8507  ;;  %7341 = vst [vmem:[#allocation21 + $0x8] sm:$0xff] %v8506_v23  ;;  %7309 = vmatprep.subr.bf16.mxu1 %v8183_v3  ;;  %v4079_v3 = vrot.slane %v9361_v28, %v9113_v20 }
 0x6fa   :  { %7343 = vst [vmem:[#allocation21 + $0x18] sm:$0xff] %v8508_v43 }
 0x6fb   :  { %7146 = vmatpush1.bf16.msra.mxu0 %v8180_v58 }
 0x6fc   :  { %7310 = vmatpush1.bf16.msra.mxu1 %v8182_v41  ;;  %7147 = vmatprep.subr.bf16.mxu0 %v8189_v15 }
 0x6fd   :  { %7311 = vmatprep.subr.bf16.mxu1 %v8191_v6 }
 0x6ff   :  { %7148 = vmatpush1.bf16.msra.mxu0 %v8188_v34 }
 0x700   :  { %7312 = vmatpush1.bf16.msra.mxu1 %v8190_v35  ;;  %7149 = vmatprep.subr.bf16.mxu0 %v8197_v37 }
 0x701   :  { %7313 = vmatprep.subr.bf16.mxu1 %v8199_v39 }
 0x703   :  { %7150 = vmatpush1.bf16.msra.mxu0 %v8196_v59 }
 0x704   :  { %7314 = vmatpush1.bf16.msra.mxu1 %v8198_v17  ;;  %7151 = vmatprep.subr.bf16.mxu0 %v8205_v40 }
 0x705   :  { %7315 = vmatprep.subr.bf16.mxu1 %v8207_v27 }
 0x707   :  { %7152 = vmatpush1.bf16.msra.mxu0 %v8204_v38 }
 0x708   :  { %7316 = vmatpush1.bf16.msra.mxu1 %v8206_v19  ;;  %7153 = vmatprep.subr.bf16.mxu0 %v8213_v32 }
 0x709   :  { %7317 = vmatprep.subr.bf16.mxu1 %v8215_v33 }
 0x70b   :  { %7154 = vmatpush1.bf16.msra.mxu0 %v8212_v61 }
 0x70c   :  { %7318 = vmatpush1.bf16.msra.mxu1 %v8214_v62  ;;  %7155 = vmatprep.subr.bf16.mxu0 %v8221_v63 }
 0x70d   :  { %7319 = vmatprep.subr.bf16.mxu1 %v8223_v22 }
 0x70f   :  { %7156 = vmatpush1.bf16.msra.mxu0 %v8220_v60 }
 0x710   :  { %7320 = vmatpush1.bf16.msra.mxu1 %v8222_v1  ;;  %7157 = vmatprep.subr.bf16.mxu0 %v8229_v0 }
 0x711   :  { %7321 = vmatprep.subr.bf16.mxu1 %v8231_v25 }
 0x713   :  { %7158 = vmatpush1.bf16.msra.mxu0 %v8228_v24 }
 0x714   :  { %7322 = vmatpush1.bf16.msra.mxu1 %v8230_v29 }
 0x716   :  { %7160 = vmatmul.mubr.bf16.vlgmr.msra.gmra.mrb[20].mxu0 %v9343_v8 }
 0x717   :  { %7324 = vmatmul.mubr.bf16.vlgmr.msra.gmra.mrb[20].mxu1 %v9343_v8 }
 0x7e9   :  { %v7161_v4 = vpop.f32.mrb[20].mxu0 }
 0x7ea   :  { %v8259_v7 = vadd.f32 %v7161_v4, %v4067_v2  ;;  %v7325_v12 = vpop.f32.mrb[20].mxu1  ;;  %v7163_v57 = vpop.f32.mrb[21].mxu0 }
 0x7eb   :  { %v8261_v45 = vadd.f32 %v7325_v12, %v4075_v42  ;;  %v8260_v18 = vadd.f32 %v7163_v57, %v4071_v11  ;;  %v7327_v58 = vpop.f32.mrb[21].mxu1  ;;  %v7165_v8 = vpop.f32.mrb[22].mxu0 }
 0x7ec   :  { %8509 = vtanh.f32 %v8259_v7  ;;  %v8262_v23 = vadd.f32 %v7327_v58, %v4079_v3  ;;  %v7329_v49 = vpop.f32.mrb[22].mxu1  ;;  %v7166_v41 = vpop.f32.mrb[23].mxu0 }
 0x7ed   :  { %8511 = vtanh.f32 %v8261_v45  ;;  %v7330_v50 = vpop.f32.mrb[23].mxu1 }
 0x7ee   :  { %8513 = vtanh.f32 %v8260_v18 }
 0x7ef   :  { %8515 = vtanh.f32 %v8262_v23 }
 0x7f6   :  { %v8510_v21 = vpop.eup %8509 }
 0x7f7   :  { %v8512_v20 = vpop.eup %8511  ;;  %7344 = vst [vmem:[#allocation21 + $0x20] sm:$0xff] %v8510_v21 }
 0x7f8   :  { %v8514_v28 = vpop.eup %8513  ;;  %7346 = vst [vmem:[#allocation21 + $0x30] sm:$0xff] %v8512_v20 }
 0x7f9   :  { %v8516_v15 = vpop.eup %8515  ;;  %7345 = vst [vmem:[#allocation21 + $0x28] sm:$0xff] %v8514_v28 }
 0x7fa   :  { %7347 = vst [vmem:[#allocation21 + $0x38] sm:$0xff] %v8516_v15 }
 0x7fb   :  { %8770 = shalt.err (!%p8767_p8)
}
 0x7fc   :  { %s8771_s4 = scalar_lea.hbm %s9404_s11, 1024 }
 0x7fd   :  { %p8772_p9 = scmp.ne.s32.totalorder %s9404_s11, %s8771_s4  ;;  %p8775_p10 = scmp.lt.u32.totalorder %s8771_s4, %s9404_s11 }
 0x7ff   :  { %p8777_p11 = pnand %p8775_p10, %p8772_p9 }
 0x801   :  { %8780 = shalt.err (!%p8777_p11)
}
 0x802   :  { %7357 = dma.vmem_to_hbm [thread:$0]  %s7355_s20, 1024, %s9404_s11, [#allocation5]  }
 0x803   :  { %8793 = dma.done.wait [#allocation5], 1024  }
 0x804   :  { %8794 = vsyncadd [#allocation5], 4294966272 }
 0x805   :  { %7361 = vsyncpa [#allocation4], 1 }
 0x806   :  { %7362 = vsyncpa [#allocation7], 1 }
 0x807   :  { %7363 = vsyncpa [#allocation10], 1 }
 0x808   :  { %7364 = vsyncpa [#allocation13], 1 }
 0x809   :  { %7365 = vsyncpa [#allocation16], 1 }
 0x80a   :  { %7366 = vsyncpa [#allocation19], 1 }
 0x80b   :  { %7367 = vsyncpa [#allocation5], 1 }

</bundles_post_ra>
